<compile_context>
chip_gen: v5e
topology: v5e:2x2
jax: 0.10.0
libtpu: 0.0.40
codegen_flags: <defaults>
</compile_context>

<pallas_src>
import jax
import jax.numpy as jnp
from jax import lax
from jax.experimental import pallas as pl
from jax.experimental.pallas import tpu as pltpu


def _elu(v):
    # ELU(alpha=1): x if x > 0 else exp(x) - 1
    return jnp.where(v > 0, v, jnp.exp(jnp.minimum(v, 0.0)) - 1.0)


def eegnet_kernel(x_ref, aw_ref, bw_ref, p1m_ref, p2m_ref, wfc_ref, ab_ref,
                  fcb_ref, out_ref, x1_s, x2_s, feat_s):
    Bb, C_in, L = x_ref.shape
    F2, KC1 = aw_ref.shape            # (32, K1*C_in)
    K1 = KC1 // C_in
    KC2 = bw_ref.shape[1]             # K2*32
    K2 = KC2 // F2
    L1u = x1_s.shape[1]               # lane-aligned temporal-conv output length
    L2u = x2_s.shape[1]               # lane-aligned separable-conv output length
    T2 = p2m_ref.shape[0]
    pad1 = K1 // 2

    aw = aw_ref[...]                  # folded temporal conv + BN1 + depthwise + BN2
    bw = bw_ref[...]                  # folded separable conv + BN3
    p1m = p1m_ref[...]                # AvgPool(4) fused with zero-pad(8): (L1u, Lp1+16)
    p2m = p2m_ref[...]                # AvgPool(8), transposed: (T2, L2u)
    a_b = ab_ref[:, 0:1]              # (32, 1) folded stage-1 bias
    b_b = ab_ref[:, 1:2]              # (32, 1) folded stage-2 bias

    # Zero once per grid step: only the (static) zero-padding border of the im2col
    # matrix relies on it; the data regions are fully overwritten for every sample.
    x1_s[...] = jnp.zeros_like(x1_s)

    for b in range(Bb):
        xb = x_ref[b]                                        # (C_in, L)

        # ---- temporal-conv im2col (conv zero padding folded in) ----
        for k in range(K1):
            off = k - pad1
            src_lo = max(0, off)
            src_hi = min(L, off + L1u)
            width = src_hi - src_lo
            if width > 0:
                dst_lo = src_lo - off
                x1_s[k * C_in:(k + 1) * C_in, dst_lo:dst_lo + width] = \
                    xb[:, src_lo:src_hi]

        # temporal conv + BN + depthwise conv + BN (all folded) + ELU: one 256-deep dot
        h2 = jnp.dot(aw, x1_s[...], preferred_element_type=jnp.float32)   # (32, L1u)
        h2 = _elu(h2 + a_b)
        # Dropout(0.5): identity in eval mode

        # AvgPool1d(4) fused with the zero-padding(8) of the separable conv
        h2p = jnp.dot(h2, p1m, preferred_element_type=jnp.float32)        # (32, Lp1+16)

        # ---- separable-conv im2col ----
        for k in range(K2):
            x2_s[k * F2:(k + 1) * F2, :] = h2p[:, k:k + L2u]

        # separable conv + BN (folded) + ELU: one 512-deep dot
        h3 = jnp.dot(bw, x2_s[...], preferred_element_type=jnp.float32)   # (32, L2u)
        h3 = _elu(h3 + b_b)
        # Dropout(0.5): identity in eval mode

        # AvgPool1d(8) fused with the channel/time transpose -> (T2, 32)
        p2t = jnp.dot(p2m, h3.T, preferred_element_type=jnp.float32)

        # scatter this sample's features as a lane-dense row (order t*32 + c,
        # matched by the host-side fc-weight layout)
        for t in range(T2):
            feat_s[b:b + 1, t * F2:(t + 1) * F2] = p2t[t:t + 1, :]

    # ---- fully-connected layer for the whole block: (Bb, 32*T2) x (32*T2, NC) ----
    out_ref[...] = (jnp.dot(feat_s[...], wfc_ref[...],
                            preferred_element_type=jnp.float32)
                    + fcb_ref[...]).astype(out_ref.dtype)


def _pick_batch_block(B):
    if B <= 8:
        return B
    for cand in (16, 8):
        if B % cand == 0:
            return cand
    return B


def eegnet_forward(x, kern):
    B, C_in, L = x.shape
    KC1 = kern["aw"].shape[1]
    K1 = KC1 // C_in
    L1 = L + 2 * (K1 // 2) - K1 + 1          # temporal-conv output length
    L1u = (L1 // 4) * 4                      # columns consumed by AvgPool(4)
    KC2 = kern["bw"].shape[1]
    L2u = kern["p2m"].shape[1]
    FC_IN, NC = kern["wfc"].shape
    Bb = _pick_batch_block(B)
    assert B % Bb == 0

    args = (x, kern["aw"], kern["bw"], kern["p1m"], kern["p2m"], kern["wfc"],
            kern["ab"], kern["fcb"])

    in_specs = [pl.BlockSpec((Bb, C_in, L), lambda i: (i, 0, 0))]
    for a in args[1:]:
        nd = a.ndim
        in_specs.append(pl.BlockSpec(a.shape, lambda i, nd=nd: (0,) * nd))

    out = pl.pallas_call(
        eegnet_kernel,
        out_shape=jax.ShapeDtypeStruct((B, NC), jnp.float32),
        grid=(B // Bb,),
        in_specs=in_specs,
        out_specs=pl.BlockSpec((Bb, NC), lambda i: (i, 0)),
        scratch_shapes=[
            pltpu.VMEM((KC1, L1u), jnp.float32),    # temporal-conv im2col
            pltpu.VMEM((KC2, L2u), jnp.float32),    # separable-conv im2col
            pltpu.VMEM((Bb, FC_IN), jnp.float32),   # block feature matrix
        ],
        compiler_params=pltpu.CompilerParams(dimension_semantics=("parallel",)),
    )(*args)
    return out


def init_params(key, num_channels, num_samples, num_classes):
    eps = 1e-5
    f32 = jnp.float32
    K1, K2 = 64, 16
    pad1, pad2 = K1 // 2, K2 // 2
    L1 = num_samples + 2 * pad1 - K1 + 1     # = num_samples + 1
    L1u = (L1 // 4) * 4
    Lp1 = L1 // 4
    L2 = Lp1 + 2 * pad2 - K2 + 1             # = Lp1 + 1
    L2u = (L2 // 8) * 8
    T2 = L2 // 8
    fc_in = 32 * (num_samples // 32)         # fc in_features exactly as in the torch module
    assert fc_in == 32 * T2, "num_samples must keep the torch fc size consistent"

    ks = jax.random.split(key, 8)

    def bn_fold(k, C):
        kg, kb, km, kv = jax.random.split(k, 4)
        gamma = 1.0 + 0.1 * jax.random.normal(kg, (C,), f32)
        beta = 0.1 * jax.random.normal(kb, (C,), f32)
        mean = 0.1 * jax.random.normal(km, (C,), f32)
        var = jax.random.uniform(kv, (C,), f32, minval=0.5, maxval=1.5)
        scale = gamma / jnp.sqrt(var + eps)
        bias = beta - mean * scale
        return scale, bias

    w1 = 0.1 * jax.random.normal(ks[0], (16, num_channels, K1), f32)
    s1, b1 = bn_fold(ks[1], 16)
    wdw_raw = 0.1 * jax.random.normal(ks[2], (32, 1, 1), f32)   # groups=16, k=1
    s2, b2 = bn_fold(ks[3], 32)
    ws = 0.1 * jax.random.normal(ks[4], (32, 32, K2), f32)
    s3, b3 = bn_fold(ks[5], 32)
    wfc = 0.1 * jax.random.normal(ks[6], (num_classes, fc_in), f32)
    fcb = 0.1 * jax.random.normal(ks[7], (num_classes,), f32)

    # ---- fold the linear chain into kernel-friendly operands ----
    # temporal-conv im2col row order is k*C_in + c
    w1_flat = jnp.transpose(w1, (0, 2, 1)).reshape(16, K1 * num_channels)
    # grouped 1x1 conv (16 -> 32, groups=16) as a dense (32, 16) matrix
    wdw_dense = wdw_raw[:, 0, 0][:, None] * jax.nn.one_hot(
        jnp.arange(32) // 2, 16, dtype=f32)
    aw = (s2[:, None] * wdw_dense * s1[None, :]) @ w1_flat      # (32, K1*C_in)
    ab = s2 * (wdw_dense @ b1) + b2                             # (32,)

    # separable-conv im2col row order is k*32 + c
    ws_flat = jnp.transpose(ws, (0, 2, 1)).reshape(32, K2 * 32)
    bw = s3[:, None] * ws_flat                                  # (32, K2*32)
    bb = b3                                                     # (32,)

    # AvgPool1d(4) fused with the zero-pad(8) of the separable conv: (L1u, Lp1+16)
    rows1 = jnp.arange(L1u)
    p1m = jnp.zeros((L1u, Lp1 + 2 * pad2), f32).at[rows1, pad2 + rows1 // 4].set(0.25)
    # AvgPool1d(8), transposed so it also moves channels onto lanes: (T2, L2u)
    rows2 = jnp.arange(L2u)
    p2m = jnp.zeros((T2, L2u), f32).at[rows2 // 8, rows2].set(1.0 / 8.0)

    # fc weight with rows in feature order t*32 + c (matches the in-kernel flatten)
    wfct = jnp.transpose(wfc.reshape(num_classes, 32, T2), (2, 1, 0)
                         ).reshape(T2 * 32, num_classes)

    kern = dict(aw=aw, bw=bw, p1m=p1m, p2m=p2m, wfc=wfct,
                ab=jnp.stack([ab, bb], axis=1),                 # (32, 2)
                fcb=fcb.reshape(1, num_classes))
    ref = dict(w1=w1, s1=s1, b1=b1, wdw_raw=wdw_raw, s2=s2, b2=b2,
               ws=ws, s3=s3, b3=b3, wfc=wfc, fcb=fcb)
    return dict(kern=kern, ref=ref)


def ref_forward(x, ref):
    """Pure-JAX (XLA) reference with identical eval-mode semantics."""
    dn = ("NCH", "OIH", "NCH")
    y = lax.conv_general_dilated(x, ref["w1"], (1,), [(32, 32)], dimension_numbers=dn)
    y = y * ref["s1"][None, :, None] + ref["b1"][None, :, None]
    y = lax.conv_general_dilated(y, ref["wdw_raw"], (1,), [(0, 0)],
                                 dimension_numbers=dn, feature_group_count=16)
    y = jax.nn.elu(y * ref["s2"][None, :, None] + ref["b2"][None, :, None])
    B, C, Ln = y.shape
    y = y[:, :, :(Ln // 4) * 4].reshape(B, C, Ln // 4, 4).mean(-1)
    y = lax.conv_general_dilated(y, ref["ws"], (1,), [(8, 8)], dimension_numbers=dn)
    y = jax.nn.elu(y * ref["s3"][None, :, None] + ref["b3"][None, :, None])
    B, C, Ln = y.shape
    y = y[:, :, :(Ln // 8) * 8].reshape(B, C, Ln // 8, 8).mean(-1)
    flat = y.reshape(B, -1)
    return flat @ ref["wfc"].T + ref["fcb"][None, :]


if __name__ == "__main__":
    # Small shapes consistent with the module: batch=2, channels=4, samples=128, classes=10.
    B, C_IN, L, NC = 2, 4, 128, 10
    key = jax.random.PRNGKey(0)
    k_x, k_p = jax.random.split(key)
    x = jax.random.normal(k_x, (B, C_IN, L), jnp.float32)
    params = init_params(k_p, C_IN, L, NC)

    out = eegnet_forward(x, params["kern"])
    out = jax.block_until_ready(out)

    assert out.shape == (B, NC)
    assert bool(jnp.all(jnp.isfinite(out)))
    ref = ref_forward(x, params["ref"])
    if not bool(jnp.allclose(out, ref, atol=5e-2, rtol=5e-2)):
        raise AssertionError(
            f"kernel/reference mismatch, max abs diff = {float(jnp.max(jnp.abs(out - ref)))}")
    print("KERNEL_OK")
</pallas_src>

<mosaic_0001>
module attributes {stable_mosaic.version = 11 : i64} {
  func.func @eegnet_kernel(%arg0: i32, %arg1: memref<2x4x128xf32, #tpu.memory_space<vmem>>, %arg2: memref<32x256xf32, #tpu.memory_space<vmem>>, %arg3: memref<32x512xf32, #tpu.memory_space<vmem>>, %arg4: memref<128x48xf32, #tpu.memory_space<vmem>>, %arg5: memref<4x32xf32, #tpu.memory_space<vmem>>, %arg6: memref<128x10xf32, #tpu.memory_space<vmem>>, %arg7: memref<32x2xf32, #tpu.memory_space<vmem>>, %arg8: memref<1x10xf32, #tpu.memory_space<vmem>>, %arg9: memref<2x10xf32, #tpu.memory_space<vmem>>, %arg10: memref<256x128xf32, #tpu.memory_space<vmem>>, %arg11: memref<512x32xf32, #tpu.memory_space<vmem>>, %arg12: memref<2x128xf32, #tpu.memory_space<vmem>>) attributes {dimension_semantics = [#tpu.dimension_semantics<parallel>], iteration_bounds = array<i64: 1>, scalar_prefetch = 0 : i64, scratch_operands = 3 : i64, tpu.core_type = #tpu.core_type<tc>, window_params = [{transform_indices = @transform_0, window_bounds = array<i64: 2, 4, 128>}, {pipeline_mode = #tpu.pipeline_mode<synchronous>, transform_indices = @transform_1, window_bounds = array<i64: 32, 256>}, {pipeline_mode = #tpu.pipeline_mode<synchronous>, transform_indices = @transform_2, window_bounds = array<i64: 32, 512>}, {pipeline_mode = #tpu.pipeline_mode<synchronous>, transform_indices = @transform_3, window_bounds = array<i64: 128, 48>}, {pipeline_mode = #tpu.pipeline_mode<synchronous>, transform_indices = @transform_4, window_bounds = array<i64: 4, 32>}, {pipeline_mode = #tpu.pipeline_mode<synchronous>, transform_indices = @transform_5, window_bounds = array<i64: 128, 10>}, {pipeline_mode = #tpu.pipeline_mode<synchronous>, transform_indices = @transform_6, window_bounds = array<i64: 32, 2>}, {pipeline_mode = #tpu.pipeline_mode<synchronous>, transform_indices = @transform_7, window_bounds = array<i64: 1, 10>}, {transform_indices = @transform_8, window_bounds = array<i64: 2, 10>}]} {
    %c0 = arith.constant 0 : index
    %c0_0 = arith.constant 0 : index
    %0 = vector.load %arg2[%c0, %c0_0] : memref<32x256xf32, #tpu.memory_space<vmem>>, vector<32x256xf32>
    %c0_1 = arith.constant 0 : index
    %c0_2 = arith.constant 0 : index
    %1 = vector.load %arg3[%c0_1, %c0_2] : memref<32x512xf32, #tpu.memory_space<vmem>>, vector<32x512xf32>
    %c0_3 = arith.constant 0 : index
    %c0_4 = arith.constant 0 : index
    %2 = vector.load %arg4[%c0_3, %c0_4] : memref<128x48xf32, #tpu.memory_space<vmem>>, vector<128x48xf32>
    %c0_5 = arith.constant 0 : index
    %c0_6 = arith.constant 0 : index
    %3 = vector.load %arg5[%c0_5, %c0_6] : memref<4x32xf32, #tpu.memory_space<vmem>>, vector<4x32xf32>
    %c0_7 = arith.constant 0 : index
    %c0_8 = arith.constant 0 : index
    %4 = vector.load %arg7[%c0_7, %c0_8] : memref<32x2xf32, #tpu.memory_space<vmem>>, vector<32x1xf32>
    %c0_9 = arith.constant 0 : index
    %c1 = arith.constant 1 : index
    %5 = vector.load %arg7[%c0_9, %c1] : memref<32x2xf32, #tpu.memory_space<vmem>>, vector<32x1xf32>
    %cst = arith.constant 0.000000e+00 : f32
    %6 = vector.broadcast %cst : f32 to vector<256x128xf32>
    %c0_10 = arith.constant 0 : index
    %c0_11 = arith.constant 0 : index
    %7 = vector.load %arg10[%c0_10, %c0_11] : memref<256x128xf32, #tpu.memory_space<vmem>>, vector<256x128xf32>
    tpu.vector_store %arg10[%c0_10, %c0_11], %6 {strides = array<i32>} : memref<256x128xf32, #tpu.memory_space<vmem>>, vector<256x128xf32>,
    %c0_12 = arith.constant 0 : index
    %c0_13 = arith.constant 0 : index
    %c0_14 = arith.constant 0 : index
    %8 = vector.load %arg1[%c0_12, %c0_13, %c0_14] : memref<2x4x128xf32, #tpu.memory_space<vmem>>, vector<1x4x128xf32>
    %9 = vector.shape_cast %8 : vector<1x4x128xf32> to vector<4x128xf32>
    %10 = vector.extract_strided_slice %9 {offsets = [0, 0], sizes = [4, 96], strides = [1, 1]} : vector<4x128xf32> to vector<4x96xf32>
    %c0_15 = arith.constant 0 : index
    %c32 = arith.constant 32 : index
    %11 = vector.load %arg10[%c0_15, %c32] : memref<256x128xf32, #tpu.memory_space<vmem>>, vector<4x96xf32>
    tpu.vector_store %arg10[%c0_15, %c32], %10 {strides = array<i32>} : memref<256x128xf32, #tpu.memory_space<vmem>>, vector<4x96xf32>,
    %12 = vector.extract_strided_slice %9 {offsets = [0, 0], sizes = [4, 97], strides = [1, 1]} : vector<4x128xf32> to vector<4x97xf32>
    %c4 = arith.constant 4 : index
    %c31 = arith.constant 31 : index
    %13 = vector.load %arg10[%c4, %c31] : memref<256x128xf32, #tpu.memory_space<vmem>>, vector<4x97xf32>
    tpu.vector_store %arg10[%c4, %c31], %12 {strides = array<i32>} : memref<256x128xf32, #tpu.memory_space<vmem>>, vector<4x97xf32>,
    %14 = vector.extract_strided_slice %9 {offsets = [0, 0], sizes = [4, 98], strides = [1, 1]} : vector<4x128xf32> to vector<4x98xf32>
    %c8 = arith.constant 8 : index
    %c30 = arith.constant 30 : index
    %15 = vector.load %arg10[%c8, %c30] : memref<256x128xf32, #tpu.memory_space<vmem>>, vector<4x98xf32>
    tpu.vector_store %arg10[%c8, %c30], %14 {strides = array<i32>} : memref<256x128xf32, #tpu.memory_space<vmem>>, vector<4x98xf32>,
    %16 = vector.extract_strided_slice %9 {offsets = [0, 0], sizes = [4, 99], strides = [1, 1]} : vector<4x128xf32> to vector<4x99xf32>
    %c12 = arith.constant 12 : index
    %c29 = arith.constant 29 : index
    %17 = vector.load %arg10[%c12, %c29] : memref<256x128xf32, #tpu.memory_space<vmem>>, vector<4x99xf32>
    tpu.vector_store %arg10[%c12, %c29], %16 {strides = array<i32>} : memref<256x128xf32, #tpu.memory_space<vmem>>, vector<4x99xf32>,
    %18 = vector.extract_strided_slice %9 {offsets = [0, 0], sizes = [4, 100], strides = [1, 1]} : vector<4x128xf32> to vector<4x100xf32>
    %c16 = arith.constant 16 : index
    %c28 = arith.constant 28 : index
    %19 = vector.load %arg10[%c16, %c28] : memref<256x128xf32, #tpu.memory_space<vmem>>, vector<4x100xf32>
    tpu.vector_store %arg10[%c16, %c28], %18 {strides = array<i32>} : memref<256x128xf32, #tpu.memory_space<vmem>>, vector<4x100xf32>,
    %20 = vector.extract_strided_slice %9 {offsets = [0, 0], sizes = [4, 101], strides = [1, 1]} : vector<4x128xf32> to vector<4x101xf32>
    %c20 = arith.constant 20 : index
    %c27 = arith.constant 27 : index
    %21 = vector.load %arg10[%c20, %c27] : memref<256x128xf32, #tpu.memory_space<vmem>>, vector<4x101xf32>
    tpu.vector_store %arg10[%c20, %c27], %20 {strides = array<i32>} : memref<256x128xf32, #tpu.memory_space<vmem>>, vector<4x101xf32>,
    %22 = vector.extract_strided_slice %9 {offsets = [0, 0], sizes = [4, 102], strides = [1, 1]} : vector<4x128xf32> to vector<4x102xf32>
    %c24 = arith.constant 24 : index
    %c26 = arith.constant 26 : index
    %23 = vector.load %arg10[%c24, %c26] : memref<256x128xf32, #tpu.memory_space<vmem>>, vector<4x102xf32>
    tpu.vector_store %arg10[%c24, %c26], %22 {strides = array<i32>} : memref<256x128xf32, #tpu.memory_space<vmem>>, vector<4x102xf32>,
    %24 = vector.extract_strided_slice %9 {offsets = [0, 0], sizes = [4, 103], strides = [1, 1]} : vector<4x128xf32> to vector<4x103xf32>
    %c28_16 = arith.constant 28 : index
    %c25 = arith.constant 25 : index
    %25 = vector.load %arg10[%c28_16, %c25] : memref<256x128xf32, #tpu.memory_space<vmem>>, vector<4x103xf32>
    tpu.vector_store %arg10[%c28_16, %c25], %24 {strides = array<i32>} : memref<256x128xf32, #tpu.memory_space<vmem>>, vector<4x103xf32>,
    %26 = vector.extract_strided_slice %9 {offsets = [0, 0], sizes = [4, 104], strides = [1, 1]} : vector<4x128xf32> to vector<4x104xf32>
    %c32_17 = arith.constant 32 : index
    %c24_18 = arith.constant 24 : index
    %27 = vector.load %arg10[%c32_17, %c24_18] : memref<256x128xf32, #tpu.memory_space<vmem>>, vector<4x104xf32>
    tpu.vector_store %arg10[%c32_17, %c24_18], %26 {strides = array<i32>} : memref<256x128xf32, #tpu.memory_space<vmem>>, vector<4x104xf32>,
    %28 = vector.extract_strided_slice %9 {offsets = [0, 0], sizes = [4, 105], strides = [1, 1]} : vector<4x128xf32> to vector<4x105xf32>
    %c36 = arith.constant 36 : index
    %c23 = arith.constant 23 : index
    %29 = vector.load %arg10[%c36, %c23] : memref<256x128xf32, #tpu.memory_space<vmem>>, vector<4x105xf32>
    tpu.vector_store %arg10[%c36, %c23], %28 {strides = array<i32>} : memref<256x128xf32, #tpu.memory_space<vmem>>, vector<4x105xf32>,
    %30 = vector.extract_strided_slice %9 {offsets = [0, 0], sizes = [4, 106], strides = [1, 1]} : vector<4x128xf32> to vector<4x106xf32>
    %c40 = arith.constant 40 : index
    %c22 = arith.constant 22 : index
    %31 = vector.load %arg10[%c40, %c22] : memref<256x128xf32, #tpu.memory_space<vmem>>, vector<4x106xf32>
    tpu.vector_store %arg10[%c40, %c22], %30 {strides = array<i32>} : memref<256x128xf32, #tpu.memory_space<vmem>>, vector<4x106xf32>,
    %32 = vector.extract_strided_slice %9 {offsets = [0, 0], sizes = [4, 107], strides = [1, 1]} : vector<4x128xf32> to vector<4x107xf32>
    %c44 = arith.constant 44 : index
    %c21 = arith.constant 21 : index
    %33 = vector.load %arg10[%c44, %c21] : memref<256x128xf32, #tpu.memory_space<vmem>>, vector<4x107xf32>
    tpu.vector_store %arg10[%c44, %c21], %32 {strides = array<i32>} : memref<256x128xf32, #tpu.memory_space<vmem>>, vector<4x107xf32>,
    %34 = vector.extract_strided_slice %9 {offsets = [0, 0], sizes = [4, 108], strides = [1, 1]} : vector<4x128xf32> to vector<4x108xf32>
    %c48 = arith.constant 48 : index
    %c20_19 = arith.constant 20 : index
    %35 = vector.load %arg10[%c48, %c20_19] : memref<256x128xf32, #tpu.memory_space<vmem>>, vector<4x108xf32>
    tpu.vector_store %arg10[%c48, %c20_19], %34 {strides = array<i32>} : memref<256x128xf32, #tpu.memory_space<vmem>>, vector<4x108xf32>,
    %36 = vector.extract_strided_slice %9 {offsets = [0, 0], sizes = [4, 109], strides = [1, 1]} : vector<4x128xf32> to vector<4x109xf32>
    %c52 = arith.constant 52 : index
    %c19 = arith.constant 19 : index
    %37 = vector.load %arg10[%c52, %c19] : memref<256x128xf32, #tpu.memory_space<vmem>>, vector<4x109xf32>
    tpu.vector_store %arg10[%c52, %c19], %36 {strides = array<i32>} : memref<256x128xf32, #tpu.memory_space<vmem>>, vector<4x109xf32>,
    %38 = vector.extract_strided_slice %9 {offsets = [0, 0], sizes = [4, 110], strides = [1, 1]} : vector<4x128xf32> to vector<4x110xf32>
    %c56 = arith.constant 56 : index
    %c18 = arith.constant 18 : index
    %39 = vector.load %arg10[%c56, %c18] : memref<256x128xf32, #tpu.memory_space<vmem>>, vector<4x110xf32>
    tpu.vector_store %arg10[%c56, %c18], %38 {strides = array<i32>} : memref<256x128xf32, #tpu.memory_space<vmem>>, vector<4x110xf32>,
    %40 = vector.extract_strided_slice %9 {offsets = [0, 0], sizes = [4, 111], strides = [1, 1]} : vector<4x128xf32> to vector<4x111xf32>
    %c60 = arith.constant 60 : index
    %c17 = arith.constant 17 : index
    %41 = vector.load %arg10[%c60, %c17] : memref<256x128xf32, #tpu.memory_space<vmem>>, vector<4x111xf32>
    tpu.vector_store %arg10[%c60, %c17], %40 {strides = array<i32>} : memref<256x128xf32, #tpu.memory_space<vmem>>, vector<4x111xf32>,
    %42 = vector.extract_strided_slice %9 {offsets = [0, 0], sizes = [4, 112], strides = [1, 1]} : vector<4x128xf32> to vector<4x112xf32>
    %c64 = arith.constant 64 : index
    %c16_20 = arith.constant 16 : index
    %43 = vector.load %arg10[%c64, %c16_20] : memref<256x128xf32, #tpu.memory_space<vmem>>, vector<4x112xf32>
    tpu.vector_store %arg10[%c64, %c16_20], %42 {strides = array<i32>} : memref<256x128xf32, #tpu.memory_space<vmem>>, vector<4x112xf32>,
    %44 = vector.extract_strided_slice %9 {offsets = [0, 0], sizes = [4, 113], strides = [1, 1]} : vector<4x128xf32> to vector<4x113xf32>
    %c68 = arith.constant 68 : index
    %c15 = arith.constant 15 : index
    %45 = vector.load %arg10[%c68, %c15] : memref<256x128xf32, #tpu.memory_space<vmem>>, vector<4x113xf32>
    tpu.vector_store %arg10[%c68, %c15], %44 {strides = array<i32>} : memref<256x128xf32, #tpu.memory_space<vmem>>, vector<4x113xf32>,
    %46 = vector.extract_strided_slice %9 {offsets = [0, 0], sizes = [4, 114], strides = [1, 1]} : vector<4x128xf32> to vector<4x114xf32>
    %c72 = arith.constant 72 : index
    %c14 = arith.constant 14 : index
    %47 = vector.load %arg10[%c72, %c14] : memref<256x128xf32, #tpu.memory_space<vmem>>, vector<4x114xf32>
    tpu.vector_store %arg10[%c72, %c14], %46 {strides = array<i32>} : memref<256x128xf32, #tpu.memory_space<vmem>>, vector<4x114xf32>,
    %48 = vector.extract_strided_slice %9 {offsets = [0, 0], sizes = [4, 115], strides = [1, 1]} : vector<4x128xf32> to vector<4x115xf32>
    %c76 = arith.constant 76 : index
    %c13 = arith.constant 13 : index
    %49 = vector.load %arg10[%c76, %c13] : memref<256x128xf32, #tpu.memory_space<vmem>>, vector<4x115xf32>
    tpu.vector_store %arg10[%c76, %c13], %48 {strides = array<i32>} : memref<256x128xf32, #tpu.memory_space<vmem>>, vector<4x115xf32>,
    %50 = vector.extract_strided_slice %9 {offsets = [0, 0], sizes = [4, 116], strides = [1, 1]} : vector<4x128xf32> to vector<4x116xf32>
    %c80 = arith.constant 80 : index
    %c12_21 = arith.constant 12 : index
    %51 = vector.load %arg10[%c80, %c12_21] : memref<256x128xf32, #tpu.memory_space<vmem>>, vector<4x116xf32>
    tpu.vector_store %arg10[%c80, %c12_21], %50 {strides = array<i32>} : memref<256x128xf32, #tpu.memory_space<vmem>>, vector<4x116xf32>,
    %52 = vector.extract_strided_slice %9 {offsets = [0, 0], sizes = [4, 117], strides = [1, 1]} : vector<4x128xf32> to vector<4x117xf32>
    %c84 = arith.constant 84 : index
    %c11 = arith.constant 11 : index
    %53 = vector.load %arg10[%c84, %c11] : memref<256x128xf32, #tpu.memory_space<vmem>>, vector<4x117xf32>
    tpu.vector_store %arg10[%c84, %c11], %52 {strides = array<i32>} : memref<256x128xf32, #tpu.memory_space<vmem>>, vector<4x117xf32>,
    %54 = vector.extract_strided_slice %9 {offsets = [0, 0], sizes = [4, 118], strides = [1, 1]} : vector<4x128xf32> to vector<4x118xf32>
    %c88 = arith.constant 88 : index
    %c10 = arith.constant 10 : index
    %55 = vector.load %arg10[%c88, %c10] : memref<256x128xf32, #tpu.memory_space<vmem>>, vector<4x118xf32>
    tpu.vector_store %arg10[%c88, %c10], %54 {strides = array<i32>} : memref<256x128xf32, #tpu.memory_space<vmem>>, vector<4x118xf32>,
    %56 = vector.extract_strided_slice %9 {offsets = [0, 0], sizes = [4, 119], strides = [1, 1]} : vector<4x128xf32> to vector<4x119xf32>
    %c92 = arith.constant 92 : index
    %c9 = arith.constant 9 : index
    %57 = vector.load %arg10[%c92, %c9] : memref<256x128xf32, #tpu.memory_space<vmem>>, vector<4x119xf32>
    tpu.vector_store %arg10[%c92, %c9], %56 {strides = array<i32>} : memref<256x128xf32, #tpu.memory_space<vmem>>, vector<4x119xf32>,
    %58 = vector.extract_strided_slice %9 {offsets = [0, 0], sizes = [4, 120], strides = [1, 1]} : vector<4x128xf32> to vector<4x120xf32>
    %c96 = arith.constant 96 : index
    %c8_22 = arith.constant 8 : index
    %59 = vector.load %arg10[%c96, %c8_22] : memref<256x128xf32, #tpu.memory_space<vmem>>, vector<4x120xf32>
    tpu.vector_store %arg10[%c96, %c8_22], %58 {strides = array<i32>} : memref<256x128xf32, #tpu.memory_space<vmem>>, vector<4x120xf32>,
    %60 = vector.extract_strided_slice %9 {offsets = [0, 0], sizes = [4, 121], strides = [1, 1]} : vector<4x128xf32> to vector<4x121xf32>
    %c100 = arith.constant 100 : index
    %c7 = arith.constant 7 : index
    %61 = vector.load %arg10[%c100, %c7] : memref<256x128xf32, #tpu.memory_space<vmem>>, vector<4x121xf32>
    tpu.vector_store %arg10[%c100, %c7], %60 {strides = array<i32>} : memref<256x128xf32, #tpu.memory_space<vmem>>, vector<4x121xf32>,
    %62 = vector.extract_strided_slice %9 {offsets = [0, 0], sizes = [4, 122], strides = [1, 1]} : vector<4x128xf32> to vector<4x122xf32>
    %c104 = arith.constant 104 : index
    %c6 = arith.constant 6 : index
    %63 = vector.load %arg10[%c104, %c6] : memref<256x128xf32, #tpu.memory_space<vmem>>, vector<4x122xf32>
    tpu.vector_store %arg10[%c104, %c6], %62 {strides = array<i32>} : memref<256x128xf32, #tpu.memory_space<vmem>>, vector<4x122xf32>,
    %64 = vector.extract_strided_slice %9 {offsets = [0, 0], sizes = [4, 123], strides = [1, 1]} : vector<4x128xf32> to vector<4x123xf32>
    %c108 = arith.constant 108 : index
    %c5 = arith.constant 5 : index
    %65 = vector.load %arg10[%c108, %c5] : memref<256x128xf32, #tpu.memory_space<vmem>>, vector<4x123xf32>
    tpu.vector_store %arg10[%c108, %c5], %64 {strides = array<i32>} : memref<256x128xf32, #tpu.memory_space<vmem>>, vector<4x123xf32>,
    %66 = vector.extract_strided_slice %9 {offsets = [0, 0], sizes = [4, 124], strides = [1, 1]} : vector<4x128xf32> to vector<4x124xf32>
    %c112 = arith.constant 112 : index
    %c4_23 = arith.constant 4 : index
    %67 = vector.load %arg10[%c112, %c4_23] : memref<256x128xf32, #tpu.memory_space<vmem>>, vector<4x124xf32>
    tpu.vector_store %arg10[%c112, %c4_23], %66 {strides = array<i32>} : memref<256x128xf32, #tpu.memory_space<vmem>>, vector<4x124xf32>,
    %68 = vector.extract_strided_slice %9 {offsets = [0, 0], sizes = [4, 125], strides = [1, 1]} : vector<4x128xf32> to vector<4x125xf32>
    %c116 = arith.constant 116 : index
    %c3 = arith.constant 3 : index
    %69 = vector.load %arg10[%c116, %c3] : memref<256x128xf32, #tpu.memory_space<vmem>>, vector<4x125xf32>
    tpu.vector_store %arg10[%c116, %c3], %68 {strides = array<i32>} : memref<256x128xf32, #tpu.memory_space<vmem>>, vector<4x125xf32>,
    %70 = vector.extract_strided_slice %9 {offsets = [0, 0], sizes = [4, 126], strides = [1, 1]} : vector<4x128xf32> to vector<4x126xf32>
    %c120 = arith.constant 120 : index
    %c2 = arith.constant 2 : index
    %71 = vector.load %arg10[%c120, %c2] : memref<256x128xf32, #tpu.memory_space<vmem>>, vector<4x126xf32>
    tpu.vector_store %arg10[%c120, %c2], %70 {strides = array<i32>} : memref<256x128xf32, #tpu.memory_space<vmem>>, vector<4x126xf32>,
    %72 = vector.extract_strided_slice %9 {offsets = [0, 0], sizes = [4, 127], strides = [1, 1]} : vector<4x128xf32> to vector<4x127xf32>
    %c124 = arith.constant 124 : index
    %c1_24 = arith.constant 1 : index
    %73 = vector.load %arg10[%c124, %c1_24] : memref<256x128xf32, #tpu.memory_space<vmem>>, vector<4x127xf32>
    tpu.vector_store %arg10[%c124, %c1_24], %72 {strides = array<i32>} : memref<256x128xf32, #tpu.memory_space<vmem>>, vector<4x127xf32>,
    %c128 = arith.constant 128 : index
    %c0_25 = arith.constant 0 : index
    %74 = vector.load %arg10[%c128, %c0_25] : memref<256x128xf32, #tpu.memory_space<vmem>>, vector<4x128xf32>
    tpu.vector_store %arg10[%c128, %c0_25], %9 {strides = array<i32>} : memref<256x128xf32, #tpu.memory_space<vmem>>, vector<4x128xf32>,
    %75 = vector.extract_strided_slice %9 {offsets = [0, 1], sizes = [4, 127], strides = [1, 1]} : vector<4x128xf32> to vector<4x127xf32>
    %c132 = arith.constant 132 : index
    %c0_26 = arith.constant 0 : index
    %76 = vector.load %arg10[%c132, %c0_26] : memref<256x128xf32, #tpu.memory_space<vmem>>, vector<4x127xf32>
    tpu.vector_store %arg10[%c132, %c0_26], %75 {strides = array<i32>} : memref<256x128xf32, #tpu.memory_space<vmem>>, vector<4x127xf32>,
    %77 = vector.extract_strided_slice %9 {offsets = [0, 2], sizes = [4, 126], strides = [1, 1]} : vector<4x128xf32> to vector<4x126xf32>
    %c136 = arith.constant 136 : index
    %c0_27 = arith.constant 0 : index
    %78 = vector.load %arg10[%c136, %c0_27] : memref<256x128xf32, #tpu.memory_space<vmem>>, vector<4x126xf32>
    tpu.vector_store %arg10[%c136, %c0_27], %77 {strides = array<i32>} : memref<256x128xf32, #tpu.memory_space<vmem>>, vector<4x126xf32>,
    %79 = vector.extract_strided_slice %9 {offsets = [0, 3], sizes = [4, 125], strides = [1, 1]} : vector<4x128xf32> to vector<4x125xf32>
    %c140 = arith.constant 140 : index
    %c0_28 = arith.constant 0 : index
    %80 = vector.load %arg10[%c140, %c0_28] : memref<256x128xf32, #tpu.memory_space<vmem>>, vector<4x125xf32>
    tpu.vector_store %arg10[%c140, %c0_28], %79 {strides = array<i32>} : memref<256x128xf32, #tpu.memory_space<vmem>>, vector<4x125xf32>,
    %81 = vector.extract_strided_slice %9 {offsets = [0, 4], sizes = [4, 124], strides = [1, 1]} : vector<4x128xf32> to vector<4x124xf32>
    %c144 = arith.constant 144 : index
    %c0_29 = arith.constant 0 : index
    %82 = vector.load %arg10[%c144, %c0_29] : memref<256x128xf32, #tpu.memory_space<vmem>>, vector<4x124xf32>
    tpu.vector_store %arg10[%c144, %c0_29], %81 {strides = array<i32>} : memref<256x128xf32, #tpu.memory_space<vmem>>, vector<4x124xf32>,
    %83 = vector.extract_strided_slice %9 {offsets = [0, 5], sizes = [4, 123], strides = [1, 1]} : vector<4x128xf32> to vector<4x123xf32>
    %c148 = arith.constant 148 : index
    %c0_30 = arith.constant 0 : index
    %84 = vector.load %arg10[%c148, %c0_30] : memref<256x128xf32, #tpu.memory_space<vmem>>, vector<4x123xf32>
    tpu.vector_store %arg10[%c148, %c0_30], %83 {strides = array<i32>} : memref<256x128xf32, #tpu.memory_space<vmem>>, vector<4x123xf32>,
    %85 = vector.extract_strided_slice %9 {offsets = [0, 6], sizes = [4, 122], strides = [1, 1]} : vector<4x128xf32> to vector<4x122xf32>
    %c152 = arith.constant 152 : index
    %c0_31 = arith.constant 0 : index
    %86 = vector.load %arg10[%c152, %c0_31] : memref<256x128xf32, #tpu.memory_space<vmem>>, vector<4x122xf32>
    tpu.vector_store %arg10[%c152, %c0_31], %85 {strides = array<i32>} : memref<256x128xf32, #tpu.memory_space<vmem>>, vector<4x122xf32>,
    %87 = vector.extract_strided_slice %9 {offsets = [0, 7], sizes = [4, 121], strides = [1, 1]} : vector<4x128xf32> to vector<4x121xf32>
    %c156 = arith.constant 156 : index
    %c0_32 = arith.constant 0 : index
    %88 = vector.load %arg10[%c156, %c0_32] : memref<256x128xf32, #tpu.memory_space<vmem>>, vector<4x121xf32>
    tpu.vector_store %arg10[%c156, %c0_32], %87 {strides = array<i32>} : memref<256x128xf32, #tpu.memory_space<vmem>>, vector<4x121xf32>,
    %89 = vector.extract_strided_slice %9 {offsets = [0, 8], sizes = [4, 120], strides = [1, 1]} : vector<4x128xf32> to vector<4x120xf32>
    %c160 = arith.constant 160 : index
    %c0_33 = arith.constant 0 : index
    %90 = vector.load %arg10[%c160, %c0_33] : memref<256x128xf32, #tpu.memory_space<vmem>>, vector<4x120xf32>
    tpu.vector_store %arg10[%c160, %c0_33], %89 {strides = array<i32>} : memref<256x128xf32, #tpu.memory_space<vmem>>, vector<4x120xf32>,
    %91 = vector.extract_strided_slice %9 {offsets = [0, 9], sizes = [4, 119], strides = [1, 1]} : vector<4x128xf32> to vector<4x119xf32>
    %c164 = arith.constant 164 : index
    %c0_34 = arith.constant 0 : index
    %92 = vector.load %arg10[%c164, %c0_34] : memref<256x128xf32, #tpu.memory_space<vmem>>, vector<4x119xf32>
    tpu.vector_store %arg10[%c164, %c0_34], %91 {strides = array<i32>} : memref<256x128xf32, #tpu.memory_space<vmem>>, vector<4x119xf32>,
    %93 = vector.extract_strided_slice %9 {offsets = [0, 10], sizes = [4, 118], strides = [1, 1]} : vector<4x128xf32> to vector<4x118xf32>
    %c168 = arith.constant 168 : index
    %c0_35 = arith.constant 0 : index
    %94 = vector.load %arg10[%c168, %c0_35] : memref<256x128xf32, #tpu.memory_space<vmem>>, vector<4x118xf32>
    tpu.vector_store %arg10[%c168, %c0_35], %93 {strides = array<i32>} : memref<256x128xf32, #tpu.memory_space<vmem>>, vector<4x118xf32>,
    %95 = vector.extract_strided_slice %9 {offsets = [0, 11], sizes = [4, 117], strides = [1, 1]} : vector<4x128xf32> to vector<4x117xf32>
    %c172 = arith.constant 172 : index
    %c0_36 = arith.constant 0 : index
    %96 = vector.load %arg10[%c172, %c0_36] : memref<256x128xf32, #tpu.memory_space<vmem>>, vector<4x117xf32>
    tpu.vector_store %arg10[%c172, %c0_36], %95 {strides = array<i32>} : memref<256x128xf32, #tpu.memory_space<vmem>>, vector<4x117xf32>,
    %97 = vector.extract_strided_slice %9 {offsets = [0, 12], sizes = [4, 116], strides = [1, 1]} : vector<4x128xf32> to vector<4x116xf32>
    %c176 = arith.constant 176 : index
    %c0_37 = arith.constant 0 : index
    %98 = vector.load %arg10[%c176, %c0_37] : memref<256x128xf32, #tpu.memory_space<vmem>>, vector<4x116xf32>
    tpu.vector_store %arg10[%c176, %c0_37], %97 {strides = array<i32>} : memref<256x128xf32, #tpu.memory_space<vmem>>, vector<4x116xf32>,
    %99 = vector.extract_strided_slice %9 {offsets = [0, 13], sizes = [4, 115], strides = [1, 1]} : vector<4x128xf32> to vector<4x115xf32>
    %c180 = arith.constant 180 : index
    %c0_38 = arith.constant 0 : index
    %100 = vector.load %arg10[%c180, %c0_38] : memref<256x128xf32, #tpu.memory_space<vmem>>, vector<4x115xf32>
    tpu.vector_store %arg10[%c180, %c0_38], %99 {strides = array<i32>} : memref<256x128xf32, #tpu.memory_space<vmem>>, vector<4x115xf32>,
    %101 = vector.extract_strided_slice %9 {offsets = [0, 14], sizes = [4, 114], strides = [1, 1]} : vector<4x128xf32> to vector<4x114xf32>
    %c184 = arith.constant 184 : index
    %c0_39 = arith.constant 0 : index
    %102 = vector.load %arg10[%c184, %c0_39] : memref<256x128xf32, #tpu.memory_space<vmem>>, vector<4x114xf32>
    tpu.vector_store %arg10[%c184, %c0_39], %101 {strides = array<i32>} : memref<256x128xf32, #tpu.memory_space<vmem>>, vector<4x114xf32>,
    %103 = vector.extract_strided_slice %9 {offsets = [0, 15], sizes = [4, 113], strides = [1, 1]} : vector<4x128xf32> to vector<4x113xf32>
    %c188 = arith.constant 188 : index
    %c0_40 = arith.constant 0 : index
    %104 = vector.load %arg10[%c188, %c0_40] : memref<256x128xf32, #tpu.memory_space<vmem>>, vector<4x113xf32>
    tpu.vector_store %arg10[%c188, %c0_40], %103 {strides = array<i32>} : memref<256x128xf32, #tpu.memory_space<vmem>>, vector<4x113xf32>,
    %105 = vector.extract_strided_slice %9 {offsets = [0, 16], sizes = [4, 112], strides = [1, 1]} : vector<4x128xf32> to vector<4x112xf32>
    %c192 = arith.constant 192 : index
    %c0_41 = arith.constant 0 : index
    %106 = vector.load %arg10[%c192, %c0_41] : memref<256x128xf32, #tpu.memory_space<vmem>>, vector<4x112xf32>
    tpu.vector_store %arg10[%c192, %c0_41], %105 {strides = array<i32>} : memref<256x128xf32, #tpu.memory_space<vmem>>, vector<4x112xf32>,
    %107 = vector.extract_strided_slice %9 {offsets = [0, 17], sizes = [4, 111], strides = [1, 1]} : vector<4x128xf32> to vector<4x111xf32>
    %c196 = arith.constant 196 : index
    %c0_42 = arith.constant 0 : index
    %108 = vector.load %arg10[%c196, %c0_42] : memref<256x128xf32, #tpu.memory_space<vmem>>, vector<4x111xf32>
    tpu.vector_store %arg10[%c196, %c0_42], %107 {strides = array<i32>} : memref<256x128xf32, #tpu.memory_space<vmem>>, vector<4x111xf32>,
    %109 = vector.extract_strided_slice %9 {offsets = [0, 18], sizes = [4, 110], strides = [1, 1]} : vector<4x128xf32> to vector<4x110xf32>
    %c200 = arith.constant 200 : index
    %c0_43 = arith.constant 0 : index
    %110 = vector.load %arg10[%c200, %c0_43] : memref<256x128xf32, #tpu.memory_space<vmem>>, vector<4x110xf32>
    tpu.vector_store %arg10[%c200, %c0_43], %109 {strides = array<i32>} : memref<256x128xf32, #tpu.memory_space<vmem>>, vector<4x110xf32>,
    %111 = vector.extract_strided_slice %9 {offsets = [0, 19], sizes = [4, 109], strides = [1, 1]} : vector<4x128xf32> to vector<4x109xf32>
    %c204 = arith.constant 204 : index
    %c0_44 = arith.constant 0 : index
    %112 = vector.load %arg10[%c204, %c0_44] : memref<256x128xf32, #tpu.memory_space<vmem>>, vector<4x109xf32>
    tpu.vector_store %arg10[%c204, %c0_44], %111 {strides = array<i32>} : memref<256x128xf32, #tpu.memory_space<vmem>>, vector<4x109xf32>,
    %113 = vector.extract_strided_slice %9 {offsets = [0, 20], sizes = [4, 108], strides = [1, 1]} : vector<4x128xf32> to vector<4x108xf32>
    %c208 = arith.constant 208 : index
    %c0_45 = arith.constant 0 : index
    %114 = vector.load %arg10[%c208, %c0_45] : memref<256x128xf32, #tpu.memory_space<vmem>>, vector<4x108xf32>
    tpu.vector_store %arg10[%c208, %c0_45], %113 {strides = array<i32>} : memref<256x128xf32, #tpu.memory_space<vmem>>, vector<4x108xf32>,
    %115 = vector.extract_strided_slice %9 {offsets = [0, 21], sizes = [4, 107], strides = [1, 1]} : vector<4x128xf32> to vector<4x107xf32>
    %c212 = arith.constant 212 : index
    %c0_46 = arith.constant 0 : index
    %116 = vector.load %arg10[%c212, %c0_46] : memref<256x128xf32, #tpu.memory_space<vmem>>, vector<4x107xf32>
    tpu.vector_store %arg10[%c212, %c0_46], %115 {strides = array<i32>} : memref<256x128xf32, #tpu.memory_space<vmem>>, vector<4x107xf32>,
    %117 = vector.extract_strided_slice %9 {offsets = [0, 22], sizes = [4, 106], strides = [1, 1]} : vector<4x128xf32> to vector<4x106xf32>
    %c216 = arith.constant 216 : index
    %c0_47 = arith.constant 0 : index
    %118 = vector.load %arg10[%c216, %c0_47] : memref<256x128xf32, #tpu.memory_space<vmem>>, vector<4x106xf32>
    tpu.vector_store %arg10[%c216, %c0_47], %117 {strides = array<i32>} : memref<256x128xf32, #tpu.memory_space<vmem>>, vector<4x106xf32>,
    %119 = vector.extract_strided_slice %9 {offsets = [0, 23], sizes = [4, 105], strides = [1, 1]} : vector<4x128xf32> to vector<4x105xf32>
    %c220 = arith.constant 220 : index
    %c0_48 = arith.constant 0 : index
    %120 = vector.load %arg10[%c220, %c0_48] : memref<256x128xf32, #tpu.memory_space<vmem>>, vector<4x105xf32>
    tpu.vector_store %arg10[%c220, %c0_48], %119 {strides = array<i32>} : memref<256x128xf32, #tpu.memory_space<vmem>>, vector<4x105xf32>,
    %121 = vector.extract_strided_slice %9 {offsets = [0, 24], sizes = [4, 104], strides = [1, 1]} : vector<4x128xf32> to vector<4x104xf32>
    %c224 = arith.constant 224 : index
    %c0_49 = arith.constant 0 : index
    %122 = vector.load %arg10[%c224, %c0_49] : memref<256x128xf32, #tpu.memory_space<vmem>>, vector<4x104xf32>
    tpu.vector_store %arg10[%c224, %c0_49], %121 {strides = array<i32>} : memref<256x128xf32, #tpu.memory_space<vmem>>, vector<4x104xf32>,
    %123 = vector.extract_strided_slice %9 {offsets = [0, 25], sizes = [4, 103], strides = [1, 1]} : vector<4x128xf32> to vector<4x103xf32>
    %c228 = arith.constant 228 : index
    %c0_50 = arith.constant 0 : index
    %124 = vector.load %arg10[%c228, %c0_50] : memref<256x128xf32, #tpu.memory_space<vmem>>, vector<4x103xf32>
    tpu.vector_store %arg10[%c228, %c0_50], %123 {strides = array<i32>} : memref<256x128xf32, #tpu.memory_space<vmem>>, vector<4x103xf32>,
    %125 = vector.extract_strided_slice %9 {offsets = [0, 26], sizes = [4, 102], strides = [1, 1]} : vector<4x128xf32> to vector<4x102xf32>
    %c232 = arith.constant 232 : index
    %c0_51 = arith.constant 0 : index
    %126 = vector.load %arg10[%c232, %c0_51] : memref<256x128xf32, #tpu.memory_space<vmem>>, vector<4x102xf32>
    tpu.vector_store %arg10[%c232, %c0_51], %125 {strides = array<i32>} : memref<256x128xf32, #tpu.memory_space<vmem>>, vector<4x102xf32>,
    %127 = vector.extract_strided_slice %9 {offsets = [0, 27], sizes = [4, 101], strides = [1, 1]} : vector<4x128xf32> to vector<4x101xf32>
    %c236 = arith.constant 236 : index
    %c0_52 = arith.constant 0 : index
    %128 = vector.load %arg10[%c236, %c0_52] : memref<256x128xf32, #tpu.memory_space<vmem>>, vector<4x101xf32>
    tpu.vector_store %arg10[%c236, %c0_52], %127 {strides = array<i32>} : memref<256x128xf32, #tpu.memory_space<vmem>>, vector<4x101xf32>,
    %129 = vector.extract_strided_slice %9 {offsets = [0, 28], sizes = [4, 100], strides = [1, 1]} : vector<4x128xf32> to vector<4x100xf32>
    %c240 = arith.constant 240 : index
    %c0_53 = arith.constant 0 : index
    %130 = vector.load %arg10[%c240, %c0_53] : memref<256x128xf32, #tpu.memory_space<vmem>>, vector<4x100xf32>
    tpu.vector_store %arg10[%c240, %c0_53], %129 {strides = array<i32>} : memref<256x128xf32, #tpu.memory_space<vmem>>, vector<4x100xf32>,
    %131 = vector.extract_strided_slice %9 {offsets = [0, 29], sizes = [4, 99], strides = [1, 1]} : vector<4x128xf32> to vector<4x99xf32>
    %c244 = arith.constant 244 : index
    %c0_54 = arith.constant 0 : index
    %132 = vector.load %arg10[%c244, %c0_54] : memref<256x128xf32, #tpu.memory_space<vmem>>, vector<4x99xf32>
    tpu.vector_store %arg10[%c244, %c0_54], %131 {strides = array<i32>} : memref<256x128xf32, #tpu.memory_space<vmem>>, vector<4x99xf32>,
    %133 = vector.extract_strided_slice %9 {offsets = [0, 30], sizes = [4, 98], strides = [1, 1]} : vector<4x128xf32> to vector<4x98xf32>
    %c248 = arith.constant 248 : index
    %c0_55 = arith.constant 0 : index
    %134 = vector.load %arg10[%c248, %c0_55] : memref<256x128xf32, #tpu.memory_space<vmem>>, vector<4x98xf32>
    tpu.vector_store %arg10[%c248, %c0_55], %133 {strides = array<i32>} : memref<256x128xf32, #tpu.memory_space<vmem>>, vector<4x98xf32>,
    %135 = vector.extract_strided_slice %9 {offsets = [0, 31], sizes = [4, 97], strides = [1, 1]} : vector<4x128xf32> to vector<4x97xf32>
    %c252 = arith.constant 252 : index
    %c0_56 = arith.constant 0 : index
    %136 = vector.load %arg10[%c252, %c0_56] : memref<256x128xf32, #tpu.memory_space<vmem>>, vector<4x97xf32>
    tpu.vector_store %arg10[%c252, %c0_56], %135 {strides = array<i32>} : memref<256x128xf32, #tpu.memory_space<vmem>>, vector<4x97xf32>,
    %c0_57 = arith.constant 0 : index
    %c0_58 = arith.constant 0 : index
    %137 = vector.load %arg10[%c0_57, %c0_58] : memref<256x128xf32, #tpu.memory_space<vmem>>, vector<256x128xf32>
    %cst_59 = arith.constant dense<0.000000e+00> : vector<32x128xf32>
    %138 = tpu.matmul %0, %137, %cst_59 {dimension_numbers = #tpu.dot_dimension_numbers<[1], [0], [0], [1], [0, 0, 1, 1], [], []>} : vector<32x256xf32>, vector<256x128xf32>, vector<32x128xf32> -> vector<32x128xf32>
    %139 = vector.broadcast %4 : vector<32x1xf32> to vector<32x128xf32>
    %140 = arith.addf %138, %139 : vector<32x128xf32>
    %cst_60 = arith.constant 0.000000e+00 : f32
    %141 = vector.broadcast %cst_60 : f32 to vector<32x128xf32>
    %142 = arith.cmpf ogt, %140, %141 : vector<32x128xf32>
    %cst_61 = arith.constant 0.000000e+00 : f32
    %143 = vector.broadcast %cst_61 : f32 to vector<32x128xf32>
    %144 = arith.minimumf %140, %143 : vector<32x128xf32>
    %145 = math.exp %144 : vector<32x128xf32>
    %cst_62 = arith.constant 1.000000e+00 : f32
    %146 = vector.broadcast %cst_62 : f32 to vector<32x128xf32>
    %147 = arith.subf %145, %146 : vector<32x128xf32>
    %148 = arith.select %142, %140, %147 : vector<32x128xi1>, vector<32x128xf32>
    %cst_63 = arith.constant dense<0.000000e+00> : vector<32x48xf32>
    %149 = tpu.matmul %148, %2, %cst_63 {dimension_numbers = #tpu.dot_dimension_numbers<[1], [0], [0], [1], [0, 0, 1, 1], [], []>} : vector<32x128xf32>, vector<128x48xf32>, vector<32x48xf32> -> vector<32x48xf32>
    %150 = vector.extract_strided_slice %149 {offsets = [0, 0], sizes = [32, 32], strides = [1, 1]} : vector<32x48xf32> to vector<32x32xf32>
    %c0_64 = arith.constant 0 : index
    %c0_65 = arith.constant 0 : index
    %151 = vector.load %arg11[%c0_64, %c0_65] : memref<512x32xf32, #tpu.memory_space<vmem>>, vector<32x32xf32>
    tpu.vector_store %arg11[%c0_64, %c0_65], %150 {strides = array<i32>} : memref<512x32xf32, #tpu.memory_space<vmem>>, vector<32x32xf32>,
    %152 = vector.extract_strided_slice %149 {offsets = [0, 1], sizes = [32, 32], strides = [1, 1]} : vector<32x48xf32> to vector<32x32xf32>
    %c32_66 = arith.constant 32 : index
    %c0_67 = arith.constant 0 : index
    %153 = vector.load %arg11[%c32_66, %c0_67] : memref<512x32xf32, #tpu.memory_space<vmem>>, vector<32x32xf32>
    tpu.vector_store %arg11[%c32_66, %c0_67], %152 {strides = array<i32>} : memref<512x32xf32, #tpu.memory_space<vmem>>, vector<32x32xf32>,
    %154 = vector.extract_strided_slice %149 {offsets = [0, 2], sizes = [32, 32], strides = [1, 1]} : vector<32x48xf32> to vector<32x32xf32>
    %c64_68 = arith.constant 64 : index
    %c0_69 = arith.constant 0 : index
    %155 = vector.load %arg11[%c64_68, %c0_69] : memref<512x32xf32, #tpu.memory_space<vmem>>, vector<32x32xf32>
    tpu.vector_store %arg11[%c64_68, %c0_69], %154 {strides = array<i32>} : memref<512x32xf32, #tpu.memory_space<vmem>>, vector<32x32xf32>,
    %156 = vector.extract_strided_slice %149 {offsets = [0, 3], sizes = [32, 32], strides = [1, 1]} : vector<32x48xf32> to vector<32x32xf32>
    %c96_70 = arith.constant 96 : index
    %c0_71 = arith.constant 0 : index
    %157 = vector.load %arg11[%c96_70, %c0_71] : memref<512x32xf32, #tpu.memory_space<vmem>>, vector<32x32xf32>
    tpu.vector_store %arg11[%c96_70, %c0_71], %156 {strides = array<i32>} : memref<512x32xf32, #tpu.memory_space<vmem>>, vector<32x32xf32>,
    %158 = vector.extract_strided_slice %149 {offsets = [0, 4], sizes = [32, 32], strides = [1, 1]} : vector<32x48xf32> to vector<32x32xf32>
    %c128_72 = arith.constant 128 : index
    %c0_73 = arith.constant 0 : index
    %159 = vector.load %arg11[%c128_72, %c0_73] : memref<512x32xf32, #tpu.memory_space<vmem>>, vector<32x32xf32>
    tpu.vector_store %arg11[%c128_72, %c0_73], %158 {strides = array<i32>} : memref<512x32xf32, #tpu.memory_space<vmem>>, vector<32x32xf32>,
    %160 = vector.extract_strided_slice %149 {offsets = [0, 5], sizes = [32, 32], strides = [1, 1]} : vector<32x48xf32> to vector<32x32xf32>
    %c160_74 = arith.constant 160 : index
    %c0_75 = arith.constant 0 : index
    %161 = vector.load %arg11[%c160_74, %c0_75] : memref<512x32xf32, #tpu.memory_space<vmem>>, vector<32x32xf32>
    tpu.vector_store %arg11[%c160_74, %c0_75], %160 {strides = array<i32>} : memref<512x32xf32, #tpu.memory_space<vmem>>, vector<32x32xf32>,
    %162 = vector.extract_strided_slice %149 {offsets = [0, 6], sizes = [32, 32], strides = [1, 1]} : vector<32x48xf32> to vector<32x32xf32>
    %c192_76 = arith.constant 192 : index
    %c0_77 = arith.constant 0 : index
    %163 = vector.load %arg11[%c192_76, %c0_77] : memref<512x32xf32, #tpu.memory_space<vmem>>, vector<32x32xf32>
    tpu.vector_store %arg11[%c192_76, %c0_77], %162 {strides = array<i32>} : memref<512x32xf32, #tpu.memory_space<vmem>>, vector<32x32xf32>,
    %164 = vector.extract_strided_slice %149 {offsets = [0, 7], sizes = [32, 32], strides = [1, 1]} : vector<32x48xf32> to vector<32x32xf32>
    %c224_78 = arith.constant 224 : index
    %c0_79 = arith.constant 0 : index
    %165 = vector.load %arg11[%c224_78, %c0_79] : memref<512x32xf32, #tpu.memory_space<vmem>>, vector<32x32xf32>
    tpu.vector_store %arg11[%c224_78, %c0_79], %164 {strides = array<i32>} : memref<512x32xf32, #tpu.memory_space<vmem>>, vector<32x32xf32>,
    %166 = vector.extract_strided_slice %149 {offsets = [0, 8], sizes = [32, 32], strides = [1, 1]} : vector<32x48xf32> to vector<32x32xf32>
    %c256 = arith.constant 256 : index
    %c0_80 = arith.constant 0 : index
    %167 = vector.load %arg11[%c256, %c0_80] : memref<512x32xf32, #tpu.memory_space<vmem>>, vector<32x32xf32>
    tpu.vector_store %arg11[%c256, %c0_80], %166 {strides = array<i32>} : memref<512x32xf32, #tpu.memory_space<vmem>>, vector<32x32xf32>,
    %168 = vector.extract_strided_slice %149 {offsets = [0, 9], sizes = [32, 32], strides = [1, 1]} : vector<32x48xf32> to vector<32x32xf32>
    %c288 = arith.constant 288 : index
    %c0_81 = arith.constant 0 : index
    %169 = vector.load %arg11[%c288, %c0_81] : memref<512x32xf32, #tpu.memory_space<vmem>>, vector<32x32xf32>
    tpu.vector_store %arg11[%c288, %c0_81], %168 {strides = array<i32>} : memref<512x32xf32, #tpu.memory_space<vmem>>, vector<32x32xf32>,
    %170 = vector.extract_strided_slice %149 {offsets = [0, 10], sizes = [32, 32], strides = [1, 1]} : vector<32x48xf32> to vector<32x32xf32>
    %c320 = arith.constant 320 : index
    %c0_82 = arith.constant 0 : index
    %171 = vector.load %arg11[%c320, %c0_82] : memref<512x32xf32, #tpu.memory_space<vmem>>, vector<32x32xf32>
    tpu.vector_store %arg11[%c320, %c0_82], %170 {strides = array<i32>} : memref<512x32xf32, #tpu.memory_space<vmem>>, vector<32x32xf32>,
    %172 = vector.extract_strided_slice %149 {offsets = [0, 11], sizes = [32, 32], strides = [1, 1]} : vector<32x48xf32> to vector<32x32xf32>
    %c352 = arith.constant 352 : index
    %c0_83 = arith.constant 0 : index
    %173 = vector.load %arg11[%c352, %c0_83] : memref<512x32xf32, #tpu.memory_space<vmem>>, vector<32x32xf32>
    tpu.vector_store %arg11[%c352, %c0_83], %172 {strides = array<i32>} : memref<512x32xf32, #tpu.memory_space<vmem>>, vector<32x32xf32>,
    %174 = vector.extract_strided_slice %149 {offsets = [0, 12], sizes = [32, 32], strides = [1, 1]} : vector<32x48xf32> to vector<32x32xf32>
    %c384 = arith.constant 384 : index
    %c0_84 = arith.constant 0 : index
    %175 = vector.load %arg11[%c384, %c0_84] : memref<512x32xf32, #tpu.memory_space<vmem>>, vector<32x32xf32>
    tpu.vector_store %arg11[%c384, %c0_84], %174 {strides = array<i32>} : memref<512x32xf32, #tpu.memory_space<vmem>>, vector<32x32xf32>,
    %176 = vector.extract_strided_slice %149 {offsets = [0, 13], sizes = [32, 32], strides = [1, 1]} : vector<32x48xf32> to vector<32x32xf32>
    %c416 = arith.constant 416 : index
    %c0_85 = arith.constant 0 : index
    %177 = vector.load %arg11[%c416, %c0_85] : memref<512x32xf32, #tpu.memory_space<vmem>>, vector<32x32xf32>
    tpu.vector_store %arg11[%c416, %c0_85], %176 {strides = array<i32>} : memref<512x32xf32, #tpu.memory_space<vmem>>, vector<32x32xf32>,
    %178 = vector.extract_strided_slice %149 {offsets = [0, 14], sizes = [32, 32], strides = [1, 1]} : vector<32x48xf32> to vector<32x32xf32>
    %c448 = arith.constant 448 : index
    %c0_86 = arith.constant 0 : index
    %179 = vector.load %arg11[%c448, %c0_86] : memref<512x32xf32, #tpu.memory_space<vmem>>, vector<32x32xf32>
    tpu.vector_store %arg11[%c448, %c0_86], %178 {strides = array<i32>} : memref<512x32xf32, #tpu.memory_space<vmem>>, vector<32x32xf32>,
    %180 = vector.extract_strided_slice %149 {offsets = [0, 15], sizes = [32, 32], strides = [1, 1]} : vector<32x48xf32> to vector<32x32xf32>
    %c480 = arith.constant 480 : index
    %c0_87 = arith.constant 0 : index
    %181 = vector.load %arg11[%c480, %c0_87] : memref<512x32xf32, #tpu.memory_space<vmem>>, vector<32x32xf32>
    tpu.vector_store %arg11[%c480, %c0_87], %180 {strides = array<i32>} : memref<512x32xf32, #tpu.memory_space<vmem>>, vector<32x32xf32>,
    %c0_88 = arith.constant 0 : index
    %c0_89 = arith.constant 0 : index
    %182 = vector.load %arg11[%c0_88, %c0_89] : memref<512x32xf32, #tpu.memory_space<vmem>>, vector<512x32xf32>
    %cst_90 = arith.constant dense<0.000000e+00> : vector<32x32xf32>
    %183 = tpu.matmul %1, %182, %cst_90 {dimension_numbers = #tpu.dot_dimension_numbers<[1], [0], [0], [1], [0, 0, 1, 1], [], []>} : vector<32x512xf32>, vector<512x32xf32>, vector<32x32xf32> -> vector<32x32xf32>
    %184 = vector.broadcast %5 : vector<32x1xf32> to vector<32x32xf32>
    %185 = arith.addf %183, %184 : vector<32x32xf32>
    %cst_91 = arith.constant 0.000000e+00 : f32
    %186 = vector.broadcast %cst_91 : f32 to vector<32x32xf32>
    %187 = arith.cmpf ogt, %185, %186 : vector<32x32xf32>
    %cst_92 = arith.constant 0.000000e+00 : f32
    %188 = vector.broadcast %cst_92 : f32 to vector<32x32xf32>
    %189 = arith.minimumf %185, %188 : vector<32x32xf32>
    %190 = math.exp %189 : vector<32x32xf32>
    %cst_93 = arith.constant 1.000000e+00 : f32
    %191 = vector.broadcast %cst_93 : f32 to vector<32x32xf32>
    %192 = arith.subf %190, %191 : vector<32x32xf32>
    %193 = arith.select %187, %185, %192 : vector<32x32xi1>, vector<32x32xf32>
    %194 = tpu.transpose %193, [1, 0] : vector<32x32xf32> -> vector<32x32xf32>
    %cst_94 = arith.constant dense<0.000000e+00> : vector<4x32xf32>
    %195 = tpu.matmul %3, %194, %cst_94 {dimension_numbers = #tpu.dot_dimension_numbers<[1], [0], [0], [1], [0, 0, 1, 1], [], []>} : vector<4x32xf32>, vector<32x32xf32>, vector<4x32xf32> -> vector<4x32xf32>
    %196 = vector.extract_strided_slice %195 {offsets = [0, 0], sizes = [1, 32], strides = [1, 1]} : vector<4x32xf32> to vector<1x32xf32>
    %c0_95 = arith.constant 0 : index
    %c0_96 = arith.constant 0 : index
    %197 = vector.load %arg12[%c0_95, %c0_96] : memref<2x128xf32, #tpu.memory_space<vmem>>, vector<1x32xf32>
    tpu.vector_store %arg12[%c0_95, %c0_96], %196 {strides = array<i32>} : memref<2x128xf32, #tpu.memory_space<vmem>>, vector<1x32xf32>,
    %198 = vector.extract_strided_slice %195 {offsets = [1, 0], sizes = [1, 32], strides = [1, 1]} : vector<4x32xf32> to vector<1x32xf32>
    %c0_97 = arith.constant 0 : index
    %c32_98 = arith.constant 32 : index
    %199 = vector.load %arg12[%c0_97, %c32_98] : memref<2x128xf32, #tpu.memory_space<vmem>>, vector<1x32xf32>
    tpu.vector_store %arg12[%c0_97, %c32_98], %198 {strides = array<i32>} : memref<2x128xf32, #tpu.memory_space<vmem>>, vector<1x32xf32>,
    %200 = vector.extract_strided_slice %195 {offsets = [2, 0], sizes = [1, 32], strides = [1, 1]} : vector<4x32xf32> to vector<1x32xf32>
    %c0_99 = arith.constant 0 : index
    %c64_100 = arith.constant 64 : index
    %201 = vector.load %arg12[%c0_99, %c64_100] : memref<2x128xf32, #tpu.memory_space<vmem>>, vector<1x32xf32>
    tpu.vector_store %arg12[%c0_99, %c64_100], %200 {strides = array<i32>} : memref<2x128xf32, #tpu.memory_space<vmem>>, vector<1x32xf32>,
    %202 = vector.extract_strided_slice %195 {offsets = [3, 0], sizes = [1, 32], strides = [1, 1]} : vector<4x32xf32> to vector<1x32xf32>
    %c0_101 = arith.constant 0 : index
    %c96_102 = arith.constant 96 : index
    %203 = vector.load %arg12[%c0_101, %c96_102] : memref<2x128xf32, #tpu.memory_space<vmem>>, vector<1x32xf32>
    tpu.vector_store %arg12[%c0_101, %c96_102], %202 {strides = array<i32>} : memref<2x128xf32, #tpu.memory_space<vmem>>, vector<1x32xf32>,
    %c1_103 = arith.constant 1 : index
    %c0_104 = arith.constant 0 : index
    %c0_105 = arith.constant 0 : index
    %204 = vector.load %arg1[%c1_103, %c0_104, %c0_105] : memref<2x4x128xf32, #tpu.memory_space<vmem>>, vector<1x4x128xf32>
    %205 = vector.shape_cast %204 : vector<1x4x128xf32> to vector<4x128xf32>
    %206 = vector.extract_strided_slice %205 {offsets = [0, 0], sizes = [4, 96], strides = [1, 1]} : vector<4x128xf32> to vector<4x96xf32>
    %c0_106 = arith.constant 0 : index
    %c32_107 = arith.constant 32 : index
    %207 = vector.load %arg10[%c0_106, %c32_107] : memref<256x128xf32, #tpu.memory_space<vmem>>, vector<4x96xf32>
    tpu.vector_store %arg10[%c0_106, %c32_107], %206 {strides = array<i32>} : memref<256x128xf32, #tpu.memory_space<vmem>>, vector<4x96xf32>,
    %208 = vector.extract_strided_slice %205 {offsets = [0, 0], sizes = [4, 97], strides = [1, 1]} : vector<4x128xf32> to vector<4x97xf32>
    %c4_108 = arith.constant 4 : index
    %c31_109 = arith.constant 31 : index
    %209 = vector.load %arg10[%c4_108, %c31_109] : memref<256x128xf32, #tpu.memory_space<vmem>>, vector<4x97xf32>
    tpu.vector_store %arg10[%c4_108, %c31_109], %208 {strides = array<i32>} : memref<256x128xf32, #tpu.memory_space<vmem>>, vector<4x97xf32>,
    %210 = vector.extract_strided_slice %205 {offsets = [0, 0], sizes = [4, 98], strides = [1, 1]} : vector<4x128xf32> to vector<4x98xf32>
    %c8_110 = arith.constant 8 : index
    %c30_111 = arith.constant 30 : index
    %211 = vector.load %arg10[%c8_110, %c30_111] : memref<256x128xf32, #tpu.memory_space<vmem>>, vector<4x98xf32>
    tpu.vector_store %arg10[%c8_110, %c30_111], %210 {strides = array<i32>} : memref<256x128xf32, #tpu.memory_space<vmem>>, vector<4x98xf32>,
    %212 = vector.extract_strided_slice %205 {offsets = [0, 0], sizes = [4, 99], strides = [1, 1]} : vector<4x128xf32> to vector<4x99xf32>
    %c12_112 = arith.constant 12 : index
    %c29_113 = arith.constant 29 : index
    %213 = vector.load %arg10[%c12_112, %c29_113] : memref<256x128xf32, #tpu.memory_space<vmem>>, vector<4x99xf32>
    tpu.vector_store %arg10[%c12_112, %c29_113], %212 {strides = array<i32>} : memref<256x128xf32, #tpu.memory_space<vmem>>, vector<4x99xf32>,
    %214 = vector.extract_strided_slice %205 {offsets = [0, 0], sizes = [4, 100], strides = [1, 1]} : vector<4x128xf32> to vector<4x100xf32>
    %c16_114 = arith.constant 16 : index
    %c28_115 = arith.constant 28 : index
    %215 = vector.load %arg10[%c16_114, %c28_115] : memref<256x128xf32, #tpu.memory_space<vmem>>, vector<4x100xf32>
    tpu.vector_store %arg10[%c16_114, %c28_115], %214 {strides = array<i32>} : memref<256x128xf32, #tpu.memory_space<vmem>>, vector<4x100xf32>,
    %216 = vector.extract_strided_slice %205 {offsets = [0, 0], sizes = [4, 101], strides = [1, 1]} : vector<4x128xf32> to vector<4x101xf32>
    %c20_116 = arith.constant 20 : index
    %c27_117 = arith.constant 27 : index
    %217 = vector.load %arg10[%c20_116, %c27_117] : memref<256x128xf32, #tpu.memory_space<vmem>>, vector<4x101xf32>
    tpu.vector_store %arg10[%c20_116, %c27_117], %216 {strides = array<i32>} : memref<256x128xf32, #tpu.memory_space<vmem>>, vector<4x101xf32>,
    %218 = vector.extract_strided_slice %205 {offsets = [0, 0], sizes = [4, 102], strides = [1, 1]} : vector<4x128xf32> to vector<4x102xf32>
    %c24_118 = arith.constant 24 : index
    %c26_119 = arith.constant 26 : index
    %219 = vector.load %arg10[%c24_118, %c26_119] : memref<256x128xf32, #tpu.memory_space<vmem>>, vector<4x102xf32>
    tpu.vector_store %arg10[%c24_118, %c26_119], %218 {strides = array<i32>} : memref<256x128xf32, #tpu.memory_space<vmem>>, vector<4x102xf32>,
    %220 = vector.extract_strided_slice %205 {offsets = [0, 0], sizes = [4, 103], strides = [1, 1]} : vector<4x128xf32> to vector<4x103xf32>
    %c28_120 = arith.constant 28 : index
    %c25_121 = arith.constant 25 : index
    %221 = vector.load %arg10[%c28_120, %c25_121] : memref<256x128xf32, #tpu.memory_space<vmem>>, vector<4x103xf32>
    tpu.vector_store %arg10[%c28_120, %c25_121], %220 {strides = array<i32>} : memref<256x128xf32, #tpu.memory_space<vmem>>, vector<4x103xf32>,
    %222 = vector.extract_strided_slice %205 {offsets = [0, 0], sizes = [4, 104], strides = [1, 1]} : vector<4x128xf32> to vector<4x104xf32>
    %c32_122 = arith.constant 32 : index
    %c24_123 = arith.constant 24 : index
    %223 = vector.load %arg10[%c32_122, %c24_123] : memref<256x128xf32, #tpu.memory_space<vmem>>, vector<4x104xf32>
    tpu.vector_store %arg10[%c32_122, %c24_123], %222 {strides = array<i32>} : memref<256x128xf32, #tpu.memory_space<vmem>>, vector<4x104xf32>,
    %224 = vector.extract_strided_slice %205 {offsets = [0, 0], sizes = [4, 105], strides = [1, 1]} : vector<4x128xf32> to vector<4x105xf32>
    %c36_124 = arith.constant 36 : index
    %c23_125 = arith.constant 23 : index
    %225 = vector.load %arg10[%c36_124, %c23_125] : memref<256x128xf32, #tpu.memory_space<vmem>>, vector<4x105xf32>
    tpu.vector_store %arg10[%c36_124, %c23_125], %224 {strides = array<i32>} : memref<256x128xf32, #tpu.memory_space<vmem>>, vector<4x105xf32>,
    %226 = vector.extract_strided_slice %205 {offsets = [0, 0], sizes = [4, 106], strides = [1, 1]} : vector<4x128xf32> to vector<4x106xf32>
    %c40_126 = arith.constant 40 : index
    %c22_127 = arith.constant 22 : index
    %227 = vector.load %arg10[%c40_126, %c22_127] : memref<256x128xf32, #tpu.memory_space<vmem>>, vector<4x106xf32>
    tpu.vector_store %arg10[%c40_126, %c22_127], %226 {strides = array<i32>} : memref<256x128xf32, #tpu.memory_space<vmem>>, vector<4x106xf32>,
    %228 = vector.extract_strided_slice %205 {offsets = [0, 0], sizes = [4, 107], strides = [1, 1]} : vector<4x128xf32> to vector<4x107xf32>
    %c44_128 = arith.constant 44 : index
    %c21_129 = arith.constant 21 : index
    %229 = vector.load %arg10[%c44_128, %c21_129] : memref<256x128xf32, #tpu.memory_space<vmem>>, vector<4x107xf32>
    tpu.vector_store %arg10[%c44_128, %c21_129], %228 {strides = array<i32>} : memref<256x128xf32, #tpu.memory_space<vmem>>, vector<4x107xf32>,
    %230 = vector.extract_strided_slice %205 {offsets = [0, 0], sizes = [4, 108], strides = [1, 1]} : vector<4x128xf32> to vector<4x108xf32>
    %c48_130 = arith.constant 48 : index
    %c20_131 = arith.constant 20 : index
    %231 = vector.load %arg10[%c48_130, %c20_131] : memref<256x128xf32, #tpu.memory_space<vmem>>, vector<4x108xf32>
    tpu.vector_store %arg10[%c48_130, %c20_131], %230 {strides = array<i32>} : memref<256x128xf32, #tpu.memory_space<vmem>>, vector<4x108xf32>,
    %232 = vector.extract_strided_slice %205 {offsets = [0, 0], sizes = [4, 109], strides = [1, 1]} : vector<4x128xf32> to vector<4x109xf32>
    %c52_132 = arith.constant 52 : index
    %c19_133 = arith.constant 19 : index
    %233 = vector.load %arg10[%c52_132, %c19_133] : memref<256x128xf32, #tpu.memory_space<vmem>>, vector<4x109xf32>
    tpu.vector_store %arg10[%c52_132, %c19_133], %232 {strides = array<i32>} : memref<256x128xf32, #tpu.memory_space<vmem>>, vector<4x109xf32>,
    %234 = vector.extract_strided_slice %205 {offsets = [0, 0], sizes = [4, 110], strides = [1, 1]} : vector<4x128xf32> to vector<4x110xf32>
    %c56_134 = arith.constant 56 : index
    %c18_135 = arith.constant 18 : index
    %235 = vector.load %arg10[%c56_134, %c18_135] : memref<256x128xf32, #tpu.memory_space<vmem>>, vector<4x110xf32>
    tpu.vector_store %arg10[%c56_134, %c18_135], %234 {strides = array<i32>} : memref<256x128xf32, #tpu.memory_space<vmem>>, vector<4x110xf32>,
    %236 = vector.extract_strided_slice %205 {offsets = [0, 0], sizes = [4, 111], strides = [1, 1]} : vector<4x128xf32> to vector<4x111xf32>
    %c60_136 = arith.constant 60 : index
    %c17_137 = arith.constant 17 : index
    %237 = vector.load %arg10[%c60_136, %c17_137] : memref<256x128xf32, #tpu.memory_space<vmem>>, vector<4x111xf32>
    tpu.vector_store %arg10[%c60_136, %c17_137], %236 {strides = array<i32>} : memref<256x128xf32, #tpu.memory_space<vmem>>, vector<4x111xf32>,
    %238 = vector.extract_strided_slice %205 {offsets = [0, 0], sizes = [4, 112], strides = [1, 1]} : vector<4x128xf32> to vector<4x112xf32>
    %c64_138 = arith.constant 64 : index
    %c16_139 = arith.constant 16 : index
    %239 = vector.load %arg10[%c64_138, %c16_139] : memref<256x128xf32, #tpu.memory_space<vmem>>, vector<4x112xf32>
    tpu.vector_store %arg10[%c64_138, %c16_139], %238 {strides = array<i32>} : memref<256x128xf32, #tpu.memory_space<vmem>>, vector<4x112xf32>,
    %240 = vector.extract_strided_slice %205 {offsets = [0, 0], sizes = [4, 113], strides = [1, 1]} : vector<4x128xf32> to vector<4x113xf32>
    %c68_140 = arith.constant 68 : index
    %c15_141 = arith.constant 15 : index
    %241 = vector.load %arg10[%c68_140, %c15_141] : memref<256x128xf32, #tpu.memory_space<vmem>>, vector<4x113xf32>
    tpu.vector_store %arg10[%c68_140, %c15_141], %240 {strides = array<i32>} : memref<256x128xf32, #tpu.memory_space<vmem>>, vector<4x113xf32>,
    %242 = vector.extract_strided_slice %205 {offsets = [0, 0], sizes = [4, 114], strides = [1, 1]} : vector<4x128xf32> to vector<4x114xf32>
    %c72_142 = arith.constant 72 : index
    %c14_143 = arith.constant 14 : index
    %243 = vector.load %arg10[%c72_142, %c14_143] : memref<256x128xf32, #tpu.memory_space<vmem>>, vector<4x114xf32>
    tpu.vector_store %arg10[%c72_142, %c14_143], %242 {strides = array<i32>} : memref<256x128xf32, #tpu.memory_space<vmem>>, vector<4x114xf32>,
    %244 = vector.extract_strided_slice %205 {offsets = [0, 0], sizes = [4, 115], strides = [1, 1]} : vector<4x128xf32> to vector<4x115xf32>
    %c76_144 = arith.constant 76 : index
    %c13_145 = arith.constant 13 : index
    %245 = vector.load %arg10[%c76_144, %c13_145] : memref<256x128xf32, #tpu.memory_space<vmem>>, vector<4x115xf32>
    tpu.vector_store %arg10[%c76_144, %c13_145], %244 {strides = array<i32>} : memref<256x128xf32, #tpu.memory_space<vmem>>, vector<4x115xf32>,
    %246 = vector.extract_strided_slice %205 {offsets = [0, 0], sizes = [4, 116], strides = [1, 1]} : vector<4x128xf32> to vector<4x116xf32>
    %c80_146 = arith.constant 80 : index
    %c12_147 = arith.constant 12 : index
    %247 = vector.load %arg10[%c80_146, %c12_147] : memref<256x128xf32, #tpu.memory_space<vmem>>, vector<4x116xf32>
    tpu.vector_store %arg10[%c80_146, %c12_147], %246 {strides = array<i32>} : memref<256x128xf32, #tpu.memory_space<vmem>>, vector<4x116xf32>,
    %248 = vector.extract_strided_slice %205 {offsets = [0, 0], sizes = [4, 117], strides = [1, 1]} : vector<4x128xf32> to vector<4x117xf32>
    %c84_148 = arith.constant 84 : index
    %c11_149 = arith.constant 11 : index
    %249 = vector.load %arg10[%c84_148, %c11_149] : memref<256x128xf32, #tpu.memory_space<vmem>>, vector<4x117xf32>
    tpu.vector_store %arg10[%c84_148, %c11_149], %248 {strides = array<i32>} : memref<256x128xf32, #tpu.memory_space<vmem>>, vector<4x117xf32>,
    %250 = vector.extract_strided_slice %205 {offsets = [0, 0], sizes = [4, 118], strides = [1, 1]} : vector<4x128xf32> to vector<4x118xf32>
    %c88_150 = arith.constant 88 : index
    %c10_151 = arith.constant 10 : index
    %251 = vector.load %arg10[%c88_150, %c10_151] : memref<256x128xf32, #tpu.memory_space<vmem>>, vector<4x118xf32>
    tpu.vector_store %arg10[%c88_150, %c10_151], %250 {strides = array<i32>} : memref<256x128xf32, #tpu.memory_space<vmem>>, vector<4x118xf32>,
    %252 = vector.extract_strided_slice %205 {offsets = [0, 0], sizes = [4, 119], strides = [1, 1]} : vector<4x128xf32> to vector<4x119xf32>
    %c92_152 = arith.constant 92 : index
    %c9_153 = arith.constant 9 : index
    %253 = vector.load %arg10[%c92_152, %c9_153] : memref<256x128xf32, #tpu.memory_space<vmem>>, vector<4x119xf32>
    tpu.vector_store %arg10[%c92_152, %c9_153], %252 {strides = array<i32>} : memref<256x128xf32, #tpu.memory_space<vmem>>, vector<4x119xf32>,
    %254 = vector.extract_strided_slice %205 {offsets = [0, 0], sizes = [4, 120], strides = [1, 1]} : vector<4x128xf32> to vector<4x120xf32>
    %c96_154 = arith.constant 96 : index
    %c8_155 = arith.constant 8 : index
    %255 = vector.load %arg10[%c96_154, %c8_155] : memref<256x128xf32, #tpu.memory_space<vmem>>, vector<4x120xf32>
    tpu.vector_store %arg10[%c96_154, %c8_155], %254 {strides = array<i32>} : memref<256x128xf32, #tpu.memory_space<vmem>>, vector<4x120xf32>,
    %256 = vector.extract_strided_slice %205 {offsets = [0, 0], sizes = [4, 121], strides = [1, 1]} : vector<4x128xf32> to vector<4x121xf32>
    %c100_156 = arith.constant 100 : index
    %c7_157 = arith.constant 7 : index
    %257 = vector.load %arg10[%c100_156, %c7_157] : memref<256x128xf32, #tpu.memory_space<vmem>>, vector<4x121xf32>
    tpu.vector_store %arg10[%c100_156, %c7_157], %256 {strides = array<i32>} : memref<256x128xf32, #tpu.memory_space<vmem>>, vector<4x121xf32>,
    %258 = vector.extract_strided_slice %205 {offsets = [0, 0], sizes = [4, 122], strides = [1, 1]} : vector<4x128xf32> to vector<4x122xf32>
    %c104_158 = arith.constant 104 : index
    %c6_159 = arith.constant 6 : index
    %259 = vector.load %arg10[%c104_158, %c6_159] : memref<256x128xf32, #tpu.memory_space<vmem>>, vector<4x122xf32>
    tpu.vector_store %arg10[%c104_158, %c6_159], %258 {strides = array<i32>} : memref<256x128xf32, #tpu.memory_space<vmem>>, vector<4x122xf32>,
    %260 = vector.extract_strided_slice %205 {offsets = [0, 0], sizes = [4, 123], strides = [1, 1]} : vector<4x128xf32> to vector<4x123xf32>
    %c108_160 = arith.constant 108 : index
    %c5_161 = arith.constant 5 : index
    %261 = vector.load %arg10[%c108_160, %c5_161] : memref<256x128xf32, #tpu.memory_space<vmem>>, vector<4x123xf32>
    tpu.vector_store %arg10[%c108_160, %c5_161], %260 {strides = array<i32>} : memref<256x128xf32, #tpu.memory_space<vmem>>, vector<4x123xf32>,
    %262 = vector.extract_strided_slice %205 {offsets = [0, 0], sizes = [4, 124], strides = [1, 1]} : vector<4x128xf32> to vector<4x124xf32>
    %c112_162 = arith.constant 112 : index
    %c4_163 = arith.constant 4 : index
    %263 = vector.load %arg10[%c112_162, %c4_163] : memref<256x128xf32, #tpu.memory_space<vmem>>, vector<4x124xf32>
    tpu.vector_store %arg10[%c112_162, %c4_163], %262 {strides = array<i32>} : memref<256x128xf32, #tpu.memory_space<vmem>>, vector<4x124xf32>,
    %264 = vector.extract_strided_slice %205 {offsets = [0, 0], sizes = [4, 125], strides = [1, 1]} : vector<4x128xf32> to vector<4x125xf32>
    %c116_164 = arith.constant 116 : index
    %c3_165 = arith.constant 3 : index
    %265 = vector.load %arg10[%c116_164, %c3_165] : memref<256x128xf32, #tpu.memory_space<vmem>>, vector<4x125xf32>
    tpu.vector_store %arg10[%c116_164, %c3_165], %264 {strides = array<i32>} : memref<256x128xf32, #tpu.memory_space<vmem>>, vector<4x125xf32>,
    %266 = vector.extract_strided_slice %205 {offsets = [0, 0], sizes = [4, 126], strides = [1, 1]} : vector<4x128xf32> to vector<4x126xf32>
    %c120_166 = arith.constant 120 : index
    %c2_167 = arith.constant 2 : index
    %267 = vector.load %arg10[%c120_166, %c2_167] : memref<256x128xf32, #tpu.memory_space<vmem>>, vector<4x126xf32>
    tpu.vector_store %arg10[%c120_166, %c2_167], %266 {strides = array<i32>} : memref<256x128xf32, #tpu.memory_space<vmem>>, vector<4x126xf32>,
    %268 = vector.extract_strided_slice %205 {offsets = [0, 0], sizes = [4, 127], strides = [1, 1]} : vector<4x128xf32> to vector<4x127xf32>
    %c124_168 = arith.constant 124 : index
    %c1_169 = arith.constant 1 : index
    %269 = vector.load %arg10[%c124_168, %c1_169] : memref<256x128xf32, #tpu.memory_space<vmem>>, vector<4x127xf32>
    tpu.vector_store %arg10[%c124_168, %c1_169], %268 {strides = array<i32>} : memref<256x128xf32, #tpu.memory_space<vmem>>, vector<4x127xf32>,
    %c128_170 = arith.constant 128 : index
    %c0_171 = arith.constant 0 : index
    %270 = vector.load %arg10[%c128_170, %c0_171] : memref<256x128xf32, #tpu.memory_space<vmem>>, vector<4x128xf32>
    tpu.vector_store %arg10[%c128_170, %c0_171], %205 {strides = array<i32>} : memref<256x128xf32, #tpu.memory_space<vmem>>, vector<4x128xf32>,
    %271 = vector.extract_strided_slice %205 {offsets = [0, 1], sizes = [4, 127], strides = [1, 1]} : vector<4x128xf32> to vector<4x127xf32>
    %c132_172 = arith.constant 132 : index
    %c0_173 = arith.constant 0 : index
    %272 = vector.load %arg10[%c132_172, %c0_173] : memref<256x128xf32, #tpu.memory_space<vmem>>, vector<4x127xf32>
    tpu.vector_store %arg10[%c132_172, %c0_173], %271 {strides = array<i32>} : memref<256x128xf32, #tpu.memory_space<vmem>>, vector<4x127xf32>,
    %273 = vector.extract_strided_slice %205 {offsets = [0, 2], sizes = [4, 126], strides = [1, 1]} : vector<4x128xf32> to vector<4x126xf32>
    %c136_174 = arith.constant 136 : index
    %c0_175 = arith.constant 0 : index
    %274 = vector.load %arg10[%c136_174, %c0_175] : memref<256x128xf32, #tpu.memory_space<vmem>>, vector<4x126xf32>
    tpu.vector_store %arg10[%c136_174, %c0_175], %273 {strides = array<i32>} : memref<256x128xf32, #tpu.memory_space<vmem>>, vector<4x126xf32>,
    %275 = vector.extract_strided_slice %205 {offsets = [0, 3], sizes = [4, 125], strides = [1, 1]} : vector<4x128xf32> to vector<4x125xf32>
    %c140_176 = arith.constant 140 : index
    %c0_177 = arith.constant 0 : index
    %276 = vector.load %arg10[%c140_176, %c0_177] : memref<256x128xf32, #tpu.memory_space<vmem>>, vector<4x125xf32>
    tpu.vector_store %arg10[%c140_176, %c0_177], %275 {strides = array<i32>} : memref<256x128xf32, #tpu.memory_space<vmem>>, vector<4x125xf32>,
    %277 = vector.extract_strided_slice %205 {offsets = [0, 4], sizes = [4, 124], strides = [1, 1]} : vector<4x128xf32> to vector<4x124xf32>
    %c144_178 = arith.constant 144 : index
    %c0_179 = arith.constant 0 : index
    %278 = vector.load %arg10[%c144_178, %c0_179] : memref<256x128xf32, #tpu.memory_space<vmem>>, vector<4x124xf32>
    tpu.vector_store %arg10[%c144_178, %c0_179], %277 {strides = array<i32>} : memref<256x128xf32, #tpu.memory_space<vmem>>, vector<4x124xf32>,
    %279 = vector.extract_strided_slice %205 {offsets = [0, 5], sizes = [4, 123], strides = [1, 1]} : vector<4x128xf32> to vector<4x123xf32>
    %c148_180 = arith.constant 148 : index
    %c0_181 = arith.constant 0 : index
    %280 = vector.load %arg10[%c148_180, %c0_181] : memref<256x128xf32, #tpu.memory_space<vmem>>, vector<4x123xf32>
    tpu.vector_store %arg10[%c148_180, %c0_181], %279 {strides = array<i32>} : memref<256x128xf32, #tpu.memory_space<vmem>>, vector<4x123xf32>,
    %281 = vector.extract_strided_slice %205 {offsets = [0, 6], sizes = [4, 122], strides = [1, 1]} : vector<4x128xf32> to vector<4x122xf32>
    %c152_182 = arith.constant 152 : index
    %c0_183 = arith.constant 0 : index
    %282 = vector.load %arg10[%c152_182, %c0_183] : memref<256x128xf32, #tpu.memory_space<vmem>>, vector<4x122xf32>
    tpu.vector_store %arg10[%c152_182, %c0_183], %281 {strides = array<i32>} : memref<256x128xf32, #tpu.memory_space<vmem>>, vector<4x122xf32>,
    %283 = vector.extract_strided_slice %205 {offsets = [0, 7], sizes = [4, 121], strides = [1, 1]} : vector<4x128xf32> to vector<4x121xf32>
    %c156_184 = arith.constant 156 : index
    %c0_185 = arith.constant 0 : index
    %284 = vector.load %arg10[%c156_184, %c0_185] : memref<256x128xf32, #tpu.memory_space<vmem>>, vector<4x121xf32>
    tpu.vector_store %arg10[%c156_184, %c0_185], %283 {strides = array<i32>} : memref<256x128xf32, #tpu.memory_space<vmem>>, vector<4x121xf32>,
    %285 = vector.extract_strided_slice %205 {offsets = [0, 8], sizes = [4, 120], strides = [1, 1]} : vector<4x128xf32> to vector<4x120xf32>
    %c160_186 = arith.constant 160 : index
    %c0_187 = arith.constant 0 : index
    %286 = vector.load %arg10[%c160_186, %c0_187] : memref<256x128xf32, #tpu.memory_space<vmem>>, vector<4x120xf32>
    tpu.vector_store %arg10[%c160_186, %c0_187], %285 {strides = array<i32>} : memref<256x128xf32, #tpu.memory_space<vmem>>, vector<4x120xf32>,
    %287 = vector.extract_strided_slice %205 {offsets = [0, 9], sizes = [4, 119], strides = [1, 1]} : vector<4x128xf32> to vector<4x119xf32>
    %c164_188 = arith.constant 164 : index
    %c0_189 = arith.constant 0 : index
    %288 = vector.load %arg10[%c164_188, %c0_189] : memref<256x128xf32, #tpu.memory_space<vmem>>, vector<4x119xf32>
    tpu.vector_store %arg10[%c164_188, %c0_189], %287 {strides = array<i32>} : memref<256x128xf32, #tpu.memory_space<vmem>>, vector<4x119xf32>,
    %289 = vector.extract_strided_slice %205 {offsets = [0, 10], sizes = [4, 118], strides = [1, 1]} : vector<4x128xf32> to vector<4x118xf32>
    %c168_190 = arith.constant 168 : index
    %c0_191 = arith.constant 0 : index
    %290 = vector.load %arg10[%c168_190, %c0_191] : memref<256x128xf32, #tpu.memory_space<vmem>>, vector<4x118xf32>
    tpu.vector_store %arg10[%c168_190, %c0_191], %289 {strides = array<i32>} : memref<256x128xf32, #tpu.memory_space<vmem>>, vector<4x118xf32>,
    %291 = vector.extract_strided_slice %205 {offsets = [0, 11], sizes = [4, 117], strides = [1, 1]} : vector<4x128xf32> to vector<4x117xf32>
    %c172_192 = arith.constant 172 : index
    %c0_193 = arith.constant 0 : index
    %292 = vector.load %arg10[%c172_192, %c0_193] : memref<256x128xf32, #tpu.memory_space<vmem>>, vector<4x117xf32>
    tpu.vector_store %arg10[%c172_192, %c0_193], %291 {strides = array<i32>} : memref<256x128xf32, #tpu.memory_space<vmem>>, vector<4x117xf32>,
    %293 = vector.extract_strided_slice %205 {offsets = [0, 12], sizes = [4, 116], strides = [1, 1]} : vector<4x128xf32> to vector<4x116xf32>
    %c176_194 = arith.constant 176 : index
    %c0_195 = arith.constant 0 : index
    %294 = vector.load %arg10[%c176_194, %c0_195] : memref<256x128xf32, #tpu.memory_space<vmem>>, vector<4x116xf32>
    tpu.vector_store %arg10[%c176_194, %c0_195], %293 {strides = array<i32>} : memref<256x128xf32, #tpu.memory_space<vmem>>, vector<4x116xf32>,
    %295 = vector.extract_strided_slice %205 {offsets = [0, 13], sizes = [4, 115], strides = [1, 1]} : vector<4x128xf32> to vector<4x115xf32>
    %c180_196 = arith.constant 180 : index
    %c0_197 = arith.constant 0 : index
    %296 = vector.load %arg10[%c180_196, %c0_197] : memref<256x128xf32, #tpu.memory_space<vmem>>, vector<4x115xf32>
    tpu.vector_store %arg10[%c180_196, %c0_197], %295 {strides = array<i32>} : memref<256x128xf32, #tpu.memory_space<vmem>>, vector<4x115xf32>,
    %297 = vector.extract_strided_slice %205 {offsets = [0, 14], sizes = [4, 114], strides = [1, 1]} : vector<4x128xf32> to vector<4x114xf32>
    %c184_198 = arith.constant 184 : index
    %c0_199 = arith.constant 0 : index
    %298 = vector.load %arg10[%c184_198, %c0_199] : memref<256x128xf32, #tpu.memory_space<vmem>>, vector<4x114xf32>
    tpu.vector_store %arg10[%c184_198, %c0_199], %297 {strides = array<i32>} : memref<256x128xf32, #tpu.memory_space<vmem>>, vector<4x114xf32>,
    %299 = vector.extract_strided_slice %205 {offsets = [0, 15], sizes = [4, 113], strides = [1, 1]} : vector<4x128xf32> to vector<4x113xf32>
    %c188_200 = arith.constant 188 : index
    %c0_201 = arith.constant 0 : index
    %300 = vector.load %arg10[%c188_200, %c0_201] : memref<256x128xf32, #tpu.memory_space<vmem>>, vector<4x113xf32>
    tpu.vector_store %arg10[%c188_200, %c0_201], %299 {strides = array<i32>} : memref<256x128xf32, #tpu.memory_space<vmem>>, vector<4x113xf32>,
    %301 = vector.extract_strided_slice %205 {offsets = [0, 16], sizes = [4, 112], strides = [1, 1]} : vector<4x128xf32> to vector<4x112xf32>
    %c192_202 = arith.constant 192 : index
    %c0_203 = arith.constant 0 : index
    %302 = vector.load %arg10[%c192_202, %c0_203] : memref<256x128xf32, #tpu.memory_space<vmem>>, vector<4x112xf32>
    tpu.vector_store %arg10[%c192_202, %c0_203], %301 {strides = array<i32>} : memref<256x128xf32, #tpu.memory_space<vmem>>, vector<4x112xf32>,
    %303 = vector.extract_strided_slice %205 {offsets = [0, 17], sizes = [4, 111], strides = [1, 1]} : vector<4x128xf32> to vector<4x111xf32>
    %c196_204 = arith.constant 196 : index
    %c0_205 = arith.constant 0 : index
    %304 = vector.load %arg10[%c196_204, %c0_205] : memref<256x128xf32, #tpu.memory_space<vmem>>, vector<4x111xf32>
    tpu.vector_store %arg10[%c196_204, %c0_205], %303 {strides = array<i32>} : memref<256x128xf32, #tpu.memory_space<vmem>>, vector<4x111xf32>,
    %305 = vector.extract_strided_slice %205 {offsets = [0, 18], sizes = [4, 110], strides = [1, 1]} : vector<4x128xf32> to vector<4x110xf32>
    %c200_206 = arith.constant 200 : index
    %c0_207 = arith.constant 0 : index
    %306 = vector.load %arg10[%c200_206, %c0_207] : memref<256x128xf32, #tpu.memory_space<vmem>>, vector<4x110xf32>
    tpu.vector_store %arg10[%c200_206, %c0_207], %305 {strides = array<i32>} : memref<256x128xf32, #tpu.memory_space<vmem>>, vector<4x110xf32>,
    %307 = vector.extract_strided_slice %205 {offsets = [0, 19], sizes = [4, 109], strides = [1, 1]} : vector<4x128xf32> to vector<4x109xf32>
    %c204_208 = arith.constant 204 : index
    %c0_209 = arith.constant 0 : index
    %308 = vector.load %arg10[%c204_208, %c0_209] : memref<256x128xf32, #tpu.memory_space<vmem>>, vector<4x109xf32>
    tpu.vector_store %arg10[%c204_208, %c0_209], %307 {strides = array<i32>} : memref<256x128xf32, #tpu.memory_space<vmem>>, vector<4x109xf32>,
    %309 = vector.extract_strided_slice %205 {offsets = [0, 20], sizes = [4, 108], strides = [1, 1]} : vector<4x128xf32> to vector<4x108xf32>
    %c208_210 = arith.constant 208 : index
    %c0_211 = arith.constant 0 : index
    %310 = vector.load %arg10[%c208_210, %c0_211] : memref<256x128xf32, #tpu.memory_space<vmem>>, vector<4x108xf32>
    tpu.vector_store %arg10[%c208_210, %c0_211], %309 {strides = array<i32>} : memref<256x128xf32, #tpu.memory_space<vmem>>, vector<4x108xf32>,
    %311 = vector.extract_strided_slice %205 {offsets = [0, 21], sizes = [4, 107], strides = [1, 1]} : vector<4x128xf32> to vector<4x107xf32>
    %c212_212 = arith.constant 212 : index
    %c0_213 = arith.constant 0 : index
    %312 = vector.load %arg10[%c212_212, %c0_213] : memref<256x128xf32, #tpu.memory_space<vmem>>, vector<4x107xf32>
    tpu.vector_store %arg10[%c212_212, %c0_213], %311 {strides = array<i32>} : memref<256x128xf32, #tpu.memory_space<vmem>>, vector<4x107xf32>,
    %313 = vector.extract_strided_slice %205 {offsets = [0, 22], sizes = [4, 106], strides = [1, 1]} : vector<4x128xf32> to vector<4x106xf32>
    %c216_214 = arith.constant 216 : index
    %c0_215 = arith.constant 0 : index
    %314 = vector.load %arg10[%c216_214, %c0_215] : memref<256x128xf32, #tpu.memory_space<vmem>>, vector<4x106xf32>
    tpu.vector_store %arg10[%c216_214, %c0_215], %313 {strides = array<i32>} : memref<256x128xf32, #tpu.memory_space<vmem>>, vector<4x106xf32>,
    %315 = vector.extract_strided_slice %205 {offsets = [0, 23], sizes = [4, 105], strides = [1, 1]} : vector<4x128xf32> to vector<4x105xf32>
    %c220_216 = arith.constant 220 : index
    %c0_217 = arith.constant 0 : index
    %316 = vector.load %arg10[%c220_216, %c0_217] : memref<256x128xf32, #tpu.memory_space<vmem>>, vector<4x105xf32>
    tpu.vector_store %arg10[%c220_216, %c0_217], %315 {strides = array<i32>} : memref<256x128xf32, #tpu.memory_space<vmem>>, vector<4x105xf32>,
    %317 = vector.extract_strided_slice %205 {offsets = [0, 24], sizes = [4, 104], strides = [1, 1]} : vector<4x128xf32> to vector<4x104xf32>
    %c224_218 = arith.constant 224 : index
    %c0_219 = arith.constant 0 : index
    %318 = vector.load %arg10[%c224_218, %c0_219] : memref<256x128xf32, #tpu.memory_space<vmem>>, vector<4x104xf32>
    tpu.vector_store %arg10[%c224_218, %c0_219], %317 {strides = array<i32>} : memref<256x128xf32, #tpu.memory_space<vmem>>, vector<4x104xf32>,
    %319 = vector.extract_strided_slice %205 {offsets = [0, 25], sizes = [4, 103], strides = [1, 1]} : vector<4x128xf32> to vector<4x103xf32>
    %c228_220 = arith.constant 228 : index
    %c0_221 = arith.constant 0 : index
    %320 = vector.load %arg10[%c228_220, %c0_221] : memref<256x128xf32, #tpu.memory_space<vmem>>, vector<4x103xf32>
    tpu.vector_store %arg10[%c228_220, %c0_221], %319 {strides = array<i32>} : memref<256x128xf32, #tpu.memory_space<vmem>>, vector<4x103xf32>,
    %321 = vector.extract_strided_slice %205 {offsets = [0, 26], sizes = [4, 102], strides = [1, 1]} : vector<4x128xf32> to vector<4x102xf32>
    %c232_222 = arith.constant 232 : index
    %c0_223 = arith.constant 0 : index
    %322 = vector.load %arg10[%c232_222, %c0_223] : memref<256x128xf32, #tpu.memory_space<vmem>>, vector<4x102xf32>
    tpu.vector_store %arg10[%c232_222, %c0_223], %321 {strides = array<i32>} : memref<256x128xf32, #tpu.memory_space<vmem>>, vector<4x102xf32>,
    %323 = vector.extract_strided_slice %205 {offsets = [0, 27], sizes = [4, 101], strides = [1, 1]} : vector<4x128xf32> to vector<4x101xf32>
    %c236_224 = arith.constant 236 : index
    %c0_225 = arith.constant 0 : index
    %324 = vector.load %arg10[%c236_224, %c0_225] : memref<256x128xf32, #tpu.memory_space<vmem>>, vector<4x101xf32>
    tpu.vector_store %arg10[%c236_224, %c0_225], %323 {strides = array<i32>} : memref<256x128xf32, #tpu.memory_space<vmem>>, vector<4x101xf32>,
    %325 = vector.extract_strided_slice %205 {offsets = [0, 28], sizes = [4, 100], strides = [1, 1]} : vector<4x128xf32> to vector<4x100xf32>
    %c240_226 = arith.constant 240 : index
    %c0_227 = arith.constant 0 : index
    %326 = vector.load %arg10[%c240_226, %c0_227] : memref<256x128xf32, #tpu.memory_space<vmem>>, vector<4x100xf32>
    tpu.vector_store %arg10[%c240_226, %c0_227], %325 {strides = array<i32>} : memref<256x128xf32, #tpu.memory_space<vmem>>, vector<4x100xf32>,
    %327 = vector.extract_strided_slice %205 {offsets = [0, 29], sizes = [4, 99], strides = [1, 1]} : vector<4x128xf32> to vector<4x99xf32>
    %c244_228 = arith.constant 244 : index
    %c0_229 = arith.constant 0 : index
    %328 = vector.load %arg10[%c244_228, %c0_229] : memref<256x128xf32, #tpu.memory_space<vmem>>, vector<4x99xf32>
    tpu.vector_store %arg10[%c244_228, %c0_229], %327 {strides = array<i32>} : memref<256x128xf32, #tpu.memory_space<vmem>>, vector<4x99xf32>,
    %329 = vector.extract_strided_slice %205 {offsets = [0, 30], sizes = [4, 98], strides = [1, 1]} : vector<4x128xf32> to vector<4x98xf32>
    %c248_230 = arith.constant 248 : index
    %c0_231 = arith.constant 0 : index
    %330 = vector.load %arg10[%c248_230, %c0_231] : memref<256x128xf32, #tpu.memory_space<vmem>>, vector<4x98xf32>
    tpu.vector_store %arg10[%c248_230, %c0_231], %329 {strides = array<i32>} : memref<256x128xf32, #tpu.memory_space<vmem>>, vector<4x98xf32>,
    %331 = vector.extract_strided_slice %205 {offsets = [0, 31], sizes = [4, 97], strides = [1, 1]} : vector<4x128xf32> to vector<4x97xf32>
    %c252_232 = arith.constant 252 : index
    %c0_233 = arith.constant 0 : index
    %332 = vector.load %arg10[%c252_232, %c0_233] : memref<256x128xf32, #tpu.memory_space<vmem>>, vector<4x97xf32>
    tpu.vector_store %arg10[%c252_232, %c0_233], %331 {strides = array<i32>} : memref<256x128xf32, #tpu.memory_space<vmem>>, vector<4x97xf32>,
    %c0_234 = arith.constant 0 : index
    %c0_235 = arith.constant 0 : index
    %333 = vector.load %arg10[%c0_234, %c0_235] : memref<256x128xf32, #tpu.memory_space<vmem>>, vector<256x128xf32>
    %cst_236 = arith.constant dense<0.000000e+00> : vector<32x128xf32>
    %334 = tpu.matmul %0, %333, %cst_236 {dimension_numbers = #tpu.dot_dimension_numbers<[1], [0], [0], [1], [0, 0, 1, 1], [], []>} : vector<32x256xf32>, vector<256x128xf32>, vector<32x128xf32> -> vector<32x128xf32>
    %335 = vector.broadcast %4 : vector<32x1xf32> to vector<32x128xf32>
    %336 = arith.addf %334, %335 : vector<32x128xf32>
    %cst_237 = arith.constant 0.000000e+00 : f32
    %337 = vector.broadcast %cst_237 : f32 to vector<32x128xf32>
    %338 = arith.cmpf ogt, %336, %337 : vector<32x128xf32>
    %cst_238 = arith.constant 0.000000e+00 : f32
    %339 = vector.broadcast %cst_238 : f32 to vector<32x128xf32>
    %340 = arith.minimumf %336, %339 : vector<32x128xf32>
    %341 = math.exp %340 : vector<32x128xf32>
    %cst_239 = arith.constant 1.000000e+00 : f32
    %342 = vector.broadcast %cst_239 : f32 to vector<32x128xf32>
    %343 = arith.subf %341, %342 : vector<32x128xf32>
    %344 = arith.select %338, %336, %343 : vector<32x128xi1>, vector<32x128xf32>
    %cst_240 = arith.constant dense<0.000000e+00> : vector<32x48xf32>
    %345 = tpu.matmul %344, %2, %cst_240 {dimension_numbers = #tpu.dot_dimension_numbers<[1], [0], [0], [1], [0, 0, 1, 1], [], []>} : vector<32x128xf32>, vector<128x48xf32>, vector<32x48xf32> -> vector<32x48xf32>
    %346 = vector.extract_strided_slice %345 {offsets = [0, 0], sizes = [32, 32], strides = [1, 1]} : vector<32x48xf32> to vector<32x32xf32>
    %c0_241 = arith.constant 0 : index
    %c0_242 = arith.constant 0 : index
    %347 = vector.load %arg11[%c0_241, %c0_242] : memref<512x32xf32, #tpu.memory_space<vmem>>, vector<32x32xf32>
    tpu.vector_store %arg11[%c0_241, %c0_242], %346 {strides = array<i32>} : memref<512x32xf32, #tpu.memory_space<vmem>>, vector<32x32xf32>,
    %348 = vector.extract_strided_slice %345 {offsets = [0, 1], sizes = [32, 32], strides = [1, 1]} : vector<32x48xf32> to vector<32x32xf32>
    %c32_243 = arith.constant 32 : index
    %c0_244 = arith.constant 0 : index
    %349 = vector.load %arg11[%c32_243, %c0_244] : memref<512x32xf32, #tpu.memory_space<vmem>>, vector<32x32xf32>
    tpu.vector_store %arg11[%c32_243, %c0_244], %348 {strides = array<i32>} : memref<512x32xf32, #tpu.memory_space<vmem>>, vector<32x32xf32>,
    %350 = vector.extract_strided_slice %345 {offsets = [0, 2], sizes = [32, 32], strides = [1, 1]} : vector<32x48xf32> to vector<32x32xf32>
    %c64_245 = arith.constant 64 : index
    %c0_246 = arith.constant 0 : index
    %351 = vector.load %arg11[%c64_245, %c0_246] : memref<512x32xf32, #tpu.memory_space<vmem>>, vector<32x32xf32>
    tpu.vector_store %arg11[%c64_245, %c0_246], %350 {strides = array<i32>} : memref<512x32xf32, #tpu.memory_space<vmem>>, vector<32x32xf32>,
    %352 = vector.extract_strided_slice %345 {offsets = [0, 3], sizes = [32, 32], strides = [1, 1]} : vector<32x48xf32> to vector<32x32xf32>
    %c96_247 = arith.constant 96 : index
    %c0_248 = arith.constant 0 : index
    %353 = vector.load %arg11[%c96_247, %c0_248] : memref<512x32xf32, #tpu.memory_space<vmem>>, vector<32x32xf32>
    tpu.vector_store %arg11[%c96_247, %c0_248], %352 {strides = array<i32>} : memref<512x32xf32, #tpu.memory_space<vmem>>, vector<32x32xf32>,
    %354 = vector.extract_strided_slice %345 {offsets = [0, 4], sizes = [32, 32], strides = [1, 1]} : vector<32x48xf32> to vector<32x32xf32>
    %c128_249 = arith.constant 128 : index
    %c0_250 = arith.constant 0 : index
    %355 = vector.load %arg11[%c128_249, %c0_250] : memref<512x32xf32, #tpu.memory_space<vmem>>, vector<32x32xf32>
    tpu.vector_store %arg11[%c128_249, %c0_250], %354 {strides = array<i32>} : memref<512x32xf32, #tpu.memory_space<vmem>>, vector<32x32xf32>,
    %356 = vector.extract_strided_slice %345 {offsets = [0, 5], sizes = [32, 32], strides = [1, 1]} : vector<32x48xf32> to vector<32x32xf32>
    %c160_251 = arith.constant 160 : index
    %c0_252 = arith.constant 0 : index
    %357 = vector.load %arg11[%c160_251, %c0_252] : memref<512x32xf32, #tpu.memory_space<vmem>>, vector<32x32xf32>
    tpu.vector_store %arg11[%c160_251, %c0_252], %356 {strides = array<i32>} : memref<512x32xf32, #tpu.memory_space<vmem>>, vector<32x32xf32>,
    %358 = vector.extract_strided_slice %345 {offsets = [0, 6], sizes = [32, 32], strides = [1, 1]} : vector<32x48xf32> to vector<32x32xf32>
    %c192_253 = arith.constant 192 : index
    %c0_254 = arith.constant 0 : index
    %359 = vector.load %arg11[%c192_253, %c0_254] : memref<512x32xf32, #tpu.memory_space<vmem>>, vector<32x32xf32>
    tpu.vector_store %arg11[%c192_253, %c0_254], %358 {strides = array<i32>} : memref<512x32xf32, #tpu.memory_space<vmem>>, vector<32x32xf32>,
    %360 = vector.extract_strided_slice %345 {offsets = [0, 7], sizes = [32, 32], strides = [1, 1]} : vector<32x48xf32> to vector<32x32xf32>
    %c224_255 = arith.constant 224 : index
    %c0_256 = arith.constant 0 : index
    %361 = vector.load %arg11[%c224_255, %c0_256] : memref<512x32xf32, #tpu.memory_space<vmem>>, vector<32x32xf32>
    tpu.vector_store %arg11[%c224_255, %c0_256], %360 {strides = array<i32>} : memref<512x32xf32, #tpu.memory_space<vmem>>, vector<32x32xf32>,
    %362 = vector.extract_strided_slice %345 {offsets = [0, 8], sizes = [32, 32], strides = [1, 1]} : vector<32x48xf32> to vector<32x32xf32>
    %c256_257 = arith.constant 256 : index
    %c0_258 = arith.constant 0 : index
    %363 = vector.load %arg11[%c256_257, %c0_258] : memref<512x32xf32, #tpu.memory_space<vmem>>, vector<32x32xf32>
    tpu.vector_store %arg11[%c256_257, %c0_258], %362 {strides = array<i32>} : memref<512x32xf32, #tpu.memory_space<vmem>>, vector<32x32xf32>,
    %364 = vector.extract_strided_slice %345 {offsets = [0, 9], sizes = [32, 32], strides = [1, 1]} : vector<32x48xf32> to vector<32x32xf32>
    %c288_259 = arith.constant 288 : index
    %c0_260 = arith.constant 0 : index
    %365 = vector.load %arg11[%c288_259, %c0_260] : memref<512x32xf32, #tpu.memory_space<vmem>>, vector<32x32xf32>
    tpu.vector_store %arg11[%c288_259, %c0_260], %364 {strides = array<i32>} : memref<512x32xf32, #tpu.memory_space<vmem>>, vector<32x32xf32>,
    %366 = vector.extract_strided_slice %345 {offsets = [0, 10], sizes = [32, 32], strides = [1, 1]} : vector<32x48xf32> to vector<32x32xf32>
    %c320_261 = arith.constant 320 : index
    %c0_262 = arith.constant 0 : index
    %367 = vector.load %arg11[%c320_261, %c0_262] : memref<512x32xf32, #tpu.memory_space<vmem>>, vector<32x32xf32>
    tpu.vector_store %arg11[%c320_261, %c0_262], %366 {strides = array<i32>} : memref<512x32xf32, #tpu.memory_space<vmem>>, vector<32x32xf32>,
    %368 = vector.extract_strided_slice %345 {offsets = [0, 11], sizes = [32, 32], strides = [1, 1]} : vector<32x48xf32> to vector<32x32xf32>
    %c352_263 = arith.constant 352 : index
    %c0_264 = arith.constant 0 : index
    %369 = vector.load %arg11[%c352_263, %c0_264] : memref<512x32xf32, #tpu.memory_space<vmem>>, vector<32x32xf32>
    tpu.vector_store %arg11[%c352_263, %c0_264], %368 {strides = array<i32>} : memref<512x32xf32, #tpu.memory_space<vmem>>, vector<32x32xf32>,
    %370 = vector.extract_strided_slice %345 {offsets = [0, 12], sizes = [32, 32], strides = [1, 1]} : vector<32x48xf32> to vector<32x32xf32>
    %c384_265 = arith.constant 384 : index
    %c0_266 = arith.constant 0 : index
    %371 = vector.load %arg11[%c384_265, %c0_266] : memref<512x32xf32, #tpu.memory_space<vmem>>, vector<32x32xf32>
    tpu.vector_store %arg11[%c384_265, %c0_266], %370 {strides = array<i32>} : memref<512x32xf32, #tpu.memory_space<vmem>>, vector<32x32xf32>,
    %372 = vector.extract_strided_slice %345 {offsets = [0, 13], sizes = [32, 32], strides = [1, 1]} : vector<32x48xf32> to vector<32x32xf32>
    %c416_267 = arith.constant 416 : index
    %c0_268 = arith.constant 0 : index
    %373 = vector.load %arg11[%c416_267, %c0_268] : memref<512x32xf32, #tpu.memory_space<vmem>>, vector<32x32xf32>
    tpu.vector_store %arg11[%c416_267, %c0_268], %372 {strides = array<i32>} : memref<512x32xf32, #tpu.memory_space<vmem>>, vector<32x32xf32>,
    %374 = vector.extract_strided_slice %345 {offsets = [0, 14], sizes = [32, 32], strides = [1, 1]} : vector<32x48xf32> to vector<32x32xf32>
    %c448_269 = arith.constant 448 : index
    %c0_270 = arith.constant 0 : index
    %375 = vector.load %arg11[%c448_269, %c0_270] : memref<512x32xf32, #tpu.memory_space<vmem>>, vector<32x32xf32>
    tpu.vector_store %arg11[%c448_269, %c0_270], %374 {strides = array<i32>} : memref<512x32xf32, #tpu.memory_space<vmem>>, vector<32x32xf32>,
    %376 = vector.extract_strided_slice %345 {offsets = [0, 15], sizes = [32, 32], strides = [1, 1]} : vector<32x48xf32> to vector<32x32xf32>
    %c480_271 = arith.constant 480 : index
    %c0_272 = arith.constant 0 : index
    %377 = vector.load %arg11[%c480_271, %c0_272] : memref<512x32xf32, #tpu.memory_space<vmem>>, vector<32x32xf32>
    tpu.vector_store %arg11[%c480_271, %c0_272], %376 {strides = array<i32>} : memref<512x32xf32, #tpu.memory_space<vmem>>, vector<32x32xf32>,
    %c0_273 = arith.constant 0 : index
    %c0_274 = arith.constant 0 : index
    %378 = vector.load %arg11[%c0_273, %c0_274] : memref<512x32xf32, #tpu.memory_space<vmem>>, vector<512x32xf32>
    %cst_275 = arith.constant dense<0.000000e+00> : vector<32x32xf32>
    %379 = tpu.matmul %1, %378, %cst_275 {dimension_numbers = #tpu.dot_dimension_numbers<[1], [0], [0], [1], [0, 0, 1, 1], [], []>} : vector<32x512xf32>, vector<512x32xf32>, vector<32x32xf32> -> vector<32x32xf32>
    %380 = vector.broadcast %5 : vector<32x1xf32> to vector<32x32xf32>
    %381 = arith.addf %379, %380 : vector<32x32xf32>
    %cst_276 = arith.constant 0.000000e+00 : f32
    %382 = vector.broadcast %cst_276 : f32 to vector<32x32xf32>
    %383 = arith.cmpf ogt, %381, %382 : vector<32x32xf32>
    %cst_277 = arith.constant 0.000000e+00 : f32
    %384 = vector.broadcast %cst_277 : f32 to vector<32x32xf32>
    %385 = arith.minimumf %381, %384 : vector<32x32xf32>
    %386 = math.exp %385 : vector<32x32xf32>
    %cst_278 = arith.constant 1.000000e+00 : f32
    %387 = vector.broadcast %cst_278 : f32 to vector<32x32xf32>
    %388 = arith.subf %386, %387 : vector<32x32xf32>
    %389 = arith.select %383, %381, %388 : vector<32x32xi1>, vector<32x32xf32>
    %390 = tpu.transpose %389, [1, 0] : vector<32x32xf32> -> vector<32x32xf32>
    %cst_279 = arith.constant dense<0.000000e+00> : vector<4x32xf32>
    %391 = tpu.matmul %3, %390, %cst_279 {dimension_numbers = #tpu.dot_dimension_numbers<[1], [0], [0], [1], [0, 0, 1, 1], [], []>} : vector<4x32xf32>, vector<32x32xf32>, vector<4x32xf32> -> vector<4x32xf32>
    %392 = vector.extract_strided_slice %391 {offsets = [0, 0], sizes = [1, 32], strides = [1, 1]} : vector<4x32xf32> to vector<1x32xf32>
    %c1_280 = arith.constant 1 : index
    %c0_281 = arith.constant 0 : index
    %393 = vector.load %arg12[%c1_280, %c0_281] : memref<2x128xf32, #tpu.memory_space<vmem>>, vector<1x32xf32>
    tpu.vector_store %arg12[%c1_280, %c0_281], %392 {strides = array<i32>} : memref<2x128xf32, #tpu.memory_space<vmem>>, vector<1x32xf32>,
    %394 = vector.extract_strided_slice %391 {offsets = [1, 0], sizes = [1, 32], strides = [1, 1]} : vector<4x32xf32> to vector<1x32xf32>
    %c1_282 = arith.constant 1 : index
    %c32_283 = arith.constant 32 : index
    %395 = vector.load %arg12[%c1_282, %c32_283] : memref<2x128xf32, #tpu.memory_space<vmem>>, vector<1x32xf32>
    tpu.vector_store %arg12[%c1_282, %c32_283], %394 {strides = array<i32>} : memref<2x128xf32, #tpu.memory_space<vmem>>, vector<1x32xf32>,
    %396 = vector.extract_strided_slice %391 {offsets = [2, 0], sizes = [1, 32], strides = [1, 1]} : vector<4x32xf32> to vector<1x32xf32>
    %c1_284 = arith.constant 1 : index
    %c64_285 = arith.constant 64 : index
    %397 = vector.load %arg12[%c1_284, %c64_285] : memref<2x128xf32, #tpu.memory_space<vmem>>, vector<1x32xf32>
    tpu.vector_store %arg12[%c1_284, %c64_285], %396 {strides = array<i32>} : memref<2x128xf32, #tpu.memory_space<vmem>>, vector<1x32xf32>,
    %398 = vector.extract_strided_slice %391 {offsets = [3, 0], sizes = [1, 32], strides = [1, 1]} : vector<4x32xf32> to vector<1x32xf32>
    %c1_286 = arith.constant 1 : index
    %c96_287 = arith.constant 96 : index
    %399 = vector.load %arg12[%c1_286, %c96_287] : memref<2x128xf32, #tpu.memory_space<vmem>>, vector<1x32xf32>
    tpu.vector_store %arg12[%c1_286, %c96_287], %398 {strides = array<i32>} : memref<2x128xf32, #tpu.memory_space<vmem>>, vector<1x32xf32>,
    %c0_288 = arith.constant 0 : index
    %c0_289 = arith.constant 0 : index
    %400 = vector.load %arg12[%c0_288, %c0_289] : memref<2x128xf32, #tpu.memory_space<vmem>>, vector<2x128xf32>
    %c0_290 = arith.constant 0 : index
    %c0_291 = arith.constant 0 : index
    %401 = vector.load %arg6[%c0_290, %c0_291] : memref<128x10xf32, #tpu.memory_space<vmem>>, vector<128x10xf32>
    %cst_292 = arith.constant dense<0.000000e+00> : vector<2x10xf32>
    %402 = tpu.matmul %400, %401, %cst_292 {dimension_numbers = #tpu.dot_dimension_numbers<[1], [0], [0], [1], [0, 0, 1, 1], [], []>} : vector<2x128xf32>, vector<128x10xf32>, vector<2x10xf32> -> vector<2x10xf32>
    %c0_293 = arith.constant 0 : index
    %c0_294 = arith.constant 0 : index
    %403 = vector.load %arg8[%c0_293, %c0_294] : memref<1x10xf32, #tpu.memory_space<vmem>>, vector<1x10xf32>
    %404 = vector.broadcast %403 : vector<1x10xf32> to vector<2x10xf32>
    %405 = arith.addf %402, %404 : vector<2x10xf32>
    %c0_295 = arith.constant 0 : index
    %c0_296 = arith.constant 0 : index
    %406 = vector.load %arg9[%c0_295, %c0_296] : memref<2x10xf32, #tpu.memory_space<vmem>>, vector<2x10xf32>
    tpu.vector_store %arg9[%c0_295, %c0_296], %405 {strides = array<i32>} : memref<2x10xf32, #tpu.memory_space<vmem>>, vector<2x10xf32>,
    return
  }
  func.func @transform_0(%arg0: i32) -> (i32, i32, i32) {
    %c0_i32 = arith.constant 0 : i32
    %c0_i32_0 = arith.constant 0 : i32
    %c0_i32_1 = arith.constant 0 : i32
    return %arg0, %c0_i32, %c0_i32_0 : i32, i32, i32
  }
  func.func @transform_1(%arg0: i32) -> (i32, i32) {
    %c0_i32 = arith.constant 0 : i32
    %c0_i32_0 = arith.constant 0 : i32
    %c0_i32_1 = arith.constant 0 : i32
    return %c0_i32, %c0_i32_0 : i32, i32
  }
  func.func @transform_2(%arg0: i32) -> (i32, i32) {
    %c0_i32 = arith.constant 0 : i32
    %c0_i32_0 = arith.constant 0 : i32
    %c0_i32_1 = arith.constant 0 : i32
    return %c0_i32, %c0_i32_0 : i32, i32
  }
  func.func @transform_3(%arg0: i32) -> (i32, i32) {
    %c0_i32 = arith.constant 0 : i32
    %c0_i32_0 = arith.constant 0 : i32
    %c0_i32_1 = arith.constant 0 : i32
    return %c0_i32, %c0_i32_0 : i32, i32
  }
  func.func @transform_4(%arg0: i32) -> (i32, i32) {
    %c0_i32 = arith.constant 0 : i32
    %c0_i32_0 = arith.constant 0 : i32
    %c0_i32_1 = arith.constant 0 : i32
    return %c0_i32, %c0_i32_0 : i32, i32
  }
  func.func @transform_5(%arg0: i32) -> (i32, i32) {
    %c0_i32 = arith.constant 0 : i32
    %c0_i32_0 = arith.constant 0 : i32
    %c0_i32_1 = arith.constant 0 : i32
    return %c0_i32, %c0_i32_0 : i32, i32
  }
  func.func @transform_6(%arg0: i32) -> (i32, i32) {
    %c0_i32 = arith.constant 0 : i32
    %c0_i32_0 = arith.constant 0 : i32
    %c0_i32_1 = arith.constant 0 : i32
    return %c0_i32, %c0_i32_0 : i32, i32
  }
  func.func @transform_7(%arg0: i32) -> (i32, i32) {
    %c0_i32 = arith.constant 0 : i32
    %c0_i32_0 = arith.constant 0 : i32
    %c0_i32_1 = arith.constant 0 : i32
    return %c0_i32, %c0_i32_0 : i32, i32
  }
  func.func @transform_8(%arg0: i32) -> (i32, i32) {
    %c0_i32 = arith.constant 0 : i32
    %c0_i32_0 = arith.constant 0 : i32
    return %arg0, %c0_i32 : i32, i32
  }
}

</mosaic_0001>

<bundles_post_ra>
// kernel: tpu_custom_call.1
= control target key start
LH: loop header
LB: loop body
LE: loop exit
PB: predicated region body
PF: predicated region fallthrough
CT: control target
= control target key end

     0   :  { %s2262_s29 = smov 4   ;;  %s2263_s30 = smov 2   ;;  %s3555_s0 = inlined_call_operand.vmem [shape: f32[2,4,128], index: 0, kind: input, shape index: {}]   ;;  %s3556_s1 = inlined_call_operand.vmem [shape: f32[32,256], index: 1, kind: input, shape index: {}]   ;;  %s3557_s2 = inlined_call_operand.vmem [shape: f32[32,512], index: 2, kind: input, shape index: {}]   ;;  %s3558_s3 = inlined_call_operand.vmem [shape: f32[128,48], index: 3, kind: input, shape index: {}]   ;;  %s3559_s4 = inlined_call_operand.vmem [shape: f32[4,32], index: 4, kind: input, shape index: {}]   ;;  %s3560_s5 = inlined_call_operand.vmem [shape: f32[128,10], index: 5, kind: input, shape index: {}]   ;;  %s3561_s6 = inlined_call_operand.vmem [shape: f32[32,2], index: 6, kind: input, shape index: {}]   ;;  %s3562_s7 = inlined_call_operand.vmem [shape: f32[1,10], index: 7, kind: input, shape index: {}]   ;;  %s3563_s8 = inlined_call_operand.hbm [shape: f32[2,10], index: 8, kind: output, shape index: {}]  }
   0x1   :  { %v2379_v0 = vld [vmem:[%s3555_s0] sm:$0xf] }
   0x2   :  { %249 = vrot.lane.b32.xlu1 %v2379_v0, %s2262_s29  ;;  %259 = vrot.lane.b32.xlu0 %v2379_v0, %s2263_s30 }
   0x3   :  { %13 = vsyncpa [#allocation6], 0  ;;  %s2264_s9 = smov 98   ;;  %s2265_s10 = smov 3   ;;  %v2291_v1 = vmov 0.0   ;;  %vm418_vm0 = vcmask 797696  }
   0x4   :  { %415 = vrot.lane.b32.xlu2 %v2379_v0, %s2264_s9  ;;  %s2266_s11 = smov 1   ;;  %s2267_s12 = smov 97   ;;  %106 = vst [vmem:[#allocation2 + $0xf8] sm:$0xff] %v2291_v1  ;;  %vm423_vm1 = vcmask 789504   ;;  %vm3627_vm2 = vcmask 814080   ;;  %vm252_vm3 = vcmask 1043488  }
   0x5   :  { %s2268_s13 = smov 5   ;;  %s2269_s14 = smov 6   ;;  %75 = vst [vmem:[#allocation2] sm:$0xff] %v2291_v1  ;;  %vm262_vm4 = vcmask 1043472   ;;  %vm3614_vm5 = vcmask 1043512   ;;  %vm257_vm6 = vcmask 1043480  }
   0x6   :  { %s2270_s15 = smov 100   ;;  %s2271_s16 = smov 8   ;;  %76 = vst [vmem:[#allocation2 + $0x8] sm:$0xff] %v2291_v1  ;;  %vm267_vm7 = vcmask 1043464   ;;  %vm3613_vm8 = vcmask 1043536   ;;  %vm247_vm9 = vcmask 1043496  }
   0x7   :  { %s2272_s17 = smov 99   ;;  %s2273_s18 = smov 7   ;;  %77 = vst [vmem:[#allocation2 + $0x10] sm:$0xff] %v2291_v1  ;;  %vm3629_vm10 = vcmask 1043504   ;;  %vm3607_vm11 = vcmask 838656   ;;  %vm232_vm12 = vcmask 1043520  }
   0x8   :  { %s3675_s19 = smov 101   ;;  %s3674_s20 = smov 102   ;;  %78 = vst [vmem:[#allocation2 + $0x18] sm:$0xff] %v2291_v1  ;;  %vm3623_vm13 = vcmask 805888   ;;  %vm3610_vm14 = vcmask 863232   ;;  %vm403_vm15 = vcmask 822272  }
   0x9   :  { %s2276_s21 = smov 10   ;;  %s3565_s22 = smov 104   ;;  %79 = vst [vmem:[#allocation2 + $0x20] sm:$0xff] %v2291_v1 }
   0xa   :  { %254 = vrot.lane.b32.xlu1 %v2379_v0, %s2265_s10  ;;  %264 = vrot.lane.b32.xlu0 %v2379_v0, %s2266_s11  ;;  %s3564_s23 = smov 9   ;;  %s2279_s24 = smov 103   ;;  %80 = vst [vmem:[#allocation2 + $0x28] sm:$0xff] %v2291_v1 }
   0xb   :  { %s3566_s25 = smov 11   ;;  %s3567_s26 = smov 12   ;;  %81 = vst [vmem:[#allocation2 + $0x30] sm:$0xff] %v2291_v1 }
   0xc   :  { %420 = vrot.lane.b32.xlu2 %v2379_v0, %s2267_s12  ;;  %s3568_s27 = smov 106   ;;  %s3569_s28 = smov 14   ;;  %82 = vst [vmem:[#allocation2 + $0x38] sm:$0xff] %v2291_v1 }
   0xd   :  { %83 = vst [vmem:[#allocation2 + $0x40] sm:$0xff] %v2291_v1 }
   0xe   :  { %84 = vst [vmem:[#allocation2 + $0x48] sm:$0xff] %v2291_v1 }
   0xf   :  { %85 = vst [vmem:[#allocation2 + $0x50] sm:$0xff] %v2291_v1 }
  0x10   :  { %86 = vst [vmem:[#allocation2 + $0x58] sm:$0xff] %v2291_v1 }
  0x11   :  { %87 = vst [vmem:[#allocation2 + $0x60] sm:$0xff] %v2291_v1 }
  0x12   :  { %244 = vrot.lane.b32.xlu1 %v2379_v0, %s2268_s13  ;;  %239 = vrot.lane.b32.xlu0 %v2379_v0, %s2269_s14  ;;  %88 = vst [vmem:[#allocation2 + $0x68] sm:$0xff] %v2291_v1 }
  0x13   :  { %89 = vst [vmem:[#allocation2 + $0x70] sm:$0xff] %v2291_v1 }
  0x14   :  { %405 = vrot.lane.b32.xlu2 %v2379_v0, %s2270_s15  ;;  %90 = vst [vmem:[#allocation2 + $0x78] sm:$0xff] %v2291_v1 }
  0x15   :  { %91 = vst [vmem:[#allocation2 + $0x80] sm:$0xff] %v2291_v1 }
  0x16   :  { %92 = vst [vmem:[#allocation2 + $0x88] sm:$0xff] %v2291_v1 }
  0x17   :  { %93 = vst [vmem:[#allocation2 + $0x90] sm:$0xff] %v2291_v1 }
  0x18   :  { %94 = vst [vmem:[#allocation2 + $0x98] sm:$0xff] %v2291_v1 }
  0x19   :  { %95 = vst [vmem:[#allocation2 + $0xa0] sm:$0xff] %v2291_v1 }
  0x1a   :  { %229 = vrot.lane.b32.xlu1 %v2379_v0, %s2271_s16  ;;  %410 = vrot.lane.b32.xlu0 %v2379_v0, %s2272_s17  ;;  %96 = vst [vmem:[#allocation2 + $0xa8] sm:$0xff] %v2291_v1 }
  0x1b   :  { %97 = vst [vmem:[#allocation2 + $0xb0] sm:$0xff] %v2291_v1 }
  0x1c   :  { %234 = vrot.lane.b32.xlu2 %v2379_v0, %s2273_s18  ;;  %98 = vst [vmem:[#allocation2 + $0xb8] sm:$0xff] %v2291_v1 }
  0x1d   :  { %99 = vst [vmem:[#allocation2 + $0xc0] sm:$0xff] %v2291_v1 }
  0x1e   :  { %100 = vst [vmem:[#allocation2 + $0xc8] sm:$0xff] %v2291_v1 }
  0x1f   :  { %101 = vst [vmem:[#allocation2 + $0xd0] sm:$0xff] %v2291_v1 }
  0x20   :  { %102 = vst [vmem:[#allocation2 + $0xd8] sm:$0xff] %v2291_v1 }
  0x21   :  { %103 = vst [vmem:[#allocation2 + $0xe0] sm:$0xff] %v2291_v1 }
  0x22   :  { %400 = vrot.lane.b32.xlu1 %v2379_v0, %s3675_s19  ;;  %395 = vrot.lane.b32.xlu0 %v2379_v0, %s3674_s20  ;;  %104 = vst [vmem:[#allocation2 + $0xe8] sm:$0xff] %v2291_v1  ;;  %s3686_s19 = smov 14   ;;  %s3688_s20 = smov 109  }
  0x23   :  { %105 = vst [vmem:[#allocation2 + $0xf0] sm:$0xff] %v2291_v1 }
  0x24   :  { %219 = vrot.lane.b32.xlu2 %v2379_v0, %s2276_s21  ;;  %269 = vst [vmem:[#allocation2 + $0x80] sm:$0xf] %v2379_v0 }
  0x2a   :  { %385 = vrot.lane.b32.xlu1 %v2379_v0, %s3565_s22  ;;  %224 = vrot.lane.b32.xlu0 %v2379_v0, %s3564_s23  ;;  %s3570_s23 = smov 105   ;;  %s3673_s22 = smov 13  }
  0x2c   :  { %390 = vrot.lane.b32.xlu2 %v2379_v0, %s2279_s24 }
  0x32   :  { %214 = vrot.lane.b32.xlu1 %v2379_v0, %s3566_s25  ;;  %209 = vrot.lane.b32.xlu0 %v2379_v0, %s3567_s26  ;;  %s3571_s25 = smov 107   ;;  %s3572_s26 = smov 108  }
  0x34   :  { %375 = vrot.lane.b32.xlu2 %v2379_v0, %s3568_s27  ;;  %s3672_s27 = smov 16  }
  0x3a   :  { %199 = vrot.lane.b32.xlu1 %v2379_v0, %s3569_s28  ;;  %380 = vrot.lane.b32.xlu0 %v2379_v0, %s3570_s23  ;;  %s3573_s28 = smov 110   ;;  %s3574_s23 = smov 15  }
  0x3c   :  { %204 = vrot.lane.b32.xlu2 %v2379_v0, %s3673_s22  ;;  %s3681_s22 = smov 9  }
  0x42   :  { %370 = vrot.lane.b32.xlu1 %v2379_v0, %s3571_s25  ;;  %365 = vrot.lane.b32.xlu0 %v2379_v0, %s3572_s26  ;;  %s3575_s25 = smov 109   ;;  %s3576_s26 = smov 17  }
  0x44   :  { %189 = vrot.lane.b32.xlu2 %v2379_v0, %s3672_s27  ;;  %s3685_s27 = smov 16  }
  0x4a   :  { %355 = vrot.lane.b32.xlu1 %v2379_v0, %s3573_s28  ;;  %194 = vrot.lane.b32.xlu0 %v2379_v0, %s3574_s23  ;;  %s3577_s28 = smov 18   ;;  %s3580_s23 = smov 112  }
  0x4c   :  { %360 = vrot.lane.b32.xlu2 %v2379_v0, %s3575_s25  ;;  %s3578_s25 = smov 20  }
  0x52   :  { %184 = vrot.lane.b32.xlu1 %v2379_v0, %s3576_s26  ;;  %179 = vrot.lane.b32.xlu0 %v2379_v0, %s3577_s28  ;;  %s3579_s26 = smov 111   ;;  %s3581_s28 = smov 19  }
  0x54   :  { %345 = vrot.lane.b32.xlu2 %v2379_v0, %s3580_s23  ;;  %s3667_s23 = smov 22  }
  0x5a   :  { %169 = vrot.lane.b32.xlu1 %v2379_v0, %s3578_s25  ;;  %350 = vrot.lane.b32.xlu0 %v2379_v0, %s3579_s26  ;;  %s3582_s25 = smov 113   ;;  %s3584_s26 = smov 114  }
  0x5c   :  { %174 = vrot.lane.b32.xlu2 %v2379_v0, %s3581_s28  ;;  %s3586_s28 = smov 116  }
  0x5e   :  { %v416_v2 = vpop.permute.xlu2 %415 }
  0x5f   :  { %419 = vst.msk [vmem:[#allocation2 + $0xf8] sm:$0xf] %vm418_vm0, %v416_v2 }
  0x62   :  { %340 = vrot.lane.b32.xlu1 %v2379_v0, %s3582_s25  ;;  %335 = vrot.lane.b32.xlu0 %v2379_v0, %s3584_s26  ;;  %s3588_s25 = smov 21   ;;  %s3589_s26 = smov 115  }
  0x64   :  { %159 = vrot.lane.b32.xlu2 %v2379_v0, %s3667_s23  ;;  %s3689_s23 = smov 107  }
  0x66   :  { %v421_v3 = vpop.permute.xlu2 %420 }
  0x67   :  { %424 = vst.msk [vmem:[#allocation2 + $0xfc] sm:$0xf] %vm423_vm1, %v421_v3 }
  0x6a   :  { %325 = vrot.lane.b32.xlu1 %v2379_v0, %s3586_s28  ;;  %164 = vrot.lane.b32.xlu0 %v2379_v0, %s3588_s25  ;;  %s3591_s28 = smov 23   ;;  %s3592_s25 = smov 24  }
  0x6c   :  { %330 = vrot.lane.b32.xlu2 %v2379_v0, %s3589_s26  ;;  %s3593_s26 = smov 118  }
  0x6e   :  { %v406_v4 = vpop.permute.xlu2 %405  ;;  %v456_v7 = vld [vmem:[#allocation2 + $0xf8] sm:$0xff] }
  0x6f   :  { %409 = vst.msk [vmem:[#allocation2 + $0xf0] sm:$0xf] %vm3627_vm2, %v406_v4  ;;  %506 = vmatpush.msra.mxu1 %v456_v7  ;;  %vm3632_vm2 = vcmask 855040  }
  0x72   :  { %154 = vrot.lane.b32.xlu1 %v2379_v0, %s3591_s28  ;;  %149 = vrot.lane.b32.xlu0 %v2379_v0, %s3592_s25  ;;  %s3595_s28 = smov 26   ;;  %s3596_s25 = smov 117  }
  0x74   :  { %v250_v5 = vpop.permute.xlu1 %249  ;;  %v260_v6 = vpop.permute.xlu0 %259  ;;  %315 = vrot.lane.b32.xlu2 %v2379_v0, %s3593_s26  ;;  %s3598_s26 = smov 25  }
  0x75   :  { %253 = vst.msk [vmem:[#allocation2 + $0x70] sm:$0xf] %vm252_vm3, %v250_v5 }
  0x76   :  { %263 = vst.msk [vmem:[#allocation2 + $0x78] sm:$0xf] %vm262_vm4, %v260_v6  ;;  %v235_v8 = vpop.permute.xlu2 %234 }
  0x77   :  { %238 = vst.msk [vmem:[#allocation2 + $0x64] sm:$0xf] %vm3614_vm5, %v235_v8  ;;  %vm3626_vm5 = vcmask 1043528  }
  0x7a   :  { %139 = vrot.lane.b32.xlu1 %v2379_v0, %s3595_s28  ;;  %320 = vrot.lane.b32.xlu0 %v2379_v0, %s3596_s25  ;;  %s3601_s28 = smov 119   ;;  %s3599_s25 = smov 120  }
  0x7c   :  { %v255_v9 = vpop.permute.xlu1 %254  ;;  %v265_v10 = vpop.permute.xlu0 %264  ;;  %144 = vrot.lane.b32.xlu2 %v2379_v0, %s3598_s26  ;;  %s3603_s26 = smov 28  }
  0x7d   :  { %258 = vst.msk [vmem:[#allocation2 + $0x74] sm:$0xf] %vm257_vm6, %v255_v9 }
  0x7e   :  { %268 = vst.msk [vmem:[#allocation2 + $0x7c] sm:$0xf] %vm267_vm7, %v265_v10  ;;  %v220_v11 = vpop.permute.xlu2 %219 }
  0x7f   :  { %223 = vst.msk [vmem:[#allocation2 + $0x58] sm:$0xf] %vm3613_vm8, %v220_v11  ;;  %vm388_vm8 = vcmask 846848  }
  0x82   :  { %310 = vrot.lane.b32.xlu1 %v2379_v0, %s3601_s28  ;;  %305 = vrot.lane.b32.xlu0 %v2379_v0, %s3599_s25  ;;  %s3604_s25 = smov 122   ;;  %s3606_s28 = smov 27  }
  0x84   :  { %v245_v12 = vpop.permute.xlu1 %244  ;;  %v240_v13 = vpop.permute.xlu0 %239  ;;  %129 = vrot.lane.b32.xlu2 %v2379_v0, %s3603_s26  ;;  %v439_v15 = vld [vmem:[#allocation2 + $0x70] sm:$0xff]  ;;  %s3608_s26 = smov 121  }
  0x85   :  { %248 = vst.msk [vmem:[#allocation2 + $0x6c] sm:$0xf] %vm247_vm9, %v245_v12  ;;  %v440_v14 = vld [vmem:[#allocation2 + $0x78] sm:$0xff] }
  0x86   :  { %243 = vst.msk [vmem:[#allocation2 + $0x68] sm:$0xf] %vm3629_vm10, %v240_v13  ;;  %477 = vmatpush.msra.mxu0 %v440_v14  ;;  %v391_v16 = vpop.permute.xlu2 %390  ;;  %vm3635_vm10 = vcmask 871424  }
  0x87   :  { %394 = vst.msk [vmem:[#allocation2 + $0xe4] sm:$0xf] %vm3607_vm11, %v391_v16  ;;  %vm3622_vm11 = vcmask 830464  }
  0x88   :  { %478 = vmatpush.msra.mxu0 %v439_v15 }
  0x8a   :  { %295 = vrot.lane.b32.xlu1 %v2379_v0, %s3604_s25  ;;  %134 = vrot.lane.b32.xlu0 %v2379_v0, %s3606_s28  ;;  %s3611_s25 = smov 29   ;;  %s3612_s28 = smov 30  }
  0x8c   :  { %v230_v17 = vpop.permute.xlu1 %229  ;;  %v411_v18 = vpop.permute.xlu0 %410  ;;  %300 = vrot.lane.b32.xlu2 %v2379_v0, %s3608_s26  ;;  %s3615_s26 = smov 124  }
  0x8d   :  { %233 = vst.msk [vmem:[#allocation2 + $0x60] sm:$0xf] %vm232_vm12, %v230_v17  ;;  %v438_v19 = vld [vmem:[#allocation2 + $0x68] sm:$0xff] }
  0x8e   :  { %414 = vst.msk [vmem:[#allocation2 + $0xf4] sm:$0xf] %vm3623_vm13, %v411_v18  ;;  %479 = vmatpush.msra.mxu0 %v438_v19  ;;  %v376_v20 = vpop.permute.xlu2 %375  ;;  %vm3630_vm13 = vcmask 1043552  }
  0x8f   :  { %379 = vst.msk [vmem:[#allocation2 + $0xd8] sm:$0xf] %vm3610_vm14, %v376_v20  ;;  %vm3617_vm14 = vcmask 1043560   ;;  %v2326_v20 = vmov 0  }
  0x90   :  { %2162 = vset.pattern.permute.xlu0 %v2326_v20  ;;  %2163 = vset.pattern.permute.xlu1 %v2326_v20 }
  0x91   :  { %2164 = vset.pattern.permute.xlu2 %v2326_v20 }
  0x92   :  { %124 = vrot.lane.b32.xlu1 %v2379_v0, %s3611_s25  ;;  %119 = vrot.lane.b32.xlu0 %v2379_v0, %s3612_s28  ;;  %s3618_s25 = smov 32   ;;  %s3620_s28 = smov 123  }
  0x94   :  { %v401_v21 = vpop.permute.xlu1 %400  ;;  %v396_v22 = vpop.permute.xlu0 %395  ;;  %v437_v23 = vld [vmem:[#allocation2 + $0x60] sm:$0xff]  ;;  %285 = vrot.lane.b32.xlu2 %v2379_v0, %s3615_s26  ;;  %s3624_s26 = smov 31  }
  0x95   :  { %404 = vst.msk [vmem:[#allocation2 + $0xec] sm:$0xf] %vm403_vm15, %v401_v21  ;;  %480 = vmatpush.msra.mxu0 %v437_v23  ;;  %v455_v24 = vld [vmem:[#allocation2 + $0xf0] sm:$0xff] }
  0x96   :  { %399 = vst.msk [vmem:[#allocation2 + $0xe8] sm:$0xf] %vm3622_vm11, %v396_v22  ;;  %507 = vmatpush.msra.mxu1 %v455_v24  ;;  %v205_v25 = vpop.permute.xlu2 %204  ;;  %vm3628_vm11 = vcmask 1043544  }
  0x97   :  { %208 = vst.msk [vmem:[#allocation2 + $0x4c] sm:$0xf] %vm3617_vm14, %v205_v25  ;;  %vm3625_vm14 = vcmask 1043584  }
  0x9a   :  { %109 = vrot.lane.b32.xlu1 %v2379_v0, %s3618_s25  ;;  %290 = vrot.lane.b32.xlu0 %v2379_v0, %s3620_s28  ;;  %s3663_s25 = smov 125   ;;  %s3665_s28 = smov 126  }
  0x9c   :  { %v386_v26 = vpop.permute.xlu1 %385  ;;  %v225_v27 = vpop.permute.xlu0 %224  ;;  %114 = vrot.lane.b32.xlu2 %v2379_v0, %s3624_s26  ;;  %s3661_s26 = smov 127  }
  0x9d   :  { %389 = vst.msk [vmem:[#allocation2 + $0xe0] sm:$0xf] %vm388_vm8, %v386_v26  ;;  %v454_v28 = vld [vmem:[#allocation2 + $0xe8] sm:$0xff]  ;;  %v2570_v26 = vld [vmem:[%s3555_s0 + $0x4] sm:$0xf]  ;;  %s3697_s0 = smov 22  }
  0x9e   :  { %228 = vst.msk [vmem:[#allocation2 + $0x5c] sm:$0xf] %vm3626_vm5, %v225_v27  ;;  %508 = vmatpush.msra.mxu1 %v454_v28  ;;  %v190_v29 = vpop.permute.xlu2 %189  ;;  %vm3633_vm5 = vcmask 1043568   ;;  %v71_v27 = vld [vmem:[%s3561_s6] sm:$0xff] }
  0x9f   :  { %193 = vst.msk [vmem:[#allocation2 + $0x40] sm:$0xf] %vm3625_vm14, %v190_v29  ;;  %vm3631_vm14 = vcmask 887808  }
  0xa2   :  { %280 = vrot.lane.b32.xlu1 %v2379_v0, %s3663_s25  ;;  %275 = vrot.lane.b32.xlu0 %v2379_v0, %s3665_s28  ;;  %s3691_s28 = smov 112   ;;  %s3692_s25 = smov 110  }
  0xa4   :  { %v215_v30 = vpop.permute.xlu1 %214  ;;  %v210_v31 = vpop.permute.xlu0 %209  ;;  %v453_v32 = vld [vmem:[#allocation2 + $0xe0] sm:$0xff]  ;;  %270 = vrot.lane.b32.xlu2 %v2379_v0, %s3661_s26  ;;  %s3690_s26 = smov 108  }
  0xa5   :  { %218 = vst.msk [vmem:[#allocation2 + $0x54] sm:$0xf] %vm3628_vm11, %v215_v30  ;;  %v436_v33 = vld [vmem:[#allocation2 + $0x58] sm:$0xff]  ;;  %509 = vmatpush.msra.mxu1 %v453_v32  ;;  %vm3634_vm11 = vcmask 912384   ;;  %v30_v32 = vld [vmem:[%s3556_s1] sm:$0xff] }
  0xa6   :  { %213 = vst.msk [vmem:[#allocation2 + $0x50] sm:$0xf] %vm3630_vm13, %v210_v31  ;;  %481 = vmatpush.msra.mxu0 %v436_v33  ;;  %v361_v34 = vpop.permute.xlu2 %360  ;;  %vm3636_vm13 = vcmask 879616   ;;  %v72_v31 = vld [vmem:[%s3561_s6 + $0x8] sm:$0xff] }
  0xa7   :  { %364 = vst.msk [vmem:[#allocation2 + $0xcc] sm:$0xf] %vm3631_vm14, %v361_v34  ;;  %vm3637_vm14 = vcmask 1043608  }
  0xaa   :  { %459 = vperm.xlu0 %2162, %v71_v27   ;;  %464 = vperm.xlu1 %2163, %v72_v31  }
  0xac   :  { %v200_v35 = vpop.permute.xlu1 %199  ;;  %v381_v36 = vpop.permute.xlu0 %380 }
  0xad   :  { %203 = vst.msk [vmem:[#allocation2 + $0x48] sm:$0xf] %vm3633_vm5, %v200_v35  ;;  %v435_v37 = vld [vmem:[#allocation2 + $0x50] sm:$0xff]  ;;  %vm3638_vm5 = vcmask 1043576  }
  0xae   :  { %384 = vst.msk [vmem:[#allocation2 + $0xdc] sm:$0xf] %vm3632_vm2, %v381_v36  ;;  %482 = vmatpush.msra.mxu0 %v435_v37  ;;  %v346_v38 = vpop.permute.xlu2 %345  ;;  %vm3639_vm2 = vcmask 896000   ;;  %v74_v37 = vld [vmem:[%s3561_s6 + $0x18] sm:$0xff] }
  0xaf   :  { %349 = vst.msk [vmem:[#allocation2 + $0xc0] sm:$0xf] %vm3634_vm11, %v346_v38  ;;  %vm3640_vm11 = vcmask 1043632   ;;  %v73_v38 = vld [vmem:[%s3561_s6 + $0x10] sm:$0xff] }
  0xb0   :  { %469 = vperm.xlu2 %2164, %v73_v38  }
  0xb2   :  { %1225 = vrot.lane.b32.xlu0 %v2570_v26, %s2262_s29  ;;  %474 = vperm.xlu1 %2163, %v74_v37   ;;  %s3693_s29 = smov 15  }
  0xb4   :  { %v371_v39 = vpop.permute.xlu1 %370  ;;  %v366_v40 = vpop.permute.xlu0 %365  ;;  %v434_v41 = vld [vmem:[#allocation2 + $0x48] sm:$0xff] }
  0xb5   :  { %374 = vst.msk [vmem:[#allocation2 + $0xd4] sm:$0xf] %vm3635_vm10, %v371_v39  ;;  %483 = vmatpush.msra.mxu0 %v434_v41  ;;  %v452_v42 = vld [vmem:[#allocation2 + $0xd8] sm:$0xff]  ;;  %vm3641_vm10 = vcmask 1043592   ;;  %v32_v41 = vld [vmem:[%s3556_s1 + $0x10] sm:$0xff] }
  0xb6   :  { %369 = vst.msk [vmem:[#allocation2 + $0xd0] sm:$0xf] %vm3636_vm13, %v366_v40  ;;  %510 = vmatpush.msra.mxu1 %v452_v42  ;;  %v175_v43 = vpop.permute.xlu2 %174  ;;  %vm3642_vm13 = vcmask 1043600   ;;  %v69_v39 = vld [vmem:[%s3558_s3 + $0x78] sm:$0xff]  ;;  %v68_v40 = vld [vmem:[%s3558_s3 + $0x70] sm:$0xff]  ;;  %v67_v42 = vld [vmem:[%s3558_s3 + $0x68] sm:$0xff] }
  0xb7   :  { %178 = vst.msk [vmem:[#allocation2 + $0x34] sm:$0xf] %vm3637_vm14, %v175_v43  ;;  %vm3643_vm14 = vcmask 936960   ;;  %559 = vmatpush.msra.mxu2 %v69_v39 }
  0xb8   :  { %1237 = vrot.lane.b32.xlu2 %v2570_v26, %s2266_s11  ;;  %s3695_s11 = smov 17  }
  0xb9   :  { %560 = vmatpush.msra.mxu2 %v68_v40 }
  0xba   :  { %1362 = vrot.lane.b32.xlu0 %v2570_v26, %s2267_s12  ;;  %1233 = vrot.lane.b32.xlu1 %v2570_v26, %s2263_s30  ;;  %s3687_s12 = smov 105   ;;  %s3694_s30 = smov 19  }
  0xbb   :  { %561 = vmatpush.msra.mxu2 %v67_v42 }
  0xbc   :  { %v356_v44 = vpop.permute.xlu1 %355  ;;  %v195_v45 = vpop.permute.xlu0 %194 }
  0xbd   :  { %359 = vst.msk [vmem:[#allocation2 + $0xc8] sm:$0xf] %vm3639_vm2, %v356_v44  ;;  %v451_v46 = vld [vmem:[#allocation2 + $0xd0] sm:$0xff]  ;;  %vm3644_vm2 = vcmask 904192   ;;  %v31_v44 = vld [vmem:[%s3556_s1 + $0x8] sm:$0xff] }
  0xbe   :  { %198 = vst.msk [vmem:[#allocation2 + $0x44] sm:$0xf] %vm3638_vm5, %v195_v45  ;;  %511 = vmatpush.msra.mxu1 %v451_v46  ;;  %v160_v47 = vpop.permute.xlu2 %159  ;;  %vm3645_vm5 = vcmask 1043616   ;;  %v66_v45 = vld [vmem:[%s3558_s3 + $0x60] sm:$0xff]  ;;  %v65_v46 = vld [vmem:[%s3558_s3 + $0x58] sm:$0xff] }
  0xbf   :  { %163 = vst.msk [vmem:[#allocation2 + $0x28] sm:$0xf] %vm3640_vm11, %v160_v47  ;;  %vm3646_vm11 = vcmask 961536   ;;  %562 = vmatpush.msra.mxu2 %v66_v45  ;;  %v64_v47 = vld [vmem:[%s3558_s3 + $0x50] sm:$0xff] }
  0xc0   :  { %1358 = vrot.lane.b32.xlu2 %v2570_v26, %s2264_s9  ;;  %s3754_s9 = smov 29  }
  0xc1   :  { %563 = vmatpush.msra.mxu2 %v65_v46 }
  0xc2   :  { %1350 = vrot.lane.b32.xlu0 %v2570_v26, %s2270_s15  ;;  %1229 = vrot.lane.b32.xlu1 %v2570_v26, %s2265_s10  ;;  %s3696_s15 = smov 18   ;;  %s3704_s10 = smov 21  }
  0xc3   :  { %564 = vmatpush.msra.mxu2 %v64_v47 }
  0xc4   :  { %v185_v48 = vpop.permute.xlu1 %184  ;;  %v180_v49 = vpop.permute.xlu0 %179  ;;  %v450_v50 = vld [vmem:[#allocation2 + $0xc8] sm:$0xff] }
  0xc5   :  { %188 = vst.msk [vmem:[#allocation2 + $0x3c] sm:$0xf] %vm3641_vm10, %v185_v48  ;;  %v433_v51 = vld [vmem:[#allocation2 + $0x40] sm:$0xff]  ;;  %512 = vmatpush.msra.mxu1 %v450_v50  ;;  %vm3647_vm10 = vcmask 920576   ;;  %v36_v50 = vld [vmem:[%s3556_s1 + $0x30] sm:$0xff] }
  0xc6   :  { %183 = vst.msk [vmem:[#allocation2 + $0x38] sm:$0xf] %vm3642_vm13, %v180_v49  ;;  %484 = vmatpush.msra.mxu0 %v433_v51  ;;  %v331_v52 = vpop.permute.xlu2 %330  ;;  %vm3648_vm13 = vcmask 928768   ;;  %v34_v48 = vld [vmem:[%s3556_s1 + $0x20] sm:$0xff]  ;;  %v33_v49 = vld [vmem:[%s3556_s1 + $0x18] sm:$0xff]  ;;  %v35_v51 = vld [vmem:[%s3556_s1 + $0x28] sm:$0xff] }
  0xc7   :  { %334 = vst.msk [vmem:[#allocation2 + $0xb4] sm:$0xf] %vm3643_vm14, %v331_v52  ;;  %vm3649_vm14 = vcmask 1043656   ;;  %v37_v52 = vld [vmem:[%s3556_s1 + $0x38] sm:$0xff] }
  0xc8   :  { %1221 = vrot.lane.b32.xlu2 %v2570_v26, %s2268_s13  ;;  %s3677_s13 = smov 101  }
  0xca   :  { %1213 = vrot.lane.b32.xlu0 %v2570_v26, %s2273_s18  ;;  %1217 = vrot.lane.b32.xlu1 %v2570_v26, %s2269_s14  ;;  %s3678_s14 = smov 102   ;;  %s3679_s18 = smov 106  }
  0xcc   :  { %v170_v53 = vpop.permute.xlu1 %169  ;;  %v351_v54 = vpop.permute.xlu0 %350 }
  0xcd   :  { %173 = vst.msk [vmem:[#allocation2 + $0x30] sm:$0xf] %vm3645_vm5, %v170_v53  ;;  %v432_v55 = vld [vmem:[#allocation2 + $0x38] sm:$0xff]  ;;  %vm3650_vm5 = vcmask 1043624   ;;  %v63_v53 = vld [vmem:[%s3558_s3 + $0x48] sm:$0xff] }
  0xce   :  { %354 = vst.msk [vmem:[#allocation2 + $0xc4] sm:$0xf] %vm3644_vm2, %v351_v54  ;;  %485 = vmatpush.msra.mxu0 %v432_v55  ;;  %v316_v56 = vpop.permute.xlu2 %315  ;;  %vm3651_vm2 = vcmask 945152   ;;  %565 = vmatpush.msra.mxu2 %v63_v53  ;;  %v62_v54 = vld [vmem:[%s3558_s3 + $0x40] sm:$0xff]  ;;  %v61_v55 = vld [vmem:[%s3558_s3 + $0x38] sm:$0xff] }
  0xcf   :  { %319 = vst.msk [vmem:[#allocation2 + $0xa8] sm:$0xf] %vm3646_vm11, %v316_v56  ;;  %vm3652_vm11 = vcmask 1043680   ;;  %v60_v56 = vld [vmem:[%s3558_s3 + $0x30] sm:$0xff] }
  0xd0   :  { %1209 = vrot.lane.b32.xlu2 %v2570_v26, %s2271_s16  ;;  %s3682_s16 = smov 13   ;;  %566 = vmatpush.msra.mxu2 %v62_v54 }
  0xd2   :  { %1201 = vrot.lane.b32.xlu0 %v2570_v26, %s2276_s21  ;;  %1354 = vrot.lane.b32.xlu1 %v2570_v26, %s2272_s17  ;;  %s3680_s21 = smov 104   ;;  %s3683_s17 = smov 11  }
  0xd3   :  { %567 = vmatpush.msra.mxu2 %v61_v55 }
  0xd4   :  { %v341_v57 = vpop.permute.xlu1 %340  ;;  %v336_v58 = vpop.permute.xlu0 %335  ;;  %v431_v59 = vld [vmem:[#allocation2 + $0x30] sm:$0xff] }
  0xd5   :  { %344 = vst.msk [vmem:[#allocation2 + $0xbc] sm:$0xf] %vm3647_vm10, %v341_v57  ;;  %486 = vmatpush.msra.mxu0 %v431_v59  ;;  %v449_v60 = vld [vmem:[#allocation2 + $0xc0] sm:$0xff]  ;;  %vm3653_vm10 = vcmask 1043640   ;;  %568 = vmatpush.msra.mxu2 %v60_v56  ;;  %v59_v57 = vld [vmem:[%s3558_s3 + $0x28] sm:$0xff]  ;;  %v57_v59 = vld [vmem:[%s3558_s3 + $0x18] sm:$0xff] }
  0xd6   :  { %339 = vst.msk [vmem:[#allocation2 + $0xb8] sm:$0xf] %vm3648_vm13, %v336_v58  ;;  %513 = vmatpush.msra.mxu1 %v449_v60  ;;  %v145_v61 = vpop.permute.xlu2 %144  ;;  %vm3654_vm13 = vcmask 1043648   ;;  %v58_v58 = vld [vmem:[%s3558_s3 + $0x20] sm:$0xff]  ;;  %v56_v60 = vld [vmem:[%s3558_s3 + $0x10] sm:$0xff] }
  0xd7   :  { %148 = vst.msk [vmem:[#allocation2 + $0x1c] sm:$0xf] %vm3649_vm14, %v145_v61  ;;  %vm3655_vm14 = vcmask 986112   ;;  %569 = vmatpush.msra.mxu2 %v59_v57  ;;  %v55_v61 = vld [vmem:[%s3558_s3 + $0x8] sm:$0xff] }
  0xd8   :  { %1346 = vrot.lane.b32.xlu2 %v2570_v26, %s3677_s13  ;;  %s3698_s13 = smov 20  }
  0xd9   :  { %570 = vmatpush.msra.mxu2 %v58_v58 }
  0xda   :  { %1338 = vrot.lane.b32.xlu0 %v2570_v26, %s2279_s24  ;;  %1342 = vrot.lane.b32.xlu1 %v2570_v26, %s3678_s14  ;;  %s3684_s24 = smov 12   ;;  %s3699_s14 = smov 111  }
  0xdb   :  { %571 = vmatpush.msra.mxu2 %v57_v59 }
  0xdc   :  { %v326_v62 = vpop.permute.xlu1 %325  ;;  %v165_v63 = vpop.permute.xlu0 %164 }
  0xdd   :  { %329 = vst.msk [vmem:[#allocation2 + $0xb0] sm:$0xf] %vm3651_vm2, %v326_v62  ;;  %v448_v0 = vld [vmem:[#allocation2 + $0xb8] sm:$0xff]  ;;  %vm3657_vm2 = vcmask 953344   ;;  %572 = vmatpush.msra.mxu2 %v56_v60  ;;  %v54_v62 = vld [vmem:[%s3558_s3] sm:$0xff] }
  0xde   :  { %168 = vst.msk [vmem:[#allocation2 + $0x2c] sm:$0xf] %vm3650_vm5, %v165_v63  ;;  %514 = vmatpush.msra.mxu1 %v448_v0  ;;  %v130_v1 = vpop.permute.xlu2 %129  ;;  %vm3656_vm5 = vcmask 1043664  }
  0xdf   :  { %133 = vst.msk [vmem:[#allocation2 + $0x10] sm:$0xf] %vm3652_vm11, %v130_v1  ;;  %vm3658_vm11 = vcmask 1010688   ;;  %573 = vmatpush.msra.mxu2 %v55_v61 }
  0xe0   :  { %1334 = vrot.lane.b32.xlu2 %v2570_v26, %s3680_s21  ;;  %s3705_s21 = smov 23  }
  0xe1   :  { %574 = vmatpush.msra.mxu2 %v54_v62 }
  0xe2   :  { %1326 = vrot.lane.b32.xlu0 %v2570_v26, %s3679_s18  ;;  %1205 = vrot.lane.b32.xlu1 %v2570_v26, %s3681_s22  ;;  %s3700_s18 = smov 115   ;;  %s3706_s22 = smov 24  }
  0xe4   :  { %v155_v2 = vpop.permute.xlu1 %154  ;;  %v150_v3 = vpop.permute.xlu0 %149  ;;  %v447_v4 = vld [vmem:[#allocation2 + $0xb0] sm:$0xff] }
  0xe5   :  { %158 = vst.msk [vmem:[#allocation2 + $0x24] sm:$0xf] %vm3653_vm10, %v155_v2  ;;  %v430_v5 = vld [vmem:[#allocation2 + $0x28] sm:$0xff]  ;;  %515 = vmatpush.msra.mxu1 %v447_v4  ;;  %vm3659_vm10 = vcmask 969728  }
  0xe6   :  { %153 = vst.msk [vmem:[#allocation2 + $0x20] sm:$0xf] %vm3654_vm13, %v150_v3  ;;  %487 = vmatpush.msra.mxu0 %v430_v5  ;;  %v301_v6 = vpop.permute.xlu2 %300  ;;  %vm3660_vm13 = vcmask 977920  }
  0xe7   :  { %304 = vst.msk [vmem:[#allocation2 + $0x9c] sm:$0xf] %vm3655_vm14, %v301_v6  ;;  %vm3669_vm14 = vcmask 1043704  }
  0xe8   :  { %1197 = vrot.lane.b32.xlu2 %v2570_v26, %s3683_s17  ;;  %s3715_s17 = smov 122  }
  0xea   :  { %1189 = vrot.lane.b32.xlu0 %v2570_v26, %s3682_s16  ;;  %1193 = vrot.lane.b32.xlu1 %v2570_v26, %s3684_s24  ;;  %s3714_s16 = smov 123   ;;  %s3717_s24 = smov 121  }
  0xec   :  { %v140_v7 = vpop.permute.xlu1 %139  ;;  %v321_v8 = vpop.permute.xlu0 %320 }
  0xed   :  { %143 = vst.msk [vmem:[#allocation2 + $0x18] sm:$0xf] %vm3656_vm5, %v140_v7  ;;  %v429_v9 = vld [vmem:[#allocation2 + $0x20] sm:$0xff]  ;;  %vm298_vm5 = vcmask 994304  }
  0xee   :  { %324 = vst.msk [vmem:[#allocation2 + $0xac] sm:$0xf] %vm3657_vm2, %v321_v8  ;;  %488 = vmatpush.msra.mxu0 %v429_v9  ;;  %v286_v10 = vpop.permute.xlu2 %285  ;;  %vm3671_vm2 = vcmask 1043672  }
  0xef   :  { %289 = vst.msk [vmem:[#allocation2 + $0x90] sm:$0xf] %vm3658_vm11, %v286_v10  ;;  %vm3668_vm11 = vcmask 1035264  }
  0xf0   :  { %1185 = vrot.lane.b32.xlu2 %v2570_v26, %s3686_s19  ;;  %s3701_s19 = smov 113  }
  0xf2   :  { %1177 = vrot.lane.b32.xlu0 %v2570_v26, %s3685_s27  ;;  %1330 = vrot.lane.b32.xlu1 %v2570_v26, %s3687_s12  ;;  %s3720_s27 = smov 119   ;;  %s3721_s12 = smov 118  }
  0xf4   :  { %v311_v11 = vpop.permute.xlu1 %310  ;;  %v306_v12 = vpop.permute.xlu0 %305  ;;  %v428_v13 = vld [vmem:[#allocation2 + $0x18] sm:$0xff] }
  0xf5   :  { %314 = vst.msk [vmem:[#allocation2 + $0xa4] sm:$0xf] %vm3659_vm10, %v311_v11  ;;  %489 = vmatpush.msra.mxu0 %v428_v13  ;;  %v446_v14 = vld [vmem:[#allocation2 + $0xa8] sm:$0xff]  ;;  %vm127_vm10 = vcmask 1043688  }
  0xf6   :  { %309 = vst.msk [vmem:[#allocation2 + $0xa0] sm:$0xf] %vm3660_vm13, %v306_v12  ;;  %516 = vmatpush.msra.mxu1 %v446_v14  ;;  %v115_v15 = vpop.permute.xlu2 %114  ;;  %vm3670_vm13 = vcmask 1043696  }
  0xf7   :  { %118 = vst.msk [vmem:[#allocation2 + $0x4] sm:$0xf] %vm3669_vm14, %v115_v15  ;;  %vm293_vm14 = vcmask 1002496  }
  0xf8   :  { %1322 = vrot.lane.b32.xlu2 %v2570_v26, %s3689_s23  ;;  %s3702_s23 = smov 114  }
  0xfa   :  { %1314 = vrot.lane.b32.xlu0 %v2570_v26, %s3688_s20  ;;  %1318 = vrot.lane.b32.xlu1 %v2570_v26, %s3690_s26  ;;  %s3723_s20 = smov 117   ;;  %s3726_s26 = smov 120  }
  0xfc   :  { %v296_v16 = vpop.permute.xlu1 %295  ;;  %v135_v17 = vpop.permute.xlu0 %134 }
  0xfd   :  { %299 = vst.msk [vmem:[#allocation2 + $0x98] sm:$0xf] %vm298_vm5, %v296_v16  ;;  %v445_v18 = vld [vmem:[#allocation2 + $0xa0] sm:$0xff] }
  0xfe   :  { %138 = vst.msk [vmem:[#allocation2 + $0x14] sm:$0xf] %vm3671_vm2, %v135_v17  ;;  %517 = vmatpush.msra.mxu1 %v445_v18  ;;  %v271_v19 = vpop.permute.xlu2 %270  ;;  %vm3676_vm2 = vcmask 1027072  }
  0xff   :  { %274 = vst.msk [vmem:[#allocation2 + $0x84] sm:$0xf] %vm3668_vm11, %v271_v19  ;;  %vm112_vm11 = vcmask 1043712  }
 0x100   :  { %1310 = vrot.lane.b32.xlu2 %v2570_v26, %s3692_s25  ;;  %s3749_s25 = smov 26  }
 0x102   :  { %1302 = vrot.lane.b32.xlu0 %v2570_v26, %s3691_s28  ;;  %1181 = vrot.lane.b32.xlu1 %v2570_v26, %s3693_s29  ;;  %s3728_s28 = smov 124   ;;  %s3750_s29 = smov 25  }
 0x104   :  { %v125_v21 = vpop.permute.xlu1 %124  ;;  %v120_v22 = vpop.permute.xlu0 %119  ;;  %v444_v23 = vld [vmem:[#allocation2 + $0x98] sm:$0xff] }
 0x105   :  { %128 = vst.msk [vmem:[#allocation2 + $0xc] sm:$0xf] %vm127_vm10, %v125_v21  ;;  %v427_v24 = vld [vmem:[#allocation2 + $0x10] sm:$0xff]  ;;  %518 = vmatpush.msra.mxu1 %v444_v23 }
 0x106   :  { %123 = vst.msk [vmem:[#allocation2 + $0x8] sm:$0xf] %vm3670_vm13, %v120_v22  ;;  %490 = vmatpush.msra.mxu0 %v427_v24  ;;  %v441_v25 = vld [vmem:[#allocation2 + $0x80] sm:$0xff]  ;;  %vm283_vm13 = vcmask 1018880  }
 0x107   :  { %1241 = vst [vmem:[#allocation2 + $0x80] sm:$0xf] %v2570_v26 }
 0x108   :  { %1173 = vrot.lane.b32.xlu2 %v2570_v26, %s3695_s11  ;;  %s3752_s11 = smov 28  }
 0x10a   :  { %1165 = vrot.lane.b32.xlu0 %v2570_v26, %s3694_s30  ;;  %1169 = vrot.lane.b32.xlu1 %v2570_v26, %s3696_s15  ;;  %s3703_s15 = smov 116   ;;  %v2754_v6 = vpop.permute.xlu2 %469  ;;  %s3751_s30 = smov 27  }
 0x10c   :  { %v110_v28 = vpop.permute.xlu1 %109  ;;  %v291_v29 = vpop.permute.xlu0 %290 }
 0x10d   :  { %113 = vst.msk [vmem:[#allocation2] sm:$0xf] %vm112_vm11, %v110_v28  ;;  %v426_v30 = vld [vmem:[#allocation2 + $0x8] sm:$0xff] }
 0x10e   :  { %294 = vst.msk [vmem:[#allocation2 + $0x94] sm:$0xf] %vm293_vm14, %v291_v29  ;;  %491 = vmatpush.msra.mxu0 %v426_v30 }
 0x110   :  { %1161 = vrot.lane.b32.xlu2 %v2570_v26, %s3698_s13  ;;  %s3756_s13 = smov 126  }
 0x112   :  { %1153 = vrot.lane.b32.xlu0 %v2570_v26, %s3697_s0  ;;  %1306 = vrot.lane.b32.xlu1 %v2570_v26, %s3699_s14  ;;  %v1238_v14 = vpop.permute.xlu2 %1237  ;;  %s3753_s0 = smov 30   ;;  %s3757_s14 = smov 31  }
 0x113   :  { %1240 = vst.msk [vmem:[#allocation2 + $0x7c] sm:$0xf] %vm267_vm7, %v1238_v14  ;;  %vm3707_vm7 = vcmask 1043504  }
 0x114   :  { %v281_v33 = vpop.permute.xlu1 %280  ;;  %v276_v34 = vpop.permute.xlu0 %275  ;;  %v425_v35 = vld [vmem:[#allocation2] sm:$0xff] }
 0x115   :  { %284 = vst.msk [vmem:[#allocation2 + $0x8c] sm:$0xf] %vm283_vm13, %v281_v33  ;;  %492 = vmatpush.msra.mxu0 %v425_v35  ;;  %v443_v36 = vld [vmem:[#allocation2 + $0x90] sm:$0xff] }
 0x116   :  { %279 = vst.msk [vmem:[#allocation2 + $0x88] sm:$0xf] %vm3676_vm2, %v276_v34  ;;  %519 = vmatpush.msra.mxu1 %v443_v36  ;;  %493 = vmatmul.f32.vlgmr.msra.gmra.mxu0 %v30_v32 }
 0x118   :  { %1298 = vrot.lane.b32.xlu2 %v2570_v26, %s3701_s19 }
 0x11a   :  { %1290 = vrot.lane.b32.xlu0 %v2570_v26, %s3700_s18  ;;  %1294 = vrot.lane.b32.xlu1 %v2570_v26, %s3702_s23  ;;  %v1359_v24 = vpop.permute.xlu2 %1358 }
 0x11b   :  { %1361 = vst.msk [vmem:[#allocation2 + $0xf8] sm:$0xf] %vm418_vm0, %v1359_v24 }
 0x11c   :  { %v2749_v0 = vpop.permute.xlu0 %459  ;;  %v2751_v1 = vpop.permute.xlu1 %464 }
 0x11d   :  { %v442_v43 = vld [vmem:[#allocation2 + $0x88] sm:$0xff] }
 0x11e   :  { %520 = vmatpush.msra.mxu1 %v442_v43  ;;  %496 = vmatmul.f32.gmra.mxu0 %v32_v41 }
 0x120   :  { %521 = vmatpush.msra.mxu1 %v441_v25  ;;  %1286 = vrot.lane.b32.xlu2 %v2570_v26, %s3703_s15 }
 0x121   :  { %522 = vmatmul.f32.vlgmr.msra.gmra.mxu1 %v31_v44 }
 0x122   :  { %1157 = vrot.lane.b32.xlu1 %v2570_v26, %s3704_s10  ;;  %v1222_v35 = vpop.permute.xlu2 %1221  ;;  %s3755_s10 = smov 32  }
 0x123   :  { %1224 = vst.msk [vmem:[#allocation2 + $0x6c] sm:$0xf] %vm247_vm9, %v1222_v35  ;;  %vm3708_vm9 = vcmask 814080  }
 0x124   :  { %v2756_v7 = vpop.permute.xlu1 %474  ;;  %v1226_v45 = vpop.permute.xlu0 %1225 }
 0x125   :  { %1228 = vst.msk [vmem:[#allocation2 + $0x70] sm:$0xf] %vm252_vm3, %v1226_v45  ;;  %vm3709_vm3 = vcmask 1043544  }
 0x126   :  { %499 = vmatmul.f32.gmra.mxu0 %v34_v48 }
 0x128   :  { %1149 = vrot.lane.b32.xlu2 %v2570_v26, %s3705_s21  ;;  %s3758_s21 = smov 125  }
 0x129   :  { %525 = vmatmul.f32.gmra.mxu1 %v33_v49 }
 0x12a   :  { %1145 = vrot.lane.b32.xlu1 %v2570_v26, %s3706_s22  ;;  %v1210_v41 = vpop.permute.xlu2 %1209  ;;  %s3759_s22 = smov 127  }
 0x12b   :  { %1212 = vst.msk [vmem:[#allocation2 + $0x60] sm:$0xf] %vm232_vm12, %v1210_v41  ;;  %vm3710_vm12 = vcmask 805888  }
 0x12c   :  { %v1234_v15 = vpop.permute.xlu1 %1233  ;;  %v1363_v48 = vpop.permute.xlu0 %1362 }
 0x12d   :  { %1236 = vst.msk [vmem:[#allocation2 + $0x78] sm:$0xf] %vm262_vm4, %v1234_v15 }
 0x12e   :  { %502 = vmatmul.f32.gmra.mxu0 %v36_v50  ;;  %1365 = vst.msk [vmem:[#allocation2 + $0xfc] sm:$0xf] %vm423_vm1, %v1363_v48  ;;  %vm3712_vm1 = vcmask 1043568  }
 0x131   :  { %528 = vmatmul.f32.gmra.mxu1 %v35_v51 }
 0x132   :  { %v1347_v46 = vpop.permute.xlu2 %1346 }
 0x133   :  { %1349 = vst.msk [vmem:[#allocation2 + $0xec] sm:$0xf] %vm403_vm15, %v1347_v46  ;;  %vm3713_vm15 = vcmask 830464  }
 0x134   :  { %v1230_v47 = vpop.permute.xlu1 %1229  ;;  %v1351_v51 = vpop.permute.xlu0 %1350 }
 0x135   :  { %1232 = vst.msk [vmem:[#allocation2 + $0x74] sm:$0xf] %vm257_vm6, %v1230_v47  ;;  %vm3711_vm6 = vcmask 1043512  }
 0x136   :  { %1353 = vst.msk [vmem:[#allocation2 + $0xf0] sm:$0xf] %vm3708_vm9, %v1351_v51  ;;  %vm3724_vm9 = vcmask 896000  }
 0x139   :  { %531 = vmatmul.f32.gmra.mxu1 %v37_v52 }
 0x13a   :  { %v1335_v49 = vpop.permute.xlu2 %1334 }
 0x13b   :  { %1337 = vst.msk [vmem:[#allocation2 + $0xe0] sm:$0xf] %vm388_vm8, %v1335_v49  ;;  %vm588_vm8 = vcmask 261120  }
 0x13c   :  { %v1218_v50 = vpop.permute.xlu1 %1217  ;;  %v1214_v54 = vpop.permute.xlu0 %1213 }
 0x13d   :  { %1220 = vst.msk [vmem:[#allocation2 + $0x68] sm:$0xf] %vm3707_vm7, %v1218_v50  ;;  %vm3722_vm7 = vcmask 838656  }
 0x13e   :  { %1216 = vst.msk [vmem:[#allocation2 + $0x64] sm:$0xf] %vm3711_vm6, %v1214_v54  ;;  %vm3729_vm6 = vcmask 1043592  }
 0x142   :  { %v1198_v52 = vpop.permute.xlu2 %1197 }
 0x143   :  { %1200 = vst.msk [vmem:[#allocation2 + $0x54] sm:$0xf] %vm3709_vm3, %v1198_v52  ;;  %vm3725_vm3 = vcmask 1043552  }
 0x144   :  { %v1355_v53 = vpop.permute.xlu1 %1354  ;;  %v1202_v58 = vpop.permute.xlu0 %1201 }
 0x145   :  { %1357 = vst.msk [vmem:[#allocation2 + $0xf4] sm:$0xf] %vm3710_vm12, %v1355_v53  ;;  %vm3727_vm12 = vcmask 863232  }
 0x14a   :  { %v1186_v55 = vpop.permute.xlu2 %1185 }
 0x14b   :  { %1188 = vst.msk [vmem:[#allocation2 + $0x48] sm:$0xf] %vm3712_vm1, %v1186_v55  ;;  %vm3730_vm1 = vcmask 855040  }
 0x14c   :  { %v1343_v56 = vpop.permute.xlu1 %1342  ;;  %v1339_v62 = vpop.permute.xlu0 %1338 }
 0x14d   :  { %1345 = vst.msk [vmem:[#allocation2 + $0xe8] sm:$0xf] %vm3713_vm15, %v1343_v56  ;;  %vm3731_vm15 = vcmask 1043560  }
 0x14e   :  { %1341 = vst.msk [vmem:[#allocation2 + $0xe4] sm:$0xf] %vm3722_vm7, %v1339_v62  ;;  %vm3735_vm7 = vcmask 920576  }
 0x152   :  { %v1323_v59 = vpop.permute.xlu2 %1322 }
 0x154   :  { %v1206_v60 = vpop.permute.xlu1 %1205 }
 0x193   :  { %v494_v63 = vpop.f32.mrf.mxu0 }
 0x194   :  { %v495_v2 = vadd.f32 %v494_v63, %v2749_v0  ;;  %v1311_v63 = vpop.permute.xlu2 %1310 }
 0x195   :  { %1313 = vst.msk [vmem:[#allocation2 + $0xc8] sm:$0xf] %vm3724_vm9, %v1311_v63  ;;  %vm3736_vm9 = vcmask 1043576  }
 0x19b   :  { %v497_v3 = vpop.f32.mrf.mxu0 }
 0x19c   :  { %v498_v10 = vadd.f32 %v497_v3, %v2751_v1 }
 0x19e   :  { %v523_v4 = vpop.f32.mrf.mxu1 }
 0x19f   :  { %v524_v5 = vadd.f32 %v523_v4, %v495_v2  ;;  %v1194_v2 = vpop.permute.xlu1 %1193  ;;  %v1327_v4 = vpop.permute.xlu0 %1326 }
 0x1a0   :  { %1196 = vst.msk [vmem:[#allocation2 + $0x50] sm:$0xf] %vm3725_vm3, %v1194_v2  ;;  %vm3737_vm3 = vcmask 887808  }
 0x1a1   :  { %v539_v8 = vmin.f32 %v524_v5, 0.0  ;;  %vm535_vm2 = vcmp.gt.f32.partialorder %v524_v5, 0.0  ;;  %1329 = vst.msk [vmem:[#allocation2 + $0xd8] sm:$0xf] %vm3727_vm12, %v1327_v4  ;;  %vm3738_vm12 = vcmask 945152  }
 0x1a3   :  { %v543_v9 = vmul.f32 1.442695, %v539_v8  ;;  %v500_v12 = vpop.f32.mrf.mxu0 }
 0x1a4   :  { %v501_v19 = vadd.f32 %v500_v12, %v2754_v6 }
 0x1a5   :  { %2168 = vpow2.f32 %v543_v9 }
 0x1a6   :  { %v526_v11 = vpop.f32.mrf.mxu1 }
 0x1a7   :  { %v527_v13 = vadd.f32 %v526_v11, %v498_v10  ;;  %v1331_v8 = vpop.permute.xlu1 %1330  ;;  %v1190_v10 = vpop.permute.xlu0 %1189 }
 0x1a8   :  { %1333 = vst.msk [vmem:[#allocation2 + $0xdc] sm:$0xf] %vm3730_vm1, %v1331_v8  ;;  %vm3740_vm1 = vcmask 912384  }
 0x1a9   :  { %v540_v16 = vmin.f32 %v527_v13, 0.0  ;;  %vm536_vm4 = vcmp.gt.f32.partialorder %v527_v13, 0.0  ;;  %1192 = vst.msk [vmem:[#allocation2 + $0x4c] sm:$0xf] %vm3731_vm15, %v1190_v10  ;;  %vm3741_vm15 = vcmask 1043640  }
 0x1ab   :  { %v2169_v17 = vpop.eup %2168  ;;  %v545_v18 = vmul.f32 1.442695, %v540_v16  ;;  %v503_v25 = vpop.f32.mrf.mxu0 }
 0x1ac   :  { %v2066_v20 = vadd.f32 -1.0, %v2169_v17  ;;  %v504_v30 = vadd.f32 %v503_v25, %v2756_v7 }
 0x1ad   :  { %2170 = vpow2.f32 %v545_v18 }
 0x1ae   :  { %v529_v21 = vpop.f32.mrf.mxu1  ;;  %v555_v22 = vsel %vm535_vm2, %v524_v5, %v2066_v20  ;;  %v1174_v5 = vpop.permute.xlu2 %1173 }
 0x1af   :  { %v530_v23 = vadd.f32 %v529_v21, %v501_v19  ;;  %575 = vmatmul.f32.vlgmr.msra.gmra.mxu2 %v555_v22  ;;  %1176 = vst.msk [vmem:[#allocation2 + $0x3c] sm:$0xf] %vm3729_vm6, %v1174_v5  ;;  %v1319_v12 = vpop.permute.xlu1 %1318  ;;  %vm3739_vm6 = vcmask 1043600  }
 0x1b1   :  { %v541_v27 = vmin.f32 %v530_v23, 0.0  ;;  %vm537_vm2 = vcmp.gt.f32.partialorder %v530_v23, 0.0 }
 0x1b3   :  { %v2171_v28 = vpop.eup %2170  ;;  %v547_v29 = vmul.f32 1.442695, %v541_v27 }
 0x1b4   :  { %v2067_v31 = vadd.f32 -1.0, %v2171_v28 }
 0x1b5   :  { %2172 = vpow2.f32 %v547_v29 }
 0x1b6   :  { %v532_v32 = vpop.f32.mrf.mxu1  ;;  %v556_v33 = vsel %vm536_vm4, %v527_v13, %v2067_v31  ;;  %vm3716_vm4 = vcmask 1043536   ;;  %v1162_v11 = vpop.permute.xlu2 %1161 }
 0x1b7   :  { %v533_v34 = vadd.f32 %v532_v32, %v504_v30  ;;  %578 = vmatmul.f32.gmra.mxu2 %v556_v33  ;;  %1204 = vst.msk [vmem:[#allocation2 + $0x58] sm:$0xf] %vm3716_vm4, %v1202_v58  ;;  %vm3732_vm4 = vcmask 1043616   ;;  %v1178_v13 = vpop.permute.xlu0 %1177  ;;  %v1182_v15 = vpop.permute.xlu1 %1181 }
 0x1b8   :  { %1164 = vst.msk [vmem:[#allocation2 + $0x30] sm:$0xf] %vm3732_vm4, %v1162_v11  ;;  %vm3742_vm4 = vcmask 904192  }
 0x1b9   :  { %v542_v36 = vmin.f32 %v533_v34, 0.0  ;;  %vm538_vm0 = vcmp.gt.f32.partialorder %v533_v34, 0.0  ;;  %1184 = vst.msk [vmem:[#allocation2 + $0x44] sm:$0xf] %vm3736_vm9, %v1182_v15  ;;  %vm3746_vm9 = vcmask 1043624  }
 0x1bb   :  { %v2173_v37 = vpop.eup %2172  ;;  %v549_v38 = vmul.f32 1.442695, %v542_v36 }
 0x1bc   :  { %v2068_v39 = vadd.f32 -1.0, %v2173_v37 }
 0x1bd   :  { %2174 = vpow2.f32 %v549_v38 }
 0x1be   :  { %v557_v40 = vsel %vm537_vm2, %v530_v23, %v2068_v39  ;;  %vm3718_vm2 = vcmask 871424   ;;  %v1299_v14 = vpop.permute.xlu2 %1298 }
 0x1bf   :  { %581 = vmatmul.f32.gmra.mxu2 %v557_v40  ;;  %1325 = vst.msk [vmem:[#allocation2 + $0xd4] sm:$0xf] %vm3718_vm2, %v1323_v59  ;;  %vm3733_vm2 = vcmask 879616   ;;  %v1315_v16 = vpop.permute.xlu0 %1314  ;;  %v1170_v18 = vpop.permute.xlu1 %1169 }
 0x1c0   :  { %1321 = vst.msk [vmem:[#allocation2 + $0xd0] sm:$0xf] %vm3733_vm2, %v1319_v12  ;;  %vm3743_vm2 = vcmask 1043608  }
 0x1c1   :  { %1301 = vst.msk [vmem:[#allocation2 + $0xbc] sm:$0xf] %vm3735_vm7, %v1299_v14  ;;  %vm3745_vm7 = vcmask 1043632  }
 0x1c2   :  { %1317 = vst.msk [vmem:[#allocation2 + $0xcc] sm:$0xf] %vm3737_vm3, %v1315_v16  ;;  %vm3747_vm3 = vcmask 936960  }
 0x1c3   :  { %v2175_v42 = vpop.eup %2174  ;;  %1172 = vst.msk [vmem:[#allocation2 + $0x38] sm:$0xf] %vm3739_vm6, %v1170_v18  ;;  %vm3760_vm6 = vcmask 953344  }
 0x1c4   :  { %v2069_v43 = vadd.f32 -1.0, %v2175_v42 }
 0x1c6   :  { %v558_v44 = vsel %vm538_vm0, %v533_v34, %v2069_v43  ;;  %vm3719_vm0 = vcmask 1043528   ;;  %v1287_v17 = vpop.permute.xlu2 %1286 }
 0x1c7   :  { %584 = vmatmul.f32.gmra.mxu2 %v558_v44  ;;  %1208 = vst.msk [vmem:[#allocation2 + $0x5c] sm:$0xf] %vm3719_vm0, %v1206_v60  ;;  %vm3734_vm0 = vcmask 1043584   ;;  %v1303_v19 = vpop.permute.xlu0 %1302  ;;  %v1307_v21 = vpop.permute.xlu1 %1306 }
 0x1c8   :  { %1180 = vst.msk [vmem:[#allocation2 + $0x40] sm:$0xf] %vm3734_vm0, %v1178_v13  ;;  %vm3744_vm0 = vcmask 928768  }
 0x1c9   :  { %1289 = vst.msk [vmem:[#allocation2 + $0xb0] sm:$0xf] %vm3738_vm12, %v1287_v17  ;;  %vm3748_vm12 = vcmask 1043648  }
 0x1ca   :  { %1305 = vst.msk [vmem:[#allocation2 + $0xc0] sm:$0xf] %vm3740_vm1, %v1303_v19  ;;  %vm3761_vm1 = vcmask 1043664  }
 0x1cb   :  { %1309 = vst.msk [vmem:[#allocation2 + $0xc4] sm:$0xf] %vm3742_vm4, %v1307_v21  ;;  %vm3763_vm4 = vcmask 961536  }
 0x1ce   :  { %v1150_v20 = vpop.permute.xlu2 %1149 }
 0x1cf   :  { %1152 = vst.msk [vmem:[#allocation2 + $0x24] sm:$0xf] %vm3741_vm15, %v1150_v20  ;;  %v1166_v22 = vpop.permute.xlu0 %1165  ;;  %v1295_v23 = vpop.permute.xlu1 %1294  ;;  %vm3762_vm15 = vcmask 969728  }
 0x1d0   :  { %1168 = vst.msk [vmem:[#allocation2 + $0x34] sm:$0xf] %vm3743_vm2, %v1166_v22  ;;  %vm3765_vm2 = vcmask 1043656  }
 0x1d1   :  { %1297 = vst.msk [vmem:[#allocation2 + $0xb8] sm:$0xf] %vm3744_vm0, %v1295_v23  ;;  %vm3768_vm0 = vcmask 1043696  }
 0x1d7   :  { %v1154_v24 = vpop.permute.xlu0 %1153  ;;  %v1158_v25 = vpop.permute.xlu1 %1157 }
 0x1d8   :  { %1156 = vst.msk [vmem:[#allocation2 + $0x28] sm:$0xf] %vm3745_vm7, %v1154_v24  ;;  %vm3771_vm7 = vcmask 1027072  }
 0x1d9   :  { %1160 = vst.msk [vmem:[#allocation2 + $0x2c] sm:$0xf] %vm3746_vm9, %v1158_v25  ;;  %vm3772_vm9 = vcmask 1043704  }
 0x1df   :  { %v1291_v27 = vpop.permute.xlu0 %1290  ;;  %v1146_v28 = vpop.permute.xlu1 %1145 }
 0x1e0   :  { %1293 = vst.msk [vmem:[#allocation2 + $0xb4] sm:$0xf] %vm3747_vm3, %v1291_v27  ;;  %vm3773_vm3 = vcmask 1035264  }
 0x1e1   :  { %1148 = vst.msk [vmem:[#allocation2 + $0x20] sm:$0xf] %vm3748_vm12, %v1146_v28 }
 0x232   :  { %v2778_v57 = vpop.f32.mrf.mxu2 }
 0x233   :  { %661 = vrot.lane.b32.xlu2 %v2778_v57, %s3714_s16  ;;  %677 = vrot.lane.b32.xlu0 %v2778_v57, %s3715_s17  ;;  %589 = vst.msk [vmem:[#allocation3] sm:$0xff] %vm588_vm8, %v2778_v57 }
 0x234   :  { %693 = vrot.lane.b32.xlu1 %v2778_v57, %s3717_s24 }
 0x23a   :  { %v2791_v61 = vpop.f32.mrf.mxu2 }
 0x23b   :  { %725 = vrot.lane.b32.xlu2 %v2778_v57, %s3720_s27  ;;  %741 = vrot.lane.b32.xlu0 %v2778_v57, %s3721_s12  ;;  %590 = vst.msk [vmem:[#allocation3 + $0x8] sm:$0xff] %vm588_vm8, %v2791_v61 }
 0x23c   :  { %757 = vrot.lane.b32.xlu1 %v2778_v57, %s3723_s20 }
 0x242   :  { %v2804_v3 = vpop.f32.mrf.mxu2 }
 0x243   :  { %709 = vrot.lane.b32.xlu0 %v2778_v57, %s3726_s26  ;;  %695 = vrot.lane.b32.xlu2 %v2791_v61, %s3717_s24  ;;  %591 = vst.msk [vmem:[#allocation3 + $0x10] sm:$0xff] %vm588_vm8, %v2804_v3 }
 0x244   :  { %645 = vrot.lane.b32.xlu1 %v2778_v57, %s3728_s28 }
 0x24a   :  { %v2817_v9 = vpop.f32.mrf.mxu2 }
 0x24b   :  { %663 = vrot.lane.b32.xlu0 %v2791_v61, %s3714_s16  ;;  %759 = vrot.lane.b32.xlu2 %v2791_v61, %s3723_s20  ;;  %592 = vst.msk [vmem:[#allocation3 + $0x18] sm:$0xff] %vm588_vm8, %v2817_v9 }
 0x24c   :  { %679 = vrot.lane.b32.xlu1 %v2791_v61, %s3715_s17 }
 0x253   :  { %727 = vrot.lane.b32.xlu0 %v2791_v61, %s3720_s27  ;;  %647 = vrot.lane.b32.xlu2 %v2791_v61, %s3728_s28 }
 0x254   :  { %743 = vrot.lane.b32.xlu1 %v2791_v61, %s3721_s12 }
 0x25b   :  { %711 = vrot.lane.b32.xlu2 %v2791_v61, %s3726_s26  ;;  %697 = vrot.lane.b32.xlu0 %v2804_v3, %s3717_s24 }
 0x25c   :  { %665 = vrot.lane.b32.xlu1 %v2804_v3, %s3714_s16 }
 0x263   :  { %681 = vrot.lane.b32.xlu2 %v2804_v3, %s3715_s17  ;;  %761 = vrot.lane.b32.xlu0 %v2804_v3, %s3723_s20 }
 0x264   :  { %729 = vrot.lane.b32.xlu1 %v2804_v3, %s3720_s27 }
 0x26b   :  { %745 = vrot.lane.b32.xlu2 %v2804_v3, %s3721_s12  ;;  %649 = vrot.lane.b32.xlu0 %v2804_v3, %s3728_s28 }
 0x26c   :  { %763 = vrot.lane.b32.xlu1 %v2817_v9, %s3723_s20 }
 0x273   :  { %713 = vrot.lane.b32.xlu0 %v2804_v3, %s3726_s26  ;;  %699 = vrot.lane.b32.xlu2 %v2817_v9, %s3717_s24 }
 0x274   :  { %1282 = vrot.lane.b32.xlu1 %v2570_v26, %s3723_s20 }
 0x27b   :  { %683 = vrot.lane.b32.xlu0 %v2817_v9, %s3715_s17  ;;  %667 = vrot.lane.b32.xlu2 %v2817_v9, %s3714_s16 }
 0x27c   :  { %651 = vrot.lane.b32.xlu1 %v2817_v9, %s3728_s28 }
 0x283   :  { %747 = vrot.lane.b32.xlu0 %v2817_v9, %s3721_s12  ;;  %731 = vrot.lane.b32.xlu2 %v2817_v9, %s3720_s27 }
 0x284   :  { %715 = vrot.lane.b32.xlu1 %v2817_v9, %s3726_s26 }
 0x28b   :  { %1278 = vrot.lane.b32.xlu0 %v2570_v26, %s3721_s12  ;;  %1137 = vrot.lane.b32.xlu2 %v2570_v26, %s3749_s25 }
 0x28c   :  { %1270 = vrot.lane.b32.xlu1 %v2570_v26, %s3726_s26 }
 0x28d   :  { %v662_v29 = vpop.permute.xlu2 %661 }
 0x28e   :  { %673 = vst.msk [vmem:[#allocation3 + $0xa0] sm:$0xff] %vm588_vm8, %v662_v29 }
 0x293   :  { %1141 = vrot.lane.b32.xlu0 %v2570_v26, %s3750_s29  ;;  %1274 = vrot.lane.b32.xlu2 %v2570_v26, %s3720_s27 }
 0x294   :  { %1133 = vrot.lane.b32.xlu1 %v2570_v26, %s3751_s30  ;;  %s2328_s30 = smov 64  }
 0x295   :  { %v726_v30 = vpop.permute.xlu2 %725  ;;  %v857_v28 = vld [vmem:[#allocation3 + $0xa0] sm:$0xff] }
 0x296   :  { %737 = vst.msk [vmem:[#allocation3 + $0x120] sm:$0xff] %vm588_vm8, %v726_v30 }
 0x29b   :  { %1129 = vrot.lane.b32.xlu0 %v2570_v26, %s3752_s11  ;;  %1262 = vrot.lane.b32.xlu2 %v2570_v26, %s3715_s17 }
 0x29c   :  { %1121 = vrot.lane.b32.xlu1 %v2570_v26, %s3753_s0 }
 0x29d   :  { %v696_v31 = vpop.permute.xlu2 %695 }
 0x29e   :  { %706 = vst.msk [vmem:[#allocation3 + $0xe8] sm:$0xff] %vm588_vm8, %v696_v31 }
 0x2a3   :  { %1266 = vrot.lane.b32.xlu0 %v2570_v26, %s3717_s24  ;;  %1125 = vrot.lane.b32.xlu2 %v2570_v26, %s3754_s9 }
 0x2a4   :  { %1258 = vrot.lane.b32.xlu1 %v2570_v26, %s3714_s16 }
 0x2a5   :  { %v678_v32 = vpop.permute.xlu0 %677  ;;  %v760_v33 = vpop.permute.xlu2 %759  ;;  %v866_v54 = vld [vmem:[#allocation3 + $0xe8] sm:$0xff] }
 0x2a6   :  { %689 = vst.msk [vmem:[#allocation3 + $0xc0] sm:$0xff] %vm588_vm8, %v678_v32  ;;  %v694_v34 = vpop.permute.xlu1 %693 }
 0x2a7   :  { %705 = vst.msk [vmem:[#allocation3 + $0xe0] sm:$0xff] %vm588_vm8, %v694_v34 }
 0x2a8   :  { %770 = vst.msk [vmem:[#allocation3 + $0x168] sm:$0xff] %vm588_vm8, %v760_v33 }
 0x2ab   :  { %1254 = vrot.lane.b32.xlu0 %v2570_v26, %s3728_s28  ;;  %1113 = vrot.lane.b32.xlu2 %v2570_v26, %s3755_s10 }
 0x2ac   :  { %1246 = vrot.lane.b32.xlu1 %v2570_v26, %s3756_s13 }
 0x2ad   :  { %v742_v35 = vpop.permute.xlu0 %741  ;;  %v648_v36 = vpop.permute.xlu2 %647 }
 0x2ae   :  { %753 = vst.msk [vmem:[#allocation3 + $0x140] sm:$0xff] %vm588_vm8, %v742_v35  ;;  %v758_v37 = vpop.permute.xlu1 %757  ;;  %v865_v55 = vld [vmem:[#allocation3 + $0xe0] sm:$0xff] }
 0x2af   :  { %769 = vst.msk [vmem:[#allocation3 + $0x160] sm:$0xff] %vm588_vm8, %v758_v37  ;;  %v882_v5 = vld [vmem:[#allocation3 + $0x168] sm:$0xff]  ;;  %v873_v37 = vld [vmem:[#allocation3 + $0x120] sm:$0xff] }
 0x2b0   :  { %658 = vst.msk [vmem:[#allocation3 + $0x88] sm:$0xff] %vm588_vm8, %v648_v36 }
 0x2b3   :  { %1117 = vrot.lane.b32.xlu0 %v2570_v26, %s3757_s14  ;;  %1250 = vrot.lane.b32.xlu2 %v2570_v26, %s3758_s21 }
 0x2b4   :  { %821 = vrot.lane.b32.xlu1 %v2778_v57, %s3701_s19 }
 0x2b5   :  { %v710_v38 = vpop.permute.xlu0 %709  ;;  %v712_v39 = vpop.permute.xlu2 %711  ;;  %v877_v27 = vld [vmem:[#allocation3 + $0x140] sm:$0xff] }
 0x2b6   :  { %721 = vst.msk [vmem:[#allocation3 + $0x100] sm:$0xff] %vm588_vm8, %v710_v38  ;;  %v646_v40 = vpop.permute.xlu1 %645  ;;  %v881_v8 = vld [vmem:[#allocation3 + $0x160] sm:$0xff] }
 0x2b7   :  { %657 = vst.msk [vmem:[#allocation3 + $0x80] sm:$0xff] %vm588_vm8, %v646_v40  ;;  %v854_v36 = vld [vmem:[#allocation3 + $0x88] sm:$0xff] }
 0x2b8   :  { %722 = vst.msk [vmem:[#allocation3 + $0x108] sm:$0xff] %vm588_vm8, %v712_v39  ;;  %v39_v39 = vld [vmem:[%s3557_s2 + $0x8] sm:$0xff] }
 0x2bb   :  { %1242 = vrot.lane.b32.xlu0 %v2570_v26, %s3759_s22  ;;  %825 = vrot.lane.b32.xlu2 %v2804_v3, %s3701_s19 }
 0x2bc   :  { %827 = vrot.lane.b32.xlu1 %v2817_v9, %s3701_s19 }
 0x2bd   :  { %v664_v41 = vpop.permute.xlu0 %663  ;;  %v682_v42 = vpop.permute.xlu2 %681 }
 0x2be   :  { %674 = vst.msk [vmem:[#allocation3 + $0xa8] sm:$0xff] %vm588_vm8, %v664_v41  ;;  %v680_v43 = vpop.permute.xlu1 %679  ;;  %v853_v38 = vld [vmem:[#allocation3 + $0x80] sm:$0xff]  ;;  %v1381_v41 = vld [vmem:[#allocation2 + $0x78] sm:$0xff] }
 0x2bf   :  { %690 = vst.msk [vmem:[#allocation3 + $0xc8] sm:$0xff] %vm588_vm8, %v680_v43 }
 0x2c0   :  { %691 = vst.msk [vmem:[#allocation3 + $0xd0] sm:$0xff] %vm588_vm8, %v682_v42 }
 0x2c3   :  { %823 = vrot.lane.b32.xlu0 %v2791_v61, %s3701_s19  ;;  %811 = vrot.lane.b32.xlu2 %v2817_v9, %s3702_s23 }
 0x2c4   :  { %807 = vrot.lane.b32.xlu1 %v2791_v61, %s3702_s23 }
 0x2c5   :  { %v728_v26 = vpop.permute.xlu0 %727  ;;  %v746_v44 = vpop.permute.xlu2 %745  ;;  %v858_v25 = vld [vmem:[#allocation3 + $0xa8] sm:$0xff] }
 0x2c6   :  { %738 = vst.msk [vmem:[#allocation3 + $0x128] sm:$0xff] %vm588_vm8, %v728_v26  ;;  %v744_v45 = vpop.permute.xlu1 %743  ;;  %v862_v18 = vld [vmem:[#allocation3 + $0xc8] sm:$0xff] }
 0x2c7   :  { %754 = vst.msk [vmem:[#allocation3 + $0x148] sm:$0xff] %vm588_vm8, %v744_v45  ;;  %v863_v17 = vld [vmem:[#allocation3 + $0xd0] sm:$0xff] }
 0x2c8   :  { %755 = vst.msk [vmem:[#allocation3 + $0x150] sm:$0xff] %vm588_vm8, %v746_v44  ;;  %v1380_v44 = vld [vmem:[#allocation2 + $0x70] sm:$0xff] }
 0x2cb   :  { %809 = vrot.lane.b32.xlu0 %v2804_v3, %s3702_s23  ;;  %805 = vrot.lane.b32.xlu2 %v2778_v57, %s3702_s23 }
 0x2cc   :  { %793 = vrot.lane.b32.xlu1 %v2804_v3, %s3700_s18 }
 0x2cd   :  { %v698_v46 = vpop.permute.xlu0 %697  ;;  %v700_v47 = vpop.permute.xlu2 %699 }
 0x2ce   :  { %v666_v48 = vpop.permute.xlu1 %665  ;;  %707 = vst.msk [vmem:[#allocation3 + $0xf0] sm:$0xff] %vm588_vm8, %v698_v46  ;;  %v1379_v46 = vld [vmem:[#allocation2 + $0x68] sm:$0xff] }
 0x2cf   :  { %675 = vst.msk [vmem:[#allocation3 + $0xb0] sm:$0xff] %vm588_vm8, %v666_v48  ;;  %v879_v24 = vld [vmem:[#allocation3 + $0x150] sm:$0xff]  ;;  %v1378_v48 = vld [vmem:[#allocation2 + $0x60] sm:$0xff] }
 0x2d0   :  { %708 = vst.msk [vmem:[#allocation3 + $0xf8] sm:$0xff] %vm588_vm8, %v700_v47  ;;  %v870_v47 = vld [vmem:[#allocation3 + $0x108] sm:$0xff] }
 0x2d3   :  { %795 = vrot.lane.b32.xlu0 %v2817_v9, %s3700_s18  ;;  %791 = vrot.lane.b32.xlu2 %v2791_v61, %s3700_s18 }
 0x2d4   :  { %779 = vrot.lane.b32.xlu1 %v2817_v9, %s3703_s15 }
 0x2d5   :  { %v762_v49 = vpop.permute.xlu0 %761  ;;  %v668_v50 = vpop.permute.xlu2 %667  ;;  %v867_v53 = vld [vmem:[#allocation3 + $0xf0] sm:$0xff] }
 0x2d6   :  { %v730_v51 = vpop.permute.xlu1 %729  ;;  %771 = vst.msk [vmem:[#allocation3 + $0x170] sm:$0xff] %vm588_vm8, %v762_v49  ;;  %v869_v49 = vld [vmem:[#allocation3 + $0x100] sm:$0xff] }
 0x2d7   :  { %739 = vst.msk [vmem:[#allocation3 + $0x130] sm:$0xff] %vm588_vm8, %v730_v51  ;;  %v868_v52 = vld [vmem:[#allocation3 + $0xf8] sm:$0xff] }
 0x2d8   :  { %676 = vst.msk [vmem:[#allocation3 + $0xb8] sm:$0xff] %vm588_vm8, %v668_v50  ;;  %946 = vmatpush.msrb.mxu0 %v868_v52  ;;  %v40_v50 = vld [vmem:[%s3557_s2 + $0x10] sm:$0xff]  ;;  %v1397_v51 = vld [vmem:[#allocation2 + $0xf8] sm:$0xff]  ;;  %v43_v52 = vld [vmem:[%s3557_s2 + $0x28] sm:$0xff] }
 0x2da   :  { %947 = vmatpush.msrb.mxu0 %v867_v53 }
 0x2db   :  { %789 = vrot.lane.b32.xlu0 %v2778_v57, %s3700_s18  ;;  %777 = vrot.lane.b32.xlu2 %v2804_v3, %s3703_s15 }
 0x2dc   :  { %948 = vmatpush.msrb.mxu0 %v866_v54  ;;  %773 = vrot.lane.b32.xlu1 %v2778_v57, %s3703_s15  ;;  %v1377_v54 = vld [vmem:[#allocation2 + $0x58] sm:$0xff] }
 0x2dd   :  { %v650_v56 = vpop.permute.xlu0 %649  ;;  %v732_v58 = vpop.permute.xlu2 %731  ;;  %v883_v4 = vld [vmem:[#allocation3 + $0x170] sm:$0xff] }
 0x2de   :  { %949 = vmatpush.msrb.mxu0 %v865_v55  ;;  %659 = vst.msk [vmem:[#allocation3 + $0x90] sm:$0xff] %vm588_vm8, %v650_v56  ;;  %v764_v59 = vpop.permute.xlu1 %763  ;;  %v875_v34 = vld [vmem:[#allocation3 + $0x130] sm:$0xff] }
 0x2df   :  { %772 = vst.msk [vmem:[#allocation3 + $0x178] sm:$0xff] %vm588_vm8, %v764_v59  ;;  %v860_v23 = vld [vmem:[#allocation3 + $0xb8] sm:$0xff]  ;;  %v1376_v59 = vld [vmem:[#allocation2 + $0x50] sm:$0xff] }
 0x2e0   :  { %740 = vst.msk [vmem:[#allocation3 + $0x138] sm:$0xff] %vm588_vm8, %v732_v58  ;;  %v1396_v58 = vld [vmem:[#allocation2 + $0xf0] sm:$0xff] }
 0x2e3   :  { %775 = vrot.lane.b32.xlu0 %v2791_v61, %s3703_s15  ;;  %635 = vrot.lane.b32.xlu2 %v2817_v9, %s3758_s21 }
 0x2e4   :  { %631 = vrot.lane.b32.xlu1 %v2791_v61, %s3758_s21 }
 0x2e5   :  { %v714_v60 = vpop.permute.xlu0 %713  ;;  %v1138_v62 = vpop.permute.xlu2 %1137  ;;  %v855_v35 = vld [vmem:[#allocation3 + $0x90] sm:$0xff] }
 0x2e6   :  { %723 = vst.msk [vmem:[#allocation3 + $0x110] sm:$0xff] %vm588_vm8, %v714_v60  ;;  %v1283_v63 = vpop.permute.xlu1 %1282  ;;  %v884_v2 = vld [vmem:[#allocation3 + $0x178] sm:$0xff]  ;;  %v1395_v60 = vld [vmem:[#allocation2 + $0xe8] sm:$0xff] }
 0x2e7   :  { %1285 = vst.msk [vmem:[#allocation2 + $0xac] sm:$0xf] %vm3760_vm6, %v1283_v63  ;;  %975 = vmatpush.msrb.mxu1 %v884_v2  ;;  %v876_v31 = vld [vmem:[#allocation3 + $0x138] sm:$0xff]  ;;  %v1394_v63 = vld [vmem:[#allocation2 + $0xe0] sm:$0xff] }
 0x2e8   :  { %1140 = vst.msk [vmem:[#allocation2 + $0x18] sm:$0xf] %vm3761_vm1, %v1138_v62  ;;  %v1375_v62 = vld [vmem:[#allocation2 + $0x48] sm:$0xff]  ;;  %v1374_v2 = vld [vmem:[#allocation2 + $0x40] sm:$0xff] }
 0x2e9   :  { %976 = vmatpush.msrb.mxu1 %v883_v4  ;;  %v44_v4 = vld [vmem:[%s3557_s2 + $0x30] sm:$0xff] }
 0x2eb   :  { %977 = vmatpush.msrb.mxu1 %v882_v5  ;;  %633 = vrot.lane.b32.xlu0 %v2804_v3, %s3758_s21  ;;  %v1393_v5 = vld [vmem:[#allocation2 + $0xd8] sm:$0xff] }
 0x2ec   :  { %617 = vrot.lane.b32.xlu1 %v2804_v3, %s3756_s13  ;;  %629 = vrot.lane.b32.xlu2 %v2778_v57, %s3758_s21 }
 0x2ed   :  { %978 = vmatpush.msrb.mxu1 %v881_v8  ;;  %v684_v10 = vpop.permute.xlu0 %683  ;;  %v1275_v11 = vpop.permute.xlu2 %1274  ;;  %v871_v45 = vld [vmem:[#allocation3 + $0x110] sm:$0xff]  ;;  %v47_v8 = vld [vmem:[%s3557_s2 + $0x48] sm:$0xff] }
 0x2ee   :  { %692 = vst.msk [vmem:[#allocation3 + $0xd8] sm:$0xff] %vm588_vm8, %v684_v10  ;;  %v652_v12 = vpop.permute.xlu1 %651 }
 0x2ef   :  { %660 = vst.msk [vmem:[#allocation3 + $0x98] sm:$0xff] %vm588_vm8, %v652_v12 }
 0x2f0   :  { %1277 = vst.msk [vmem:[#allocation2 + $0xa4] sm:$0xf] %vm3762_vm15, %v1275_v11  ;;  %v1373_v11 = vld [vmem:[#allocation2 + $0x38] sm:$0xff] }
 0x2f3   :  { %619 = vrot.lane.b32.xlu0 %v2817_v9, %s3756_s13 }
 0x2f4   :  { %603 = vrot.lane.b32.xlu1 %v2817_v9, %s3759_s22  ;;  %615 = vrot.lane.b32.xlu2 %v2791_v61, %s3756_s13  ;;  %v861_v9 = vld [vmem:[#allocation3 + $0xc0] sm:$0xff] }
 0x2f5   :  { %v748_v13 = vpop.permute.xlu0 %747  ;;  %v1263_v14 = vpop.permute.xlu2 %1262  ;;  %v864_v15 = vld [vmem:[#allocation3 + $0xd8] sm:$0xff] }
 0x2f6   :  { %756 = vst.msk [vmem:[#allocation3 + $0x158] sm:$0xff] %vm588_vm8, %v748_v13  ;;  %v716_v16 = vpop.permute.xlu1 %715  ;;  %950 = vmatpush.msrb.mxu0 %v864_v15  ;;  %v856_v33 = vld [vmem:[#allocation3 + $0x98] sm:$0xff]  ;;  %v1372_v15 = vld [vmem:[#allocation2 + $0x30] sm:$0xff] }
 0x2f7   :  { %724 = vst.msk [vmem:[#allocation3 + $0x118] sm:$0xff] %vm588_vm8, %v716_v16  ;;  %v1391_v16 = vld [vmem:[#allocation2 + $0xc8] sm:$0xff] }
 0x2f8   :  { %1265 = vst.msk [vmem:[#allocation2 + $0x98] sm:$0xf] %vm298_vm5, %v1263_v14  ;;  %951 = vmatpush.msrb.mxu0 %v863_v17  ;;  %vm3764_vm5 = vcmask 977920   ;;  %v1392_v14 = vld [vmem:[#allocation2 + $0xd0] sm:$0xff]  ;;  %v1371_v17 = vld [vmem:[#allocation2 + $0x28] sm:$0xff] }
 0x2fa   :  { %952 = vmatpush.msrb.mxu0 %v862_v18  ;;  %v1390_v18 = vld [vmem:[#allocation2 + $0xc0] sm:$0xff] }
 0x2fb   :  { %613 = vrot.lane.b32.xlu0 %v2778_v57, %s3756_s13 }
 0x2fc   :  { %597 = vrot.lane.b32.xlu1 %v2778_v57, %s3759_s22  ;;  %601 = vrot.lane.b32.xlu2 %v2804_v3, %s3759_s22  ;;  %v859_v57 = vld [vmem:[#allocation3 + $0xb0] sm:$0xff]  ;;  %v878_v3 = vld [vmem:[#allocation3 + $0x148] sm:$0xff] }
 0x2fd   :  { %953 = vmatpush.msrb.mxu0 %v861_v9  ;;  %v1279_v19 = vpop.permute.xlu0 %1278  ;;  %v1126_v20 = vpop.permute.xlu2 %1125  ;;  %v880_v21 = vld [vmem:[#allocation3 + $0x158] sm:$0xff]  ;;  %v1370_v9 = vld [vmem:[#allocation2 + $0x20] sm:$0xff] }
 0x2fe   :  { %1281 = vst.msk [vmem:[#allocation2 + $0xa8] sm:$0xf] %vm3763_vm4, %v1279_v19  ;;  %v1271_v22 = vpop.permute.xlu1 %1270  ;;  %979 = vmatpush.msrb.mxu1 %v880_v21  ;;  %v872_v43 = vld [vmem:[#allocation3 + $0x118] sm:$0xff]  ;;  %v48_v19 = vld [vmem:[%s3557_s2 + $0x50] sm:$0xff]  ;;  %v51_v21 = vld [vmem:[%s3557_s2 + $0x68] sm:$0xff] }
 0x2ff   :  { %1273 = vst.msk [vmem:[#allocation2 + $0xa0] sm:$0xf] %vm3764_vm5, %v1271_v22  ;;  %954 = vmatpush.msrb.mxu0 %v860_v23 }
 0x300   :  { %1128 = vst.msk [vmem:[#allocation2 + $0xc] sm:$0xf] %vm127_vm10, %v1126_v20  ;;  %980 = vmatpush.msrb.mxu1 %v879_v24  ;;  %vm3766_vm10 = vcmask 1043672   ;;  %v1389_v20 = vld [vmem:[#allocation2 + $0xb8] sm:$0xff] }
 0x301   :  { %955 = vmatpush.msrb.mxu0 %v859_v57 }
 0x302   :  { %981 = vmatpush.msrb.mxu1 %v878_v3  ;;  %v1388_v3 = vld [vmem:[#allocation2 + $0xb0] sm:$0xff] }
 0x303   :  { %956 = vmatpush.msrb.mxu0 %v858_v25  ;;  %599 = vrot.lane.b32.xlu0 %v2791_v61, %s3759_s22  ;;  %v874_v61 = vld [vmem:[#allocation3 + $0x128] sm:$0xff] }
 0x304   :  { %982 = vmatpush.msrb.mxu1 %v877_v27 }
 0x305   :  { %957 = vmatpush.msrb.mxu0 %v857_v28  ;;  %v1142_v29 = vpop.permute.xlu0 %1141  ;;  %v1114_v30 = vpop.permute.xlu2 %1113  ;;  %v1387_v27 = vld [vmem:[#allocation2 + $0xa8] sm:$0xff] }
 0x306   :  { %1144 = vst.msk [vmem:[#allocation2 + $0x1c] sm:$0xf] %vm3765_vm2, %v1142_v29  ;;  %v1134_v32 = vpop.permute.xlu1 %1133  ;;  %983 = vmatpush.msrb.mxu1 %v876_v31  ;;  %v1386_v29 = vld [vmem:[#allocation2 + $0xa0] sm:$0xff] }
 0x307   :  { %1136 = vst.msk [vmem:[#allocation2 + $0x14] sm:$0xf] %vm3766_vm10, %v1134_v32  ;;  %958 = vmatpush.msrb.mxu0 %v856_v33 }
 0x308   :  { %1116 = vst.msk [vmem:[#allocation2] sm:$0xf] %vm112_vm11, %v1114_v30  ;;  %984 = vmatpush.msrb.mxu1 %v875_v34  ;;  %vm3767_vm11 = vcmask 1043680   ;;  %v52_v30 = vld [vmem:[%s3557_s2 + $0x70] sm:$0xff] }
 0x309   :  { %959 = vmatpush.msrb.mxu0 %v855_v35 }
 0x30a   :  { %985 = vmatpush.msrb.mxu1 %v874_v61 }
 0x30b   :  { %960 = vmatpush.msrb.mxu0 %v854_v36 }
 0x30c   :  { %986 = vmatpush.msrb.mxu1 %v873_v37  ;;  %v2200_v37 = vld [vmem:[%s3556_s1] sm:$0xff] }
 0x30d   :  { %961 = vmatpush.msrb.mxu0 %v853_v38  ;;  %v1130_v40 = vpop.permute.xlu0 %1129  ;;  %v1251_v42 = vpop.permute.xlu2 %1250  ;;  %v1369_v23 = vld [vmem:[#allocation2 + $0x18] sm:$0xff] }
 0x30e   :  { %1132 = vst.msk [vmem:[#allocation2 + $0x10] sm:$0xf] %vm3767_vm11, %v1130_v40  ;;  %v1122_v26 = vpop.permute.xlu1 %1121  ;;  %987 = vmatpush.msrb.mxu1 %v872_v43  ;;  %962 = vmatmul.f32.vlgmr.msrb.gmra.mxu0 %v39_v39  ;;  %v2201_v43 = vld [vmem:[%s3556_s1 + $0x10] sm:$0xff]  ;;  %vm1092_vm11 = vcmask 253952  }
 0x30f   :  { %1398 = vmatpush.msra.mxu0 %v1381_v41  ;;  %1124 = vst.msk [vmem:[#allocation2 + $0x8] sm:$0xf] %vm3768_vm0, %v1122_v26  ;;  %v2202_v26 = vld [vmem:[%s3556_s1 + $0x8] sm:$0xff] }
 0x310   :  { %1253 = vst.msk [vmem:[#allocation2 + $0x8c] sm:$0xf] %vm283_vm13, %v1251_v42  ;;  %988 = vmatpush.msrb.mxu1 %v871_v45  ;;  %vm3769_vm13 = vcmask 986112  }
 0x311   :  { %1399 = vmatpush.msra.mxu0 %v1380_v44 }
 0x312   :  { %989 = vmatpush.msrb.mxu1 %v870_v47 }
 0x313   :  { %1400 = vmatpush.msra.mxu0 %v1379_v46 }
 0x314   :  { %990 = vmatpush.msrb.mxu1 %v869_v49  ;;  %v2203_v49 = vld [vmem:[%s3556_s1 + $0x20] sm:$0xff] }
 0x315   :  { %1401 = vmatpush.msra.mxu0 %v1378_v48  ;;  %v1267_v53 = vpop.permute.xlu0 %1266  ;;  %v826_v55 = vpop.permute.xlu2 %825  ;;  %991 = vmatmul.f32.vlgmr.msrb.gmra.mxu1 %v40_v50  ;;  %v1368_v25 = vld [vmem:[#allocation2 + $0x10] sm:$0xff] }
 0x316   :  { %1427 = vmatpush.msra.mxu1 %v1397_v51  ;;  %1269 = vst.msk [vmem:[#allocation2 + $0x9c] sm:$0xf] %vm3769_vm13, %v1267_v53  ;;  %v1259_v56 = vpop.permute.xlu1 %1258  ;;  %965 = vmatmul.f32.gmra.mxu0 %v43_v52  ;;  %v1367_v28 = vld [vmem:[#allocation2 + $0x8] sm:$0xff]  ;;  %v2204_v51 = vld [vmem:[%s3556_s1 + $0x18] sm:$0xff] }
 0x317   :  { %1402 = vmatpush.msra.mxu0 %v1377_v54  ;;  %1261 = vst.msk [vmem:[#allocation2 + $0x94] sm:$0xf] %vm293_vm14, %v1259_v56  ;;  %vm3770_vm14 = vcmask 1010688  }
 0x318   :  { %1428 = vmatpush.msra.mxu1 %v1396_v58  ;;  %835 = vst.msk [vmem:[#allocation3 + $0x1f0] sm:$0xff] %vm588_vm8, %v826_v55 }
 0x319   :  { %1403 = vmatpush.msra.mxu0 %v1376_v59  ;;  %v2205_v59 = vld [vmem:[%s3556_s1 + $0x30] sm:$0xff] }
 0x31a   :  { %1429 = vmatpush.msra.mxu1 %v1395_v60  ;;  %v2206_v60 = vld [vmem:[%s3556_s1 + $0x28] sm:$0xff] }
 0x31b   :  { %1404 = vmatpush.msra.mxu0 %v1375_v62 }
 0x31c   :  { %1430 = vmatpush.msra.mxu1 %v1394_v63 }
 0x31d   :  { %1405 = vmatpush.msra.mxu0 %v1374_v2  ;;  %v1255_v10 = vpop.permute.xlu0 %1254  ;;  %v812_v12 = vpop.permute.xlu2 %811  ;;  %994 = vmatmul.f32.gmra.mxu1 %v44_v4  ;;  %v1385_v31 = vld [vmem:[#allocation2 + $0x98] sm:$0xff] }
 0x31e   :  { %1431 = vmatpush.msra.mxu1 %v1393_v5  ;;  %1257 = vst.msk [vmem:[#allocation2 + $0x90] sm:$0xf] %vm3770_vm14, %v1255_v10  ;;  %v1247_v13 = vpop.permute.xlu1 %1246  ;;  %968 = vmatmul.f32.gmra.mxu0 %v47_v8 }
 0x31f   :  { %1406 = vmatpush.msra.mxu0 %v1373_v11  ;;  %1249 = vst.msk [vmem:[#allocation2 + $0x88] sm:$0xf] %vm3771_vm7, %v1247_v13  ;;  %v899_v44 = vld [vmem:[#allocation3 + $0x1f0] sm:$0xff]  ;;  %v2207_v11 = vld [vmem:[%s3556_s1 + $0x38] sm:$0xff] }
 0x320   :  { %1432 = vmatpush.msra.mxu1 %v1392_v14  ;;  %820 = vst.msk [vmem:[#allocation3 + $0x1d8] sm:$0xff] %vm588_vm8, %v812_v12 }
 0x321   :  { %1407 = vmatpush.msra.mxu0 %v1372_v15 }
 0x322   :  { %1433 = vmatpush.msra.mxu1 %v1391_v16 }
 0x323   :  { %1408 = vmatpush.msra.mxu0 %v1371_v17 }
 0x324   :  { %1434 = vmatpush.msra.mxu1 %v1390_v18 }
 0x325   :  { %1409 = vmatpush.msra.mxu0 %v1370_v9  ;;  %v1118_v22 = vpop.permute.xlu0 %1117  ;;  %v806_v24 = vpop.permute.xlu2 %805  ;;  %997 = vmatmul.f32.gmra.mxu1 %v48_v19  ;;  %v1384_v61 = vld [vmem:[#allocation2 + $0x90] sm:$0xff] }
 0x326   :  { %1435 = vmatpush.msra.mxu1 %v1389_v20  ;;  %1120 = vst.msk [vmem:[#allocation2 + $0x4] sm:$0xf] %vm3772_vm9, %v1118_v22  ;;  %v822_v57 = vpop.permute.xlu1 %821  ;;  %971 = vmatmul.f32.gmra.mxu0 %v51_v21  ;;  %v1383_v36 = vld [vmem:[#allocation2 + $0x88] sm:$0xff]  ;;  %v2208_v22 = vld [vmem:[%s3558_s3 + $0x78] sm:$0xff]  ;;  %vm1098_vm9 = vcmask 517377  }
 0x327   :  { %1410 = vmatpush.msra.mxu0 %v1369_v23  ;;  %833 = vst.msk [vmem:[#allocation3 + $0x1e0] sm:$0xff] %vm588_vm8, %v822_v57  ;;  %v896_v52 = vld [vmem:[#allocation3 + $0x1d8] sm:$0xff]  ;;  %v2209_v23 = vld [vmem:[%s3558_s3 + $0x70] sm:$0xff] }
 0x328   :  { %1436 = vmatpush.msra.mxu1 %v1388_v3  ;;  %817 = vst.msk [vmem:[#allocation3 + $0x1c0] sm:$0xff] %vm588_vm8, %v806_v24  ;;  %v2210_v3 = vld [vmem:[%s3558_s3 + $0x68] sm:$0xff] }
 0x329   :  { %1411 = vmatpush.msra.mxu0 %v1368_v25 }
 0x32a   :  { %1437 = vmatpush.msra.mxu1 %v1387_v27 }
 0x32b   :  { %1412 = vmatpush.msra.mxu0 %v1367_v28  ;;  %v2211_v28 = vld [vmem:[%s3558_s3 + $0x60] sm:$0xff] }
 0x32c   :  { %1438 = vmatpush.msra.mxu1 %v1386_v29 }
 0x32d   :  { %v1243_v32 = vpop.permute.xlu0 %1242  ;;  %v792_v33 = vpop.permute.xlu2 %791  ;;  %v1366_v34 = vld [vmem:[#allocation2] sm:$0xff]  ;;  %1000 = vmatmul.f32.gmra.mxu1 %v52_v30  ;;  %v2212_v30 = vld [vmem:[%s3558_s3 + $0x58] sm:$0xff] }
 0x32e   :  { %1439 = vmatpush.msra.mxu1 %v1385_v31  ;;  %1245 = vst.msk [vmem:[#allocation2 + $0x84] sm:$0xf] %vm3773_vm3, %v1243_v32  ;;  %v828_v35 = vpop.permute.xlu1 %827  ;;  %1413 = vmatpush.msra.mxu0 %v1366_v34  ;;  %v897_v50 = vld [vmem:[#allocation3 + $0x1e0] sm:$0xff]  ;;  %v2213_v31 = vld [vmem:[%s3558_s3 + $0x50] sm:$0xff]  ;;  %v3124_v32 = vld [vmem:[%s3557_s2 + $0x18] sm:$0xff]  ;;  %vm1103_vm3 = vcmask 780802  }
 0x32f   :  { %836 = vst.msk [vmem:[#allocation3 + $0x1f8] sm:$0xff] %vm588_vm8, %v828_v35  ;;  %1414 = vmatmul.f32.vlgmr.msra.gmra.mxu0 %v2200_v37  ;;  %v893_v63 = vld [vmem:[#allocation3 + $0x1c0] sm:$0xff]  ;;  %v2327_v35 = vmov 1  }
 0x330   :  { %1440 = vmatpush.msra.mxu1 %v1384_v61  ;;  %802 = vst.msk [vmem:[#allocation3 + $0x1a8] sm:$0xff] %vm588_vm8, %v792_v33  ;;  %2166 = vset.pattern.permute.xlu0 %v2327_v35 }
 0x331   :  { %2165 = vset.pattern.permute.xlu2 %v2327_v35 }
 0x332   :  { %1441 = vmatpush.msra.mxu1 %v1383_v36  ;;  %v2214_v36 = vld [vmem:[%s3561_s6 + $0x10] sm:$0xff] }
 0x333   :  { %910 = vperm.xlu0 %2166, %v2214_v36  }
 0x335   :  { %v824_v38 = vpop.permute.xlu0 %823  ;;  %v778_v39 = vpop.permute.xlu2 %777  ;;  %v1382_v40 = vld [vmem:[#allocation2 + $0x80] sm:$0xff] }
 0x336   :  { %834 = vst.msk [vmem:[#allocation3 + $0x1e8] sm:$0xff] %vm588_vm8, %v824_v38  ;;  %v808_v41 = vpop.permute.xlu1 %807  ;;  %v900_v42 = vld [vmem:[#allocation3 + $0x1f8] sm:$0xff]  ;;  %1442 = vmatpush.msra.mxu1 %v1382_v40  ;;  %v2215_v38 = vld [vmem:[%s3558_s3 + $0x48] sm:$0xff] }
 0x337   :  { %818 = vst.msk [vmem:[#allocation3 + $0x1c8] sm:$0xff] %vm588_vm8, %v808_v41  ;;  %1004 = vmatpush.msrb.mxu2 %v900_v42  ;;  %1417 = vmatmul.f32.gmra.mxu0 %v2201_v43  ;;  %v890_v12 = vld [vmem:[#allocation3 + $0x1a8] sm:$0xff]  ;;  %v2217_v41 = vld [vmem:[%s3558_s3 + $0x40] sm:$0xff]  ;;  %v2218_v42 = vld [vmem:[%s3558_s3 + $0x38] sm:$0xff] }
 0x338   :  { %787 = vst.msk [vmem:[#allocation3 + $0x190] sm:$0xff] %vm588_vm8, %v778_v39  ;;  %1443 = vmatmul.f32.vlgmr.msra.gmra.mxu1 %v2202_v26  ;;  %v2216_v39 = vld [vmem:[%s3561_s6 + $0x18] sm:$0xff] }
 0x339   :  { %1005 = vmatpush.msrb.mxu2 %v899_v44  ;;  %914 = vperm.xlu2 %2165, %v2216_v39   ;;  %v3147_v43 = vld [vmem:[%s3557_s2 + $0x38] sm:$0xff] }
 0x33d   :  { %v810_v45 = vpop.permute.xlu0 %809  ;;  %v636_v46 = vpop.permute.xlu2 %635  ;;  %v898_v47 = vld [vmem:[#allocation3 + $0x1e8] sm:$0xff] }
 0x33e   :  { %819 = vst.msk [vmem:[#allocation3 + $0x1d0] sm:$0xff] %vm588_vm8, %v810_v45  ;;  %v794_v48 = vpop.permute.xlu1 %793  ;;  %1006 = vmatpush.msrb.mxu2 %v898_v47  ;;  %v894_v62 = vld [vmem:[#allocation3 + $0x1c8] sm:$0xff]  ;;  %v2219_v45 = vld [vmem:[%s3561_s6] sm:$0xff]  ;;  %v2220_v47 = vld [vmem:[%s3558_s3 + $0x30] sm:$0xff] }
 0x33f   :  { %803 = vst.msk [vmem:[#allocation3 + $0x1b0] sm:$0xff] %vm588_vm8, %v794_v48  ;;  %1420 = vmatmul.f32.gmra.mxu0 %v2203_v49  ;;  %v887_v18 = vld [vmem:[#allocation3 + $0x190] sm:$0xff]  ;;  %902 = vperm.xlu0 %2166, %v2219_v45   ;;  %v2221_v48 = vld [vmem:[%s3561_s6 + $0x8] sm:$0xff] }
 0x340   :  { %644 = vst.msk [vmem:[#allocation3 + $0x78] sm:$0xff] %vm588_vm8, %v636_v46  ;;  %1446 = vmatmul.f32.gmra.mxu1 %v2204_v51  ;;  %1007 = vmatpush.msrb.mxu2 %v897_v50  ;;  %v2222_v50 = vld [vmem:[%s3558_s3 + $0x28] sm:$0xff]  ;;  %v2223_v51 = vld [vmem:[%s3558_s3 + $0x20] sm:$0xff] }
 0x341   :  { %906 = vperm.xlu2 %2165, %v2221_v48  }
 0x342   :  { %1008 = vmatpush.msrb.mxu2 %v896_v52  ;;  %v3169_v52 = vld [vmem:[%s3557_s2 + $0x58] sm:$0xff] }
 0x345   :  { %v796_v53 = vpop.permute.xlu0 %795  ;;  %v895_v54 = vld [vmem:[#allocation3 + $0x1d0] sm:$0xff] }
 0x346   :  { %804 = vst.msk [vmem:[#allocation3 + $0x1b8] sm:$0xff] %vm588_vm8, %v796_v53  ;;  %v780_v55 = vpop.permute.xlu1 %779  ;;  %v630_v56 = vpop.permute.xlu2 %629  ;;  %1009 = vmatpush.msrb.mxu2 %v895_v54  ;;  %v891_v10 = vld [vmem:[#allocation3 + $0x1b0] sm:$0xff]  ;;  %v2224_v54 = vld [vmem:[%s3558_s3 + $0x18] sm:$0xff] }
 0x347   :  { %788 = vst.msk [vmem:[#allocation3 + $0x198] sm:$0xff] %vm588_vm8, %v780_v55  ;;  %v852_v58 = vld [vmem:[#allocation3 + $0x78] sm:$0xff]  ;;  %1423 = vmatmul.f32.gmra.mxu0 %v2205_v59  ;;  %v2226_v59 = vld [vmem:[%s3558_s3 + $0x8] sm:$0xff] }
 0x348   :  { %641 = vst.msk [vmem:[#allocation3 + $0x60] sm:$0xff] %vm588_vm8, %v630_v56  ;;  %917 = vmatpush.msra.mxu3 %v852_v58  ;;  %1449 = vmatmul.f32.gmra.mxu1 %v2206_v60  ;;  %v2225_v56 = vld [vmem:[%s3558_s3 + $0x10] sm:$0xff]  ;;  %v840_v58 = vld [vmem:[#allocation3 + $0x18] sm:$0xff] }
 0x349   :  { %1010 = vmatpush.msrb.mxu2 %v894_v62  ;;  %v839_v60 = vld [vmem:[#allocation3 + $0x10] sm:$0xff]  ;;  %v3184_v62 = vld [vmem:[%s3557_s2 + $0x78] sm:$0xff] }
 0x34b   :  { %1011 = vmatpush.msrb.mxu2 %v893_v63  ;;  %v2227_v63 = vld [vmem:[%s3558_s3] sm:$0xff] }
 0x34d   :  { %v790_v2 = vpop.permute.xlu0 %789  ;;  %v892_v4 = vld [vmem:[#allocation3 + $0x1b8] sm:$0xff] }
 0x34e   :  { %801 = vst.msk [vmem:[#allocation3 + $0x1a0] sm:$0xff] %vm588_vm8, %v790_v2  ;;  %v774_v5 = vpop.permute.xlu1 %773  ;;  %v616_v8 = vpop.permute.xlu2 %615  ;;  %1012 = vmatpush.msrb.mxu2 %v892_v4  ;;  %v888_v17 = vld [vmem:[#allocation3 + $0x198] sm:$0xff]  ;;  %v838_v2 = vld [vmem:[#allocation3 + $0x8] sm:$0xff]  ;;  %v3193_v4 = vld [vmem:[%s3557_s2] sm:$0xff] }
 0x34f   :  { %785 = vst.msk [vmem:[#allocation3 + $0x180] sm:$0xff] %vm588_vm8, %v774_v5  ;;  %v849_v29 = vld [vmem:[#allocation3 + $0x60] sm:$0xff] }
 0x350   :  { %626 = vst.msk [vmem:[#allocation3 + $0x48] sm:$0xff] %vm588_vm8, %v616_v8  ;;  %1452 = vmatmul.f32.gmra.mxu1 %v2207_v11  ;;  %1013 = vmatpush.msrb.mxu2 %v891_v10  ;;  %v837_v5 = vld [vmem:[#allocation3] sm:$0xff] }
 0x351   :  { %v3201_v10 = vld [vmem:[%s3557_s2 + $0x20] sm:$0xff] }
 0x352   :  { %1014 = vmatpush.msrb.mxu2 %v890_v12 }
 0x355   :  { %v776_v13 = vpop.permute.xlu0 %775  ;;  %v889_v14 = vld [vmem:[#allocation3 + $0x1a0] sm:$0xff] }
 0x356   :  { %786 = vst.msk [vmem:[#allocation3 + $0x188] sm:$0xff] %vm588_vm8, %v776_v13  ;;  %v632_v15 = vpop.permute.xlu1 %631  ;;  %v602_v16 = vpop.permute.xlu2 %601  ;;  %1015 = vmatpush.msrb.mxu2 %v889_v14  ;;  %v885_v21 = vld [vmem:[#allocation3 + $0x180] sm:$0xff] }
 0x357   :  { %642 = vst.msk [vmem:[#allocation3 + $0x68] sm:$0xff] %vm588_vm8, %v632_v15  ;;  %v846_v40 = vld [vmem:[#allocation3 + $0x48] sm:$0xff]  ;;  %v3211_v13 = vld [vmem:[%s3557_s2 + $0x40] sm:$0xff] }
 0x358   :  { %611 = vst.msk [vmem:[#allocation3 + $0x30] sm:$0xff] %vm588_vm8, %v602_v16  ;;  %1016 = vmatpush.msrb.mxu2 %v888_v17  ;;  %v3221_v16 = vld [vmem:[%s3557_s2 + $0x60] sm:$0xff] }
 0x35a   :  { %1017 = vmatpush.msrb.mxu2 %v887_v18 }
 0x35d   :  { %v634_v9 = vpop.permute.xlu0 %633  ;;  %v886_v19 = vld [vmem:[#allocation3 + $0x188] sm:$0xff] }
 0x35e   :  { %643 = vst.msk [vmem:[#allocation3 + $0x70] sm:$0xff] %vm588_vm8, %v634_v9  ;;  %v618_v20 = vpop.permute.xlu1 %617  ;;  %1018 = vmatpush.msrb.mxu2 %v886_v19  ;;  %v850_v27 = vld [vmem:[#allocation3 + $0x68] sm:$0xff] }
 0x35f   :  { %627 = vst.msk [vmem:[#allocation3 + $0x50] sm:$0xff] %vm588_vm8, %v618_v20  ;;  %v843_v49 = vld [vmem:[#allocation3 + $0x30] sm:$0xff] }
 0x360   :  { %1019 = vmatpush.msrb.mxu2 %v885_v21 }
 0x361   :  { %1020 = vmatmul.f32.vlgmr.msrb.gmra.mxu2 %v3124_v32 }
 0x362   :  { %1480 = vmatpush.msra.mxu2 %v2208_v22 }
 0x364   :  { %1481 = vmatpush.msra.mxu2 %v2209_v23 }
 0x365   :  { %v620_v24 = vpop.permute.xlu0 %619  ;;  %v851_v57 = vld [vmem:[#allocation3 + $0x70] sm:$0xff] }
 0x366   :  { %1482 = vmatpush.msra.mxu2 %v2210_v3  ;;  %628 = vst.msk [vmem:[#allocation3 + $0x58] sm:$0xff] %vm588_vm8, %v620_v24  ;;  %v604_v25 = vpop.permute.xlu1 %603  ;;  %918 = vmatpush.msra.mxu3 %v851_v57  ;;  %v847_v37 = vld [vmem:[#allocation3 + $0x50] sm:$0xff] }
 0x367   :  { %612 = vst.msk [vmem:[#allocation3 + $0x38] sm:$0xff] %vm588_vm8, %v604_v25 }
 0x368   :  { %1483 = vmatpush.msra.mxu2 %v2211_v28  ;;  %919 = vmatpush.msra.mxu3 %v850_v27 }
 0x369   :  { %1023 = vmatmul.f32.gmra.mxu2 %v3147_v43 }
 0x36a   :  { %1484 = vmatpush.msra.mxu2 %v2212_v30  ;;  %920 = vmatpush.msra.mxu3 %v849_v29 }
 0x36c   :  { %1485 = vmatpush.msra.mxu2 %v2213_v31 }
 0x36d   :  { %v614_v33 = vpop.permute.xlu0 %613  ;;  %v848_v34 = vld [vmem:[#allocation3 + $0x58] sm:$0xff] }
 0x36e   :  { %625 = vst.msk [vmem:[#allocation3 + $0x40] sm:$0xff] %vm588_vm8, %v614_v33  ;;  %v598_v61 = vpop.permute.xlu1 %597  ;;  %921 = vmatpush.msra.mxu3 %v848_v34  ;;  %1486 = vmatpush.msra.mxu2 %v2215_v38  ;;  %v844_v46 = vld [vmem:[#allocation3 + $0x38] sm:$0xff] }
 0x36f   :  { %609 = vst.msk [vmem:[#allocation3 + $0x20] sm:$0xff] %vm588_vm8, %v598_v61 }
 0x370   :  { %922 = vmatpush.msra.mxu3 %v847_v37  ;;  %1487 = vmatpush.msra.mxu2 %v2217_v41 }
 0x371   :  { %1026 = vmatmul.f32.gmra.mxu2 %v3169_v52 }
 0x372   :  { %923 = vmatpush.msra.mxu3 %v846_v40  ;;  %1488 = vmatpush.msra.mxu2 %v2218_v42 }
 0x374   :  { %1489 = vmatpush.msra.mxu2 %v2220_v47 }
 0x375   :  { %v600_v26 = vpop.permute.xlu0 %599  ;;  %v845_v44 = vld [vmem:[#allocation3 + $0x40] sm:$0xff] }
 0x376   :  { %610 = vst.msk [vmem:[#allocation3 + $0x28] sm:$0xff] %vm588_vm8, %v600_v26  ;;  %924 = vmatpush.msra.mxu3 %v845_v44  ;;  %1490 = vmatpush.msra.mxu2 %v2222_v50  ;;  %v841_v55 = vld [vmem:[#allocation3 + $0x20] sm:$0xff] }
 0x378   :  { %925 = vmatpush.msra.mxu3 %v844_v46  ;;  %1491 = vmatpush.msra.mxu2 %v2223_v51 }
 0x379   :  { %1029 = vmatmul.f32.gmra.mxu2 %v3184_v62 }
 0x37a   :  { %926 = vmatpush.msra.mxu3 %v843_v49  ;;  %1492 = vmatpush.msra.mxu2 %v2224_v54 }
 0x37c   :  { %1493 = vmatpush.msra.mxu2 %v2225_v56 }
 0x37d   :  { %v842_v53 = vld [vmem:[#allocation3 + $0x28] sm:$0xff] }
 0x37e   :  { %927 = vmatpush.msra.mxu3 %v842_v53  ;;  %1494 = vmatpush.msra.mxu2 %v2226_v59 }
 0x380   :  { %928 = vmatpush.msra.mxu3 %v841_v55  ;;  %1495 = vmatpush.msra.mxu2 %v2227_v63 }
 0x382   :  { %929 = vmatpush.msra.mxu3 %v840_v58 }
 0x384   :  { %930 = vmatpush.msra.mxu3 %v839_v60 }
 0x386   :  { %931 = vmatpush.msra.mxu3 %v838_v2 }
 0x388   :  { %932 = vmatpush.msra.mxu3 %v837_v5 }
 0x389   :  { %933 = vmatmul.f32.vlgmr.msra.gmra.mxu3 %v3193_v4 }
 0x38b   :  { %v3196_v8 = vpop.f32.mrf.mxu0 }
 0x391   :  { %936 = vmatmul.f32.gmra.mxu3 %v3201_v10 }
 0x392   :  { %v3204_v11 = vpop.f32.mrf.mxu1 }
 0x393   :  { %v3206_v12 = vpop.f32.mrf.mxu0  ;;  %v3234_v53 = vpop.permute.xlu2 %914 }
 0x399   :  { %939 = vmatmul.f32.gmra.mxu3 %v3211_v13 }
 0x39a   :  { %v3214_v14 = vpop.f32.mrf.mxu1 }
 0x39b   :  { %v3216_v15 = vpop.f32.mrf.mxu0  ;;  %v3238_v58 = vpop.permute.xlu2 %906 }
 0x3a1   :  { %942 = vmatmul.f32.gmra.mxu3 %v3221_v16 }
 0x3a2   :  { %v3224_v17 = vpop.f32.mrf.mxu1 }
 0x3a3   :  { %v3226_v18 = vpop.f32.mrf.mxu0 }
 0x3a5   :  { %v3236_v54 = vpop.permute.xlu0 %910 }
 0x3aa   :  { %v3228_v9 = vpop.f32.mrf.mxu1 }
 0x3ac   :  { %v1415_v19 = vpop.f32.mrf.mxu0 }
 0x3ad   :  { %v1416_v20 = vadd.f32 %v1415_v19, %v2749_v0 }
 0x3b1   :  { %v3242_v2 = vpop.permute.xlu0 %902 }
 0x3b4   :  { %v1418_v21 = vpop.f32.mrf.mxu0 }
 0x3b5   :  { %v1444_v22 = vpop.f32.mrf.mxu1  ;;  %v1419_v3 = vadd.f32 %v1418_v21, %v2751_v1 }
 0x3b6   :  { %v1445_v23 = vadd.f32 %v1444_v22, %v1416_v20 }
 0x3b8   :  { %v1460_v24 = vmin.f32 %v1445_v23, 0.0  ;;  %vm1456_vm12 = vcmp.gt.f32.partialorder %v1445_v23, 0.0 }
 0x3ba   :  { %v1464_v57 = vmul.f32 1.442695, %v1460_v24 }
 0x3bc   :  { %2176 = vpow2.f32 %v1464_v57  ;;  %v1421_v28 = vpop.f32.mrf.mxu0 }
 0x3bd   :  { %v1447_v25 = vpop.f32.mrf.mxu1  ;;  %v1422_v34 = vadd.f32 %v1421_v28, %v2754_v6 }
 0x3be   :  { %v1448_v27 = vadd.f32 %v1447_v25, %v1419_v3 }
 0x3c0   :  { %v1461_v29 = vmin.f32 %v1448_v27, 0.0  ;;  %vm1457_vm6 = vcmp.gt.f32.partialorder %v1448_v27, 0.0 }
 0x3c2   :  { %v2177_v30 = vpop.eup %2176  ;;  %v1466_v31 = vmul.f32 1.442695, %v1461_v29 }
 0x3c3   :  { %v2080_v33 = vadd.f32 -1.0, %v2177_v30 }
 0x3c4   :  { %2178 = vpow2.f32 %v1466_v31  ;;  %v1424_v37 = vpop.f32.mrf.mxu0 }
 0x3c5   :  { %v1450_v0 = vpop.f32.mrf.mxu1  ;;  %v1476_v35 = vsel %vm1456_vm12, %v1445_v23, %v2080_v33  ;;  %v1425_v40 = vadd.f32 %v1424_v37, %v2756_v7  ;;  %vm2048_vm12 = vcmask 74752  }
 0x3c6   :  { %v1451_v61 = vadd.f32 %v1450_v0, %v1422_v34  ;;  %1496 = vmatmul.f32.vlgmr.msra.gmra.mxu2 %v1476_v35 }
 0x3c8   :  { %v1462_v36 = vmin.f32 %v1451_v61, 0.0  ;;  %vm1458_vm1 = vcmp.gt.f32.partialorder %v1451_v61, 0.0 }
 0x3ca   :  { %v2179_v38 = vpop.eup %2178  ;;  %v1468_v1 = vmul.f32 1.442695, %v1462_v36 }
 0x3cb   :  { %v2081_v39 = vadd.f32 -1.0, %v2179_v38 }
 0x3cc   :  { %2180 = vpow2.f32 %v1468_v1 }
 0x3cd   :  { %v1453_v41 = vpop.f32.mrf.mxu1  ;;  %v1477_v42 = vsel %vm1457_vm6, %v1448_v27, %v2081_v39 }
 0x3ce   :  { %v1454_v26 = vadd.f32 %v1453_v41, %v1425_v40  ;;  %1499 = vmatmul.f32.gmra.mxu2 %v1477_v42 }
 0x3d0   :  { %v1463_v44 = vmin.f32 %v1454_v26, 0.0  ;;  %vm1459_vm15 = vcmp.gt.f32.partialorder %v1454_v26, 0.0 }
 0x3d2   :  { %v2181_v6 = vpop.eup %2180  ;;  %v1470_v45 = vmul.f32 1.442695, %v1463_v44 }
 0x3d3   :  { %v2082_v46 = vadd.f32 -1.0, %v2181_v6 }
 0x3d4   :  { %2182 = vpow2.f32 %v1470_v45 }
 0x3d5   :  { %v1478_v47 = vsel %vm1458_vm1, %v1451_v61, %v2082_v46 }
 0x3d6   :  { %1502 = vmatmul.f32.gmra.mxu2 %v1478_v47 }
 0x3da   :  { %v2183_v48 = vpop.eup %2182 }
 0x3db   :  { %v2083_v49 = vadd.f32 -1.0, %v2183_v48 }
 0x3dd   :  { %v1479_v50 = vsel %vm1459_vm15, %v1454_v26, %v2083_v49 }
 0x3de   :  { %1505 = vmatmul.f32.gmra.mxu2 %v1479_v50 }
 0x3e4   :  { %v1021_v7 = vpop.f32.mrf.mxu2 }
 0x3ec   :  { %v1024_v56 = vpop.f32.mrf.mxu2 }
 0x3f4   :  { %v1027_v5 = vpop.f32.mrf.mxu2 }
 0x3fc   :  { %v1030_v29 = vpop.f32.mrf.mxu2 }
 0x40c   :  { %v934_v51 = vpop.f32.mrf.mxu3 }
 0x40d   :  { %v935_v20 = vadd.f32 %v934_v51, %v3242_v2 }
 0x40f   :  { %v964_v57 = vadd.f32 %v3196_v8, %v935_v20 }
 0x414   :  { %v937_v55 = vpop.f32.mrf.mxu3 }
 0x415   :  { %v938_v60 = vadd.f32 %v937_v55, %v3238_v58 }
 0x417   :  { %v967_v21 = vadd.f32 %v3206_v12, %v938_v60 }
 0x419   :  { %v996_v3 = vadd.f32 %v3214_v14, %v967_v21 }
 0x41b   :  { %v1025_v30 = vadd.f32 %v1024_v56, %v996_v3 }
 0x41c   :  { %v940_v59 = vpop.f32.mrf.mxu3 }
 0x41d   :  { %v941_v63 = vadd.f32 %v940_v59, %v3236_v54  ;;  %v1038_v34 = vmin.f32 %v1025_v30, 0.0  ;;  %vm1034_vm2 = vcmp.gt.f32.partialorder %v1025_v30, 0.0 }
 0x41f   :  { %v970_v19 = vadd.f32 %v3216_v15, %v941_v63  ;;  %v993_v15 = vadd.f32 %v3204_v11, %v964_v57  ;;  %v1043_v14 = vmul.f32 1.442695, %v1038_v34 }
 0x421   :  { %v999_v22 = vadd.f32 %v3224_v17, %v970_v19  ;;  %v1022_v17 = vadd.f32 %v1021_v7, %v993_v15 }
 0x423   :  { %v1028_v23 = vadd.f32 %v1027_v5, %v999_v22  ;;  %v1037_v8 = vmin.f32 %v1022_v17, 0.0  ;;  %vm1033_vm10 = vcmp.gt.f32.partialorder %v1022_v17, 0.0 }
 0x424   :  { %v943_v24 = vpop.f32.mrf.mxu3 }
 0x425   :  { %v944_v25 = vadd.f32 %v943_v24, %v3234_v53  ;;  %v1039_v28 = vmin.f32 %v1028_v23, 0.0  ;;  %v1041_v61 = vmul.f32 1.442695, %v1037_v8  ;;  %vm1035_vm5 = vcmp.gt.f32.partialorder %v1028_v23, 0.0 }
 0x427   :  { %v973_v27 = vadd.f32 %v3226_v18, %v944_v25  ;;  %v1045_v33 = vmul.f32 1.442695, %v1039_v28 }
 0x429   :  { %v1002_v31 = vadd.f32 %v3228_v9, %v973_v27  ;;  %2184 = vpow2.f32 %v1045_v33 }
 0x42b   :  { %v1031_v12 = vadd.f32 %v1030_v29, %v1002_v31 }
 0x42d   :  { %v1040_v0 = vmin.f32 %v1031_v12, 0.0  ;;  %vm1036_vm4 = vcmp.gt.f32.partialorder %v1031_v12, 0.0 }
 0x42f   :  { %v1047_v35 = vmul.f32 1.442695, %v1040_v0  ;;  %v2185_v18 = vpop.eup %2184 }
 0x430   :  { %v2072_v38 = vadd.f32 -1.0, %v2185_v18 }
 0x431   :  { %2186 = vpow2.f32 %v1047_v35 }
 0x432   :  { %2188 = vpow2.f32 %v1043_v14  ;;  %v1055_v1 = vsel %vm1035_vm5, %v1028_v23, %v2072_v38 }
 0x433   :  { %2190 = vpow2.f32 %v1041_v61 }
 0x437   :  { %v2187_v36 = vpop.eup %2186 }
 0x438   :  { %v2073_v37 = vadd.f32 -1.0, %v2187_v36  ;;  %v2189_v9 = vpop.eup %2188 }
 0x439   :  { %v2071_v39 = vadd.f32 -1.0, %v2189_v9  ;;  %v2191_v40 = vpop.eup %2190 }
 0x43a   :  { %v1056_v11 = vsel %vm1036_vm4, %v1031_v12, %v2073_v37  ;;  %v2070_v42 = vadd.f32 -1.0, %v2191_v40 }
 0x43b   :  { %2074 = vmatpush.xpose.msk.msrb.mxu3 %vm588_vm8, %v1056_v11  ;;  %v1054_v41 = vsel %vm1034_vm2, %v1025_v30, %v2071_v39 }
 0x43c   :  { %v1053_v26 = vsel %vm1033_vm10, %v1022_v17, %v2070_v42 }
 0x43f   :  { %2075 = vmatpush.xpose.msk.msrb.mxu3 %vm588_vm8, %v1055_v1 }
 0x443   :  { %2076 = vmatpush.xpose.msk.msrb.mxu3 %vm588_vm8, %v1054_v41 }
 0x447   :  { %2077 = vmatpush.xpose.msk.msrb.mxu3 %vm588_vm8, %v1053_v26 }
 0x449   :  { %v3258_v44 = vpop.f32.mrf.mxu2 }
 0x44a   :  { %1509 = vst.msk [vmem:[#allocation3] sm:$0xff] %vm588_vm8, %v3258_v44  ;;  %1613 = vrot.lane.b32.xlu0 %v3258_v44, %s3717_s24  ;;  %1533 = vrot.lane.b32.xlu2 %v3258_v44, %s3756_s13 }
 0x44b   :  { %1549 = vrot.lane.b32.xlu1 %v3258_v44, %s3758_s21 }
 0x451   :  { %v3268_v6 = vpop.f32.mrf.mxu2 }
 0x452   :  { %1510 = vst.msk [vmem:[#allocation3 + $0x8] sm:$0xff] %vm588_vm8, %v3268_v6  ;;  %1517 = vrot.lane.b32.xlu0 %v3258_v44, %s3759_s22  ;;  %1677 = vrot.lane.b32.xlu2 %v3258_v44, %s3723_s20 }
 0x453   :  { %1741 = vrot.lane.b32.xlu1 %v3258_v44, %s3701_s19 }
 0x459   :  { %v1503_v45 = vpop.f32.mrf.mxu2 }
 0x45a   :  { %1511 = vst.msk [vmem:[#allocation3 + $0x10] sm:$0xff] %vm588_vm8, %v1503_v45  ;;  %1709 = vrot.lane.b32.xlu0 %v3258_v44, %s3700_s18  ;;  %1725 = vrot.lane.b32.xlu2 %v3258_v44, %s3702_s23 }
 0x45b   :  { %1597 = vrot.lane.b32.xlu1 %v3258_v44, %s3715_s17 }
 0x461   :  { %v3285_v46 = vpop.f32.mrf.mxu2 }
 0x462   :  { %1512 = vst.msk [vmem:[#allocation3 + $0x18] sm:$0xff] %vm588_vm8, %v3285_v46  ;;  %1661 = vrot.lane.b32.xlu2 %v3258_v44, %s3721_s12  ;;  %1743 = vrot.lane.b32.xlu0 %v3268_v6, %s3701_s19 }
 0x463   :  { %1581 = vrot.lane.b32.xlu1 %v3258_v44, %s3714_s16 }
 0x46a   :  { %1645 = vrot.lane.b32.xlu2 %v3258_v44, %s3720_s27  ;;  %1599 = vrot.lane.b32.xlu0 %v3268_v6, %s3715_s17 }
 0x46b   :  { %1535 = vrot.lane.b32.xlu1 %v3268_v6, %s3756_s13 }
 0x472   :  { %1711 = vrot.lane.b32.xlu0 %v3268_v6, %s3700_s18  ;;  %1551 = vrot.lane.b32.xlu2 %v3268_v6, %s3758_s21 }
 0x473   :  { %1679 = vrot.lane.b32.xlu1 %v3268_v6, %s3723_s20 }
 0x47a   :  { %1695 = vrot.lane.b32.xlu0 %v3268_v6, %s3703_s15  ;;  %1615 = vrot.lane.b32.xlu2 %v3268_v6, %s3717_s24 }
 0x47b   :  { %1727 = vrot.lane.b32.xlu1 %v3268_v6, %s3702_s23 }
 0x482   :  { %1519 = vrot.lane.b32.xlu2 %v3268_v6, %s3759_s22  ;;  %1537 = vrot.lane.b32.xlu0 %v1503_v45, %s3756_s13 }
 0x483   :  { %1583 = vrot.lane.b32.xlu1 %v3268_v6, %s3714_s16 }
 0x48a   :  { %1663 = vrot.lane.b32.xlu2 %v3268_v6, %s3721_s12  ;;  %1681 = vrot.lane.b32.xlu0 %v1503_v45, %s3723_s20 }
 0x48b   :  { %1567 = vrot.lane.b32.xlu1 %v3268_v6, %s3728_s28 }
 0x492   :  { %1647 = vrot.lane.b32.xlu2 %v3268_v6, %s3720_s27  ;;  %1729 = vrot.lane.b32.xlu0 %v1503_v45, %s3702_s23 }
 0x493   :  { %1553 = vrot.lane.b32.xlu1 %v1503_v45, %s3758_s21 }
 0x49a   :  { %1713 = vrot.lane.b32.xlu0 %v1503_v45, %s3700_s18  ;;  %1745 = vrot.lane.b32.xlu2 %v1503_v45, %s3701_s19 }
 0x49b   :  { %1617 = vrot.lane.b32.xlu1 %v1503_v45, %s3717_s24 }
 0x4a2   :  { %1697 = vrot.lane.b32.xlu0 %v1503_v45, %s3703_s15  ;;  %1601 = vrot.lane.b32.xlu2 %v1503_v45, %s3715_s17 }
 0x4a3   :  { %1521 = vrot.lane.b32.xlu1 %v1503_v45, %s3759_s22 }
 0x4a4   :  { %v1534_v47 = vpop.permute.xlu2 %1533 }
 0x4a5   :  { %1545 = vst.msk [vmem:[#allocation3 + $0x40] sm:$0xff] %vm588_vm8, %v1534_v47 }
 0x4aa   :  { %1649 = vrot.lane.b32.xlu2 %v1503_v45, %s3720_s27  ;;  %1539 = vrot.lane.b32.xlu0 %v3285_v46, %s3756_s13 }
 0x4ab   :  { %1665 = vrot.lane.b32.xlu1 %v1503_v45, %s3721_s12 }
 0x4ac   :  { %v1678_v48 = vpop.permute.xlu2 %1677 }
 0x4ad   :  { %1689 = vst.msk [vmem:[#allocation3 + $0x160] sm:$0xff] %vm588_vm8, %v1678_v48 }
 0x4b2   :  { %1633 = vrot.lane.b32.xlu2 %v1503_v45, %s3726_s26  ;;  %1523 = vrot.lane.b32.xlu0 %v3285_v46, %s3759_s22 }
 0x4b3   :  { %1585 = vrot.lane.b32.xlu1 %v1503_v45, %s3714_s16 }
 0x4b4   :  { %v1726_v49 = vpop.permute.xlu2 %1725  ;;  %v1801_v47 = vld [vmem:[#allocation3 + $0x160] sm:$0xff] }
 0x4b5   :  { %1737 = vst.msk [vmem:[#allocation3 + $0x1c0] sm:$0xff] %vm588_vm8, %v1726_v49 }
 0x4ba   :  { %1667 = vrot.lane.b32.xlu0 %v3285_v46, %s3721_s12  ;;  %1747 = vrot.lane.b32.xlu2 %v3285_v46, %s3701_s19  ;;  %s2057_s19 = sshll.u32 %s3563_s8, 4  ;;  %s2058_s19 = int_to_ptr.hbm [resolvable:$true] %s2057_s19 }
 0x4bb   :  { %1569 = vrot.lane.b32.xlu1 %v1503_v45, %s3728_s28 }
 0x4bc   :  { %v1614_v50 = vpop.permute.xlu0 %1613  ;;  %v1662_v7 = vpop.permute.xlu2 %1661 }
 0x4bd   :  { %1625 = vst.msk [vmem:[#allocation3 + $0xe0] sm:$0xff] %vm588_vm8, %v1614_v50  ;;  %v1550_v51 = vpop.permute.xlu1 %1549 }
 0x4be   :  { %1561 = vst.msk [vmem:[#allocation3 + $0x60] sm:$0xff] %vm588_vm8, %v1550_v51 }
 0x4bf   :  { %1673 = vst.msk [vmem:[#allocation3 + $0x140] sm:$0xff] %vm588_vm8, %v1662_v7 }
 0x4c2   :  { %1715 = vrot.lane.b32.xlu0 %v3285_v46, %s3700_s18  ;;  %1683 = vrot.lane.b32.xlu2 %v3285_v46, %s3723_s20 }
 0x4c3   :  { %1555 = vrot.lane.b32.xlu1 %v3285_v46, %s3758_s21 }
 0x4c4   :  { %v1518_v55 = vpop.permute.xlu0 %1517  ;;  %v1646_v56 = vpop.permute.xlu2 %1645 }
 0x4c5   :  { %1529 = vst.msk [vmem:[#allocation3 + $0x20] sm:$0xff] %vm588_vm8, %v1518_v55  ;;  %v1742_v59 = vpop.permute.xlu1 %1741 }
 0x4c6   :  { %1753 = vst.msk [vmem:[#allocation3 + $0x1e0] sm:$0xff] %vm588_vm8, %v1742_v59 }
 0x4c7   :  { %1657 = vst.msk [vmem:[#allocation3 + $0x120] sm:$0xff] %vm588_vm8, %v1646_v56  ;;  %v1813_v56 = vld [vmem:[#allocation3 + $0x1c0] sm:$0xff] }
 0x4ca   :  { %1699 = vrot.lane.b32.xlu0 %v3285_v46, %s3703_s15  ;;  %1731 = vrot.lane.b32.xlu2 %v3285_v46, %s3702_s23 }
 0x4cb   :  { %1619 = vrot.lane.b32.xlu1 %v3285_v46, %s3717_s24 }
 0x4cc   :  { %v1710_v60 = vpop.permute.xlu0 %1709  ;;  %v1552_v63 = vpop.permute.xlu2 %1551 }
 0x4cd   :  { %1721 = vst.msk [vmem:[#allocation3 + $0x1a0] sm:$0xff] %vm588_vm8, %v1710_v60  ;;  %v1598_v5 = vpop.permute.xlu1 %1597  ;;  %v1817_v41 = vld [vmem:[#allocation3 + $0x1e0] sm:$0xff] }
 0x4ce   :  { %1609 = vst.msk [vmem:[#allocation3 + $0xc0] sm:$0xff] %vm588_vm8, %v1598_v5 }
 0x4cf   :  { %1562 = vst.msk [vmem:[#allocation3 + $0x68] sm:$0xff] %vm588_vm8, %v1552_v63 }
 0x4d2   :  { %1693 = vrot.lane.b32.xlu0 %v3258_v44, %s3703_s15  ;;  %1651 = vrot.lane.b32.xlu2 %v3285_v46, %s3720_s27 }
 0x4d3   :  { %1603 = vrot.lane.b32.xlu1 %v3285_v46, %s3715_s17 }
 0x4d4   :  { %v1744_v19 = vpop.permute.xlu0 %1743  ;;  %v1616_v20 = vpop.permute.xlu2 %1615 }
 0x4d5   :  { %v1582_v21 = vpop.permute.xlu1 %1581  ;;  %1754 = vst.msk [vmem:[#allocation3 + $0x1e8] sm:$0xff] %vm588_vm8, %v1744_v19  ;;  %v3428_v19 = vld [vmem:[%s3559_s4] sm:$0xf] }
 0x4d6   :  { %1593 = vst.msk [vmem:[#allocation3 + $0xa0] sm:$0xff] %vm588_vm8, %v1582_v21  ;;  %2078 = vmatmul.msk.f32.vlgmr.msrb.gmra.mxu3 %vm588_vm8, %v3428_v19 }
 0x4d7   :  { %1626 = vst.msk [vmem:[#allocation3 + $0xe8] sm:$0xff] %vm588_vm8, %v1616_v20 }
 0x4da   :  { %1629 = vrot.lane.b32.xlu0 %v3258_v44, %s3726_s26  ;;  %1635 = vrot.lane.b32.xlu2 %v3285_v46, %s3726_s26 }
 0x4db   :  { %1587 = vrot.lane.b32.xlu1 %v3285_v46, %s3714_s16 }
 0x4dc   :  { %v1600_v22 = vpop.permute.xlu0 %1599  ;;  %v1520_v23 = vpop.permute.xlu2 %1519  ;;  %v1818_v40 = vld [vmem:[#allocation3 + $0x1e8] sm:$0xff] }
 0x4dd   :  { %v1536_v24 = vpop.permute.xlu1 %1535  ;;  %1610 = vst.msk [vmem:[#allocation3 + $0xc8] sm:$0xff] %vm588_vm8, %v1600_v22  ;;  %v1797_v22 = vld [vmem:[#allocation3 + $0x140] sm:$0xff] }
 0x4de   :  { %1546 = vst.msk [vmem:[#allocation3 + $0x48] sm:$0xff] %vm588_vm8, %v1536_v24 }
 0x4df   :  { %1530 = vst.msk [vmem:[#allocation3 + $0x28] sm:$0xff] %vm588_vm8, %v1520_v23 }
 0x4e2   :  { %1631 = vrot.lane.b32.xlu2 %v3268_v6, %s3726_s26 }
 0x4e3   :  { %1571 = vrot.lane.b32.xlu1 %v3285_v46, %s3728_s28 }
 0x4e4   :  { %v1712_v57 = vpop.permute.xlu0 %1711  ;;  %v1664_v3 = vpop.permute.xlu2 %1663 }
 0x4e5   :  { %v1680_v25 = vpop.permute.xlu1 %1679  ;;  %1722 = vst.msk [vmem:[#allocation3 + $0x1a8] sm:$0xff] %vm588_vm8, %v1712_v57 }
 0x4e6   :  { %1690 = vst.msk [vmem:[#allocation3 + $0x168] sm:$0xff] %vm588_vm8, %v1680_v25 }
 0x4e7   :  { %1674 = vst.msk [vmem:[#allocation3 + $0x148] sm:$0xff] %vm588_vm8, %v1664_v3 }
 0x4eb   :  { %1565 = vrot.lane.b32.xlu1 %v3258_v44, %s3728_s28 }
 0x4ec   :  { %v1696_v27 = vpop.permute.xlu0 %1695  ;;  %v1648_v28 = vpop.permute.xlu2 %1647 }
 0x4ed   :  { %v1728_v29 = vpop.permute.xlu1 %1727  ;;  %1706 = vst.msk [vmem:[#allocation3 + $0x188] sm:$0xff] %vm588_vm8, %v1696_v27  ;;  %v1802_v46 = vld [vmem:[#allocation3 + $0x168] sm:$0xff] }
 0x4ee   :  { %1738 = vst.msk [vmem:[#allocation3 + $0x1c8] sm:$0xff] %vm588_vm8, %v1728_v29  ;;  %v1798_v21 = vld [vmem:[#allocation3 + $0x148] sm:$0xff] }
 0x4ef   :  { %1658 = vst.msk [vmem:[#allocation3 + $0x128] sm:$0xff] %vm588_vm8, %v1648_v28 }
 0x4f4   :  { %v1538_v15 = vpop.permute.xlu0 %1537  ;;  %v1746_v30 = vpop.permute.xlu2 %1745 }
 0x4f5   :  { %v1584_v31 = vpop.permute.xlu1 %1583  ;;  %1547 = vst.msk [vmem:[#allocation3 + $0x50] sm:$0xff] %vm588_vm8, %v1538_v15  ;;  %v1814_v55 = vld [vmem:[#allocation3 + $0x1c8] sm:$0xff] }
 0x4f6   :  { %1594 = vst.msk [vmem:[#allocation3 + $0xa8] sm:$0xff] %vm588_vm8, %v1584_v31  ;;  %v1810_v31 = vld [vmem:[#allocation3 + $0x1a8] sm:$0xff] }
 0x4f7   :  { %1755 = vst.msk [vmem:[#allocation3 + $0x1f0] sm:$0xff] %vm588_vm8, %v1746_v30  ;;  %v1794_v30 = vld [vmem:[#allocation3 + $0x128] sm:$0xff] }
 0x4fc   :  { %v1682_v12 = vpop.permute.xlu0 %1681  ;;  %v1602_v33 = vpop.permute.xlu2 %1601 }
 0x4fd   :  { %v1568_v17 = vpop.permute.xlu1 %1567  ;;  %1691 = vst.msk [vmem:[#allocation3 + $0x170] sm:$0xff] %vm588_vm8, %v1682_v12  ;;  %v1770_v12 = vld [vmem:[#allocation3 + $0x68] sm:$0xff] }
 0x4fe   :  { %1578 = vst.msk [vmem:[#allocation3 + $0x88] sm:$0xff] %vm588_vm8, %v1568_v17  ;;  %v1819_v39 = vld [vmem:[#allocation3 + $0x1f0] sm:$0xff]  ;;  %v1809_v17 = vld [vmem:[#allocation3 + $0x1a0] sm:$0xff] }
 0x4ff   :  { %1611 = vst.msk [vmem:[#allocation3 + $0xd0] sm:$0xff] %vm588_vm8, %v1602_v33  ;;  %v1793_v33 = vld [vmem:[#allocation3 + $0x120] sm:$0xff] }
 0x504   :  { %v1730_v34 = vpop.permute.xlu0 %1729  ;;  %v1650_v0 = vpop.permute.xlu2 %1649  ;;  %v1803_v45 = vld [vmem:[#allocation3 + $0x170] sm:$0xff] }
 0x505   :  { %1739 = vst.msk [vmem:[#allocation3 + $0x1d0] sm:$0xff] %vm588_vm8, %v1730_v34  ;;  %v1554_v35 = vpop.permute.xlu1 %1553  ;;  %v1769_v34 = vld [vmem:[#allocation3 + $0x60] sm:$0xff] }
 0x506   :  { %1563 = vst.msk [vmem:[#allocation3 + $0x70] sm:$0xff] %vm588_vm8, %v1554_v35 }
 0x507   :  { %1659 = vst.msk [vmem:[#allocation3 + $0x130] sm:$0xff] %vm588_vm8, %v1650_v0 }
 0x50c   :  { %v1714_v8 = vpop.permute.xlu0 %1713  ;;  %v1634_v14 = vpop.permute.xlu2 %1633  ;;  %v1815_v51 = vld [vmem:[#allocation3 + $0x1d0] sm:$0xff] }
 0x50d   :  { %1723 = vst.msk [vmem:[#allocation3 + $0x1b0] sm:$0xff] %vm588_vm8, %v1714_v8  ;;  %v1618_v61 = vpop.permute.xlu1 %1617  ;;  %v1771_v15 = vld [vmem:[#allocation3 + $0x70] sm:$0xff] }
 0x50e   :  { %1627 = vst.msk [vmem:[#allocation3 + $0xf0] sm:$0xff] %vm588_vm8, %v1618_v61  ;;  %v1795_v28 = vld [vmem:[#allocation3 + $0x130] sm:$0xff] }
 0x50f   :  { %1643 = vst.msk [vmem:[#allocation3 + $0x110] sm:$0xff] %vm588_vm8, %v1634_v14 }
 0x514   :  { %v1698_v18 = vpop.permute.xlu0 %1697  ;;  %v1748_v36 = vpop.permute.xlu2 %1747  ;;  %v1811_v29 = vld [vmem:[#allocation3 + $0x1b0] sm:$0xff] }
 0x515   :  { %1707 = vst.msk [vmem:[#allocation3 + $0x190] sm:$0xff] %vm588_vm8, %v1698_v18  ;;  %v1522_v37 = vpop.permute.xlu1 %1521 }
 0x516   :  { %1531 = vst.msk [vmem:[#allocation3 + $0x30] sm:$0xff] %vm588_vm8, %v1522_v37 }
 0x517   :  { %1756 = vst.msk [vmem:[#allocation3 + $0x1f8] sm:$0xff] %vm588_vm8, %v1748_v36  ;;  %v1791_v36 = vld [vmem:[#allocation3 + $0x110] sm:$0xff] }
 0x51c   :  { %v1540_v11 = vpop.permute.xlu0 %1539  ;;  %v1684_v38 = vpop.permute.xlu2 %1683  ;;  %v1807_v37 = vld [vmem:[#allocation3 + $0x190] sm:$0xff] }
 0x51d   :  { %v1666_v9 = vpop.permute.xlu1 %1665  ;;  %1548 = vst.msk [vmem:[#allocation3 + $0x58] sm:$0xff] %vm588_vm8, %v1540_v11  ;;  %v1767_v11 = vld [vmem:[#allocation3 + $0x50] sm:$0xff] }
 0x51e   :  { %1675 = vst.msk [vmem:[#allocation3 + $0x150] sm:$0xff] %vm588_vm8, %v1666_v9  ;;  %v1820_v1 = vld [vmem:[#allocation3 + $0x1f8] sm:$0xff] }
 0x51f   :  { %1692 = vst.msk [vmem:[#allocation3 + $0x178] sm:$0xff] %vm588_vm8, %v1684_v38  ;;  %1908 = vmatpush.msrb.mxu2 %v1820_v1  ;;  %v1787_v38 = vld [vmem:[#allocation3 + $0xf0] sm:$0xff]  ;;  %v1806_v1 = vld [vmem:[#allocation3 + $0x188] sm:$0xff] }
 0x521   :  { %1909 = vmatpush.msrb.mxu2 %v1819_v39  ;;  %v1766_v39 = vld [vmem:[#allocation3 + $0x48] sm:$0xff] }
 0x523   :  { %1910 = vmatpush.msrb.mxu2 %v1818_v40  ;;  %v1786_v40 = vld [vmem:[#allocation3 + $0xe8] sm:$0xff] }
 0x524   :  { %v1524_v42 = vpop.permute.xlu0 %1523  ;;  %v1732_v26 = vpop.permute.xlu2 %1731  ;;  %v1768_v61 = vld [vmem:[#allocation3 + $0x58] sm:$0xff] }
 0x525   :  { %1911 = vmatpush.msrb.mxu2 %v1817_v41  ;;  %v1586_v44 = vpop.permute.xlu1 %1585  ;;  %1532 = vst.msk [vmem:[#allocation3 + $0x38] sm:$0xff] %vm588_vm8, %v1524_v42  ;;  %v1799_v20 = vld [vmem:[#allocation3 + $0x150] sm:$0xff]  ;;  %v1765_v41 = vld [vmem:[#allocation3 + $0x40] sm:$0xff] }
 0x526   :  { %1595 = vst.msk [vmem:[#allocation3 + $0xb0] sm:$0xff] %vm588_vm8, %v1586_v44  ;;  %v1804_v6 = vld [vmem:[#allocation3 + $0x178] sm:$0xff]  ;;  %v1785_v42 = vld [vmem:[#allocation3 + $0xe0] sm:$0xff] }
 0x527   :  { %1740 = vst.msk [vmem:[#allocation3 + $0x1d8] sm:$0xff] %vm588_vm8, %v1732_v26  ;;  %1879 = vmatpush.msrb.mxu1 %v1804_v6 }
 0x529   :  { %1880 = vmatpush.msrb.mxu1 %v1803_v45 }
 0x52b   :  { %1881 = vmatpush.msrb.mxu1 %v1802_v46 }
 0x52c   :  { %v1668_v48 = vpop.permute.xlu0 %1667  ;;  %v1652_v49 = vpop.permute.xlu2 %1651  ;;  %v1764_v45 = vld [vmem:[#allocation3 + $0x38] sm:$0xff] }
 0x52d   :  { %1882 = vmatpush.msrb.mxu1 %v1801_v47  ;;  %v1570_v50 = vpop.permute.xlu1 %1569  ;;  %1676 = vst.msk [vmem:[#allocation3 + $0x158] sm:$0xff] %vm588_vm8, %v1668_v48  ;;  %v1763_v47 = vld [vmem:[#allocation3 + $0x30] sm:$0xff] }
 0x52e   :  { %1579 = vst.msk [vmem:[#allocation3 + $0x90] sm:$0xff] %vm588_vm8, %v1570_v50  ;;  %v1816_v7 = vld [vmem:[#allocation3 + $0x1d8] sm:$0xff]  ;;  %v1783_v48 = vld [vmem:[#allocation3 + $0xd0] sm:$0xff]  ;;  %v1782_v50 = vld [vmem:[#allocation3 + $0xc8] sm:$0xff] }
 0x52f   :  { %1660 = vst.msk [vmem:[#allocation3 + $0x138] sm:$0xff] %vm588_vm8, %v1652_v49  ;;  %1912 = vmatpush.msrb.mxu2 %v1816_v7  ;;  %v1762_v49 = vld [vmem:[#allocation3 + $0x28] sm:$0xff]  ;;  %v1761_v7 = vld [vmem:[#allocation3 + $0x20] sm:$0xff] }
 0x531   :  { %1913 = vmatpush.msrb.mxu2 %v1815_v51  ;;  %v1781_v51 = vld [vmem:[#allocation3 + $0xc0] sm:$0xff] }
 0x533   :  { %1914 = vmatpush.msrb.mxu2 %v1814_v55 }
 0x534   :  { %v1716_v59 = vpop.permute.xlu0 %1715  ;;  %v1636_v60 = vpop.permute.xlu2 %1635  ;;  %v1800_v63 = vld [vmem:[#allocation3 + $0x158] sm:$0xff] }
 0x535   :  { %1915 = vmatpush.msrb.mxu2 %v1813_v56  ;;  %1724 = vst.msk [vmem:[#allocation3 + $0x1b8] sm:$0xff] %vm588_vm8, %v1716_v59  ;;  %v1556_v5 = vpop.permute.xlu1 %1555  ;;  %1883 = vmatpush.msrb.mxu1 %v1800_v63  ;;  %v1760_v59 = vld [vmem:[#allocation3 + $0x18] sm:$0xff]  ;;  %v1779_v63 = vld [vmem:[#allocation3 + $0xb0] sm:$0xff] }
 0x536   :  { %1564 = vst.msk [vmem:[#allocation3 + $0x78] sm:$0xff] %vm588_vm8, %v1556_v5  ;;  %v1796_v57 = vld [vmem:[#allocation3 + $0x138] sm:$0xff]  ;;  %v2228_v5 = vld [vmem:[%s3557_s2 + $0x10] sm:$0xff] }
 0x537   :  { %1644 = vst.msk [vmem:[#allocation3 + $0x118] sm:$0xff] %vm588_vm8, %v1636_v60  ;;  %1884 = vmatpush.msrb.mxu1 %v1799_v20  ;;  %v1758_v20 = vld [vmem:[#allocation3 + $0x8] sm:$0xff] }
 0x539   :  { %1885 = vmatpush.msrb.mxu1 %v1798_v21  ;;  %v1778_v21 = vld [vmem:[#allocation3 + $0xa8] sm:$0xff] }
 0x53b   :  { %1886 = vmatpush.msrb.mxu1 %v1797_v22  ;;  %v1757_v22 = vld [vmem:[#allocation3] sm:$0xff] }
 0x53c   :  { %v1700_v23 = vpop.permute.xlu0 %1699  ;;  %v1632_v24 = vpop.permute.xlu2 %1631  ;;  %v1812_v3 = vld [vmem:[#allocation3 + $0x1b8] sm:$0xff] }
 0x53d   :  { %1708 = vst.msk [vmem:[#allocation3 + $0x198] sm:$0xff] %vm588_vm8, %v1700_v23  ;;  %v1620_v25 = vpop.permute.xlu1 %1619  ;;  %v1772_v27 = vld [vmem:[#allocation3 + $0x78] sm:$0xff]  ;;  %1887 = vmatpush.msrb.mxu1 %v1796_v57  ;;  %1916 = vmatpush.msrb.mxu2 %v1812_v3  ;;  %v1777_v23 = vld [vmem:[#allocation3 + $0xa0] sm:$0xff]  ;;  %v1775_v3 = vld [vmem:[#allocation3 + $0x90] sm:$0xff] }
 0x53e   :  { %1628 = vst.msk [vmem:[#allocation3 + $0xf8] sm:$0xff] %vm588_vm8, %v1620_v25  ;;  %1821 = vmatpush.msra.mxu3 %v1772_v27  ;;  %v1792_v35 = vld [vmem:[#allocation3 + $0x118] sm:$0xff]  ;;  %v1774_v25 = vld [vmem:[#allocation3 + $0x88] sm:$0xff] }
 0x53f   :  { %1642 = vst.msk [vmem:[#allocation3 + $0x108] sm:$0xff] %vm588_vm8, %v1632_v24  ;;  %1888 = vmatpush.msrb.mxu1 %v1795_v28  ;;  %1917 = vmatpush.msrb.mxu2 %v1811_v29  ;;  %v2231_v28 = vld [vmem:[%s3557_s2 + $0x50] sm:$0xff]  ;;  %v2234_v29 = vld [vmem:[%s3557_s2 + $0x48] sm:$0xff] }
 0x540   :  { %1822 = vmatpush.msra.mxu3 %v1771_v15 }
 0x541   :  { %1889 = vmatpush.msrb.mxu1 %v1794_v30  ;;  %1918 = vmatpush.msrb.mxu2 %v1810_v31 }
 0x542   :  { %1823 = vmatpush.msra.mxu3 %v1770_v12 }
 0x543   :  { %1890 = vmatpush.msrb.mxu1 %v1793_v33  ;;  %1919 = vmatpush.msrb.mxu2 %v1809_v17 }
 0x544   :  { %1824 = vmatpush.msra.mxu3 %v1769_v34  ;;  %v1694_v0 = vpop.permute.xlu0 %1693  ;;  %v1808_v8 = vld [vmem:[#allocation3 + $0x198] sm:$0xff] }
 0x545   :  { %1705 = vst.msk [vmem:[#allocation3 + $0x180] sm:$0xff] %vm588_vm8, %v1694_v0  ;;  %v1604_v14 = vpop.permute.xlu1 %1603  ;;  %v1788_v18 = vld [vmem:[#allocation3 + $0xf8] sm:$0xff]  ;;  %1891 = vmatpush.msrb.mxu1 %v1792_v35  ;;  %1920 = vmatpush.msrb.mxu2 %v1808_v8 }
 0x546   :  { %1612 = vst.msk [vmem:[#allocation3 + $0xd8] sm:$0xff] %vm588_vm8, %v1604_v14  ;;  %1825 = vmatpush.msra.mxu3 %v1768_v61  ;;  %1850 = vmatpush.msrb.mxu0 %v1788_v18  ;;  %v1790_v9 = vld [vmem:[#allocation3 + $0x108] sm:$0xff] }
 0x547   :  { %1892 = vmatpush.msrb.mxu1 %v1791_v36  ;;  %1921 = vmatpush.msrb.mxu2 %v1807_v37 }
 0x548   :  { %1826 = vmatpush.msra.mxu3 %v1767_v11  ;;  %1851 = vmatpush.msrb.mxu0 %v1787_v38 }
 0x549   :  { %1893 = vmatpush.msrb.mxu1 %v1790_v9  ;;  %1922 = vmatpush.msrb.mxu2 %v1806_v1 }
 0x54a   :  { %1827 = vmatpush.msra.mxu3 %v1766_v39  ;;  %1852 = vmatpush.msrb.mxu0 %v1786_v40 }
 0x54c   :  { %1828 = vmatpush.msra.mxu3 %v1765_v41  ;;  %1853 = vmatpush.msrb.mxu0 %v1785_v42  ;;  %v1630_v26 = vpop.permute.xlu0 %1629  ;;  %v1805_v44 = vld [vmem:[#allocation3 + $0x180] sm:$0xff] }
 0x54d   :  { %1641 = vst.msk [vmem:[#allocation3 + $0x100] sm:$0xff] %vm588_vm8, %v1630_v26  ;;  %v1588_v6 = vpop.permute.xlu1 %1587  ;;  %v1784_v46 = vld [vmem:[#allocation3 + $0xd8] sm:$0xff]  ;;  %1923 = vmatpush.msrb.mxu2 %v1805_v44 }
 0x54e   :  { %1596 = vst.msk [vmem:[#allocation3 + $0xb8] sm:$0xff] %vm588_vm8, %v1588_v6  ;;  %1829 = vmatpush.msra.mxu3 %v1764_v45  ;;  %1854 = vmatpush.msrb.mxu0 %v1784_v46 }
 0x54f   :  { %1924 = vmatmul.f32.vlgmr.msrb.gmra.mxu2 %v3124_v32  ;;  %v1759_v32 = vld [vmem:[#allocation3 + $0x10] sm:$0xff] }
 0x550   :  { %1830 = vmatpush.msra.mxu3 %v1763_v47  ;;  %1855 = vmatpush.msrb.mxu0 %v1783_v48 }
 0x552   :  { %1831 = vmatpush.msra.mxu3 %v1762_v49  ;;  %1856 = vmatpush.msrb.mxu0 %v1782_v50 }
 0x554   :  { %1832 = vmatpush.msra.mxu3 %v1761_v7  ;;  %1857 = vmatpush.msrb.mxu0 %v1781_v51  ;;  %v1789_v55 = vld [vmem:[#allocation3 + $0x100] sm:$0xff] }
 0x555   :  { %v1572_v56 = vpop.permute.xlu1 %1571  ;;  %v1780_v60 = vld [vmem:[#allocation3 + $0xb8] sm:$0xff]  ;;  %1894 = vmatpush.msrb.mxu1 %v1789_v55 }
 0x556   :  { %1580 = vst.msk [vmem:[#allocation3 + $0x98] sm:$0xff] %vm588_vm8, %v1572_v56  ;;  %1833 = vmatpush.msra.mxu3 %v1760_v59  ;;  %1858 = vmatpush.msrb.mxu0 %v1780_v60 }
 0x557   :  { %1895 = vmatmul.f32.vlgmr.msrb.gmra.mxu1 %v2228_v5  ;;  %1927 = vmatmul.f32.gmra.mxu2 %v3147_v43  ;;  %v2229_v43 = vld [vmem:[%s3557_s2 + $0x30] sm:$0xff] }
 0x558   :  { %1834 = vmatpush.msra.mxu3 %v1759_v32  ;;  %1859 = vmatpush.msrb.mxu0 %v1779_v63 }
 0x55a   :  { %1835 = vmatpush.msra.mxu3 %v1758_v20  ;;  %1860 = vmatpush.msrb.mxu0 %v1778_v21 }
 0x55c   :  { %1836 = vmatpush.msra.mxu3 %v1757_v22  ;;  %1861 = vmatpush.msrb.mxu0 %v1777_v23 }
 0x55d   :  { %v1566_v24 = vpop.permute.xlu1 %1565  ;;  %1837 = vmatmul.f32.vlgmr.msra.gmra.mxu3 %v3193_v4  ;;  %v1776_v57 = vld [vmem:[#allocation3 + $0x98] sm:$0xff]  ;;  %v2230_v4 = vld [vmem:[%s3557_s2 + $0x8] sm:$0xff] }
 0x55e   :  { %1577 = vst.msk [vmem:[#allocation3 + $0x80] sm:$0xff] %vm588_vm8, %v1566_v24  ;;  %1862 = vmatpush.msrb.mxu0 %v1776_v57 }
 0x55f   :  { %1898 = vmatmul.f32.gmra.mxu1 %v2229_v43  ;;  %1930 = vmatmul.f32.gmra.mxu2 %v3169_v52  ;;  %v2232_v52 = vld [vmem:[%s3557_s2 + $0x28] sm:$0xff] }
 0x560   :  { %1863 = vmatpush.msrb.mxu0 %v1775_v3 }
 0x562   :  { %1864 = vmatpush.msrb.mxu0 %v1774_v25 }
 0x565   :  { %1840 = vmatmul.f32.gmra.mxu3 %v3201_v10  ;;  %v1773_v27 = vld [vmem:[#allocation3 + $0x80] sm:$0xff]  ;;  %v2233_v10 = vld [vmem:[%s3557_s2 + $0x70] sm:$0xff] }
 0x566   :  { %1865 = vmatpush.msrb.mxu0 %v1773_v27  ;;  %v2022_v27 = vld [vmem:[%s3560_s5 + $0x70] sm:$0xff] }
 0x567   :  { %1866 = vmatmul.f32.vlgmr.msrb.gmra.mxu0 %v2230_v4  ;;  %1901 = vmatmul.f32.gmra.mxu1 %v2231_v28  ;;  %v2021_v4 = vld [vmem:[%s3560_s5 + $0x68] sm:$0xff]  ;;  %v2020_v28 = vld [vmem:[%s3560_s5 + $0x60] sm:$0xff] }
 0x568   :  { %1933 = vmatmul.f32.gmra.mxu2 %v3184_v62  ;;  %v2235_v62 = vld [vmem:[%s3557_s2 + $0x68] sm:$0xff]  ;;  %s2329_s2 = smov 96  }
 0x56d   :  { %1843 = vmatmul.f32.gmra.mxu3 %v3211_v13  ;;  %v3475_v13 = vpop.f32.mrf.mxu3 }
 0x56e   :  { %1095 = vrot.lane.b32.xlu1 %v3475_v13, %s3755_s10  ;;  %1100 = vrot.lane.b32.xlu0 %v3475_v13, %s2328_s30  ;;  %1093 = vst.msk [vmem:[#allocation4] sm:$0x1] %vm1092_vm11, %v3475_v13 }
 0x56f   :  { %1869 = vmatmul.f32.gmra.mxu0 %v2232_v52  ;;  %1904 = vmatmul.f32.gmra.mxu1 %v2233_v10  ;;  %v2019_v52 = vld [vmem:[%s3560_s5 + $0x58] sm:$0xff]  ;;  %v2018_v10 = vld [vmem:[%s3560_s5 + $0x50] sm:$0xff] }
 0x575   :  { %1846 = vmatmul.f32.gmra.mxu3 %v3221_v16 }
 0x577   :  { %1872 = vmatmul.f32.gmra.mxu0 %v2234_v29  ;;  %v2017_v29 = vld [vmem:[%s3560_s5 + $0x48] sm:$0xff] }
 0x57f   :  { %1875 = vmatmul.f32.gmra.mxu0 %v2235_v62  ;;  %v2016_v62 = vld [vmem:[%s3560_s5 + $0x40] sm:$0xff] }
 0x5d2   :  { %v1925_v30 = vpop.f32.mrf.mxu2 }
 0x5d4   :  { %v1896_v16 = vpop.f32.mrf.mxu1 }
 0x5da   :  { %v1928_v17 = vpop.f32.mrf.mxu2 }
 0x5dc   :  { %v1899_v33 = vpop.f32.mrf.mxu1 }
 0x5e0   :  { %v1838_v15 = vpop.f32.mrf.mxu3  ;;  %v1096_v3 = vpop.permute.xlu1 %1095 }
 0x5e1   :  { %v1839_v9 = vadd.f32 %v1838_v15, %v3242_v2  ;;  %v1101_v43 = vpop.permute.xlu0 %1100  ;;  %1099 = vst.msk [vmem:[#allocation4 - $0x1] sm:$0x2] %vm1098_vm9, %v1096_v3  ;;  %v2013_v15 = vld [vmem:[%s3560_s5 + $0x28] sm:$0xff] }
 0x5e2   :  { %v1931_v61 = vpop.f32.mrf.mxu2  ;;  %1104 = vst.msk [vmem:[#allocation4 - $0x2] sm:$0x4] %vm1103_vm3, %v1101_v43 }
 0x5e4   :  { %v1867_v31 = vpop.f32.mrf.mxu0  ;;  %v1902_v35 = vpop.f32.mrf.mxu1 }
 0x5e5   :  { %v1868_v39 = vadd.f32 %v1867_v31, %v1839_v9  ;;  %v2011_v31 = vld [vmem:[%s3560_s5 + $0x18] sm:$0xff] }
 0x5e7   :  { %v1897_v45 = vadd.f32 %v1896_v16, %v1868_v39  ;;  %v2014_v16 = vld [vmem:[%s3560_s5 + $0x30] sm:$0xff] }
 0x5e8   :  { %v1841_v12 = vpop.f32.mrf.mxu3 }
 0x5e9   :  { %v1842_v18 = vadd.f32 %v1841_v12, %v3238_v58  ;;  %v1926_v49 = vadd.f32 %v1925_v30, %v1897_v45  ;;  %v2012_v30 = vld [vmem:[%s3560_s5 + $0x20] sm:$0xff]  ;;  %v2010_v12 = vld [vmem:[%s3560_s5 + $0x10] sm:$0xff] }
 0x5eb   :  { %v1941_v2 = vmin.f32 %v1926_v49, 0.0  ;;  %vm1937_vm7 = vcmp.gt.f32.partialorder %v1926_v49, 0.0 }
 0x5ec   :  { %v1870_v34 = vpop.f32.mrf.mxu0  ;;  %v1905_v26 = vpop.f32.mrf.mxu1 }
 0x5ed   :  { %v1871_v37 = vadd.f32 %v1870_v34, %v1842_v18  ;;  %v1945_v56 = vmul.f32 1.442695, %v1941_v2 }
 0x5ef   :  { %v1900_v40 = vadd.f32 %v1899_v33, %v1871_v37  ;;  %v2009_v33 = vld [vmem:[%s3560_s5 + $0x8] sm:$0xff] }
 0x5f0   :  { %v1844_v0 = vpop.f32.mrf.mxu3 }
 0x5f1   :  { %v1845_v8 = vadd.f32 %v1844_v0, %v3236_v54  ;;  %v1934_v54 = vpop.f32.mrf.mxu2  ;;  %v1929_v46 = vadd.f32 %v1928_v17, %v1900_v40  ;;  %v2008_v17 = vld [vmem:[%s3560_s5] sm:$0xff] }
 0x5f3   :  { %v1942_v50 = vmin.f32 %v1929_v46, 0.0  ;;  %vm1938_vm14 = vcmp.gt.f32.partialorder %v1929_v46, 0.0 }
 0x5f4   :  { %v1873_v14 = vpop.f32.mrf.mxu0 }
 0x5f5   :  { %v1874_v36 = vadd.f32 %v1873_v14, %v1845_v8  ;;  %v1947_v55 = vmul.f32 1.442695, %v1942_v50 }
 0x5f7   :  { %v1903_v11 = vadd.f32 %v1902_v35, %v1874_v36 }
 0x5f8   :  { %v1847_v38 = vpop.f32.mrf.mxu3 }
 0x5f9   :  { %v1932_v1 = vadd.f32 %v1931_v61, %v1903_v11  ;;  %v1848_v41 = vadd.f32 %v1847_v38, %v3234_v53  ;;  %v2167_v61 = vld [vmem:[%s3562_s7] ss:$0 sm:$0xff] }
 0x5fb   :  { %v1943_v6 = vmin.f32 %v1932_v1, 0.0  ;;  %vm1939_vm13 = vcmp.gt.f32.partialorder %v1932_v1, 0.0 }
 0x5fc   :  { %v1876_v42 = vpop.f32.mrf.mxu0 }
 0x5fd   :  { %v1877_v44 = vadd.f32 %v1876_v42, %v1848_v41  ;;  %v1949_v48 = vmul.f32 1.442695, %v1943_v6 }
 0x5ff   :  { %v1906_v47 = vadd.f32 %v1905_v26, %v1877_v44  ;;  %2192 = vpow2.f32 %v1949_v48 }
 0x601   :  { %v1935_v58 = vadd.f32 %v1934_v54, %v1906_v47 }
 0x603   :  { %v1944_v7 = vmin.f32 %v1935_v58, 0.0  ;;  %vm1940_vm0 = vcmp.gt.f32.partialorder %v1935_v58, 0.0 }
 0x605   :  { %v1951_v51 = vmul.f32 1.442695, %v1944_v7  ;;  %v2193_v53 = vpop.eup %2192 }
 0x606   :  { %v2086_v32 = vadd.f32 -1.0, %v2193_v53 }
 0x607   :  { %2194 = vpow2.f32 %v1951_v51 }
 0x608   :  { %2196 = vpow2.f32 %v1947_v55  ;;  %v1959_v21 = vsel %vm1939_vm13, %v1932_v1, %v2086_v32 }
 0x609   :  { %2198 = vpow2.f32 %v1945_v56 }
 0x60d   :  { %v2195_v59 = vpop.eup %2194 }
 0x60e   :  { %v2087_v60 = vadd.f32 -1.0, %v2195_v59  ;;  %v2197_v5 = vpop.eup %2196 }
 0x60f   :  { %v2085_v20 = vadd.f32 -1.0, %v2197_v5  ;;  %v2199_v22 = vpop.eup %2198 }
 0x610   :  { %v1960_v63 = vsel %vm1940_vm0, %v1935_v58, %v2087_v60  ;;  %v2084_v23 = vadd.f32 -1.0, %v2199_v22 }
 0x611   :  { %2088 = vmatpush.xpose.msk.msrb.mxu3 %vm588_vm8, %v1960_v63  ;;  %v1958_v24 = vsel %vm1938_vm14, %v1929_v46, %v2085_v20 }
 0x612   :  { %v1957_v57 = vsel %vm1937_vm7, %v1926_v49, %v2084_v23 }
 0x615   :  { %2089 = vmatpush.xpose.msk.msrb.mxu3 %vm588_vm8, %v1959_v21 }
 0x619   :  { %2090 = vmatpush.xpose.msk.msrb.mxu3 %vm588_vm8, %v1958_v24 }
 0x61d   :  { %2091 = vmatpush.xpose.msk.msrb.mxu3 %vm588_vm8, %v1957_v57 }
 0x620   :  { %2092 = vmatmul.msk.f32.vlgmr.msrb.gmra.mxu3 %vm588_vm8, %v3428_v19  ;;  %v2023_v19 = vld [vmem:[%s3560_s5 + $0x78] sm:$0xff]  ;;  %vm1108_vm8 = vcmask 1044227  }
 0x621   :  { %2028 = vmatpush.msra.mxu0 %v2023_v19 }
 0x623   :  { %2029 = vmatpush.msra.mxu0 %v2022_v27 }
 0x625   :  { %2030 = vmatpush.msra.mxu0 %v2021_v4 }
 0x627   :  { %2031 = vmatpush.msra.mxu0 %v2020_v28 }
 0x629   :  { %2032 = vmatpush.msra.mxu0 %v2019_v52 }
 0x62b   :  { %2033 = vmatpush.msra.mxu0 %v2018_v10 }
 0x62d   :  { %2034 = vmatpush.msra.mxu0 %v2017_v29 }
 0x62f   :  { %2035 = vmatpush.msra.mxu0 %v2016_v62 }
 0x6a3   :  { %v1990_v25 = vpop.f32.mrf.mxu3 }
 0x6a4   :  { %1993 = vst.msk [vmem:[#allocation4 + $0x1] sm:$0x1] %vm1092_vm11, %v1990_v25  ;;  %1999 = vrot.lane.b32.xlu1 %v1990_v25, %s2328_s30  ;;  %1995 = vrot.lane.b32.xlu2 %v1990_v25, %s3755_s10 }
 0x6a5   :  { %2003 = vrot.lane.b32.xlu0 %v1990_v25, %s2329_s2 }
 0x6ac   :  { %1105 = vrot.lane.b32.xlu2 %v3475_v13, %s2329_s2  ;;  %v2015_v13 = vld [vmem:[%s3560_s5 + $0x38] sm:$0xff]  ;;  %s2330_s5 = smov [#allocation5]  }
 0x6ad   :  { %2036 = vmatpush.msra.mxu0 %v2015_v13  ;;  %s2055_s10 = sshll.u32 %s2330_s5, 4  ;;  %s2056_s10 = int_to_ptr.vmem [resolvable:$true] %s2055_s10 }
 0x6af   :  { %2037 = vmatpush.msra.mxu0 %v2014_v16 }
 0x6b1   :  { %2038 = vmatpush.msra.mxu0 %v2013_v15 }
 0x6b3   :  { %2039 = vmatpush.msra.mxu0 %v2012_v30 }
 0x6b5   :  { %2040 = vmatpush.msra.mxu0 %v2011_v31 }
 0x6b7   :  { %2041 = vmatpush.msra.mxu0 %v2010_v12 }
 0x6b9   :  { %2042 = vmatpush.msra.mxu0 %v2009_v33 }
 0x6bb   :  { %2043 = vmatpush.msra.mxu0 %v2008_v17 }
 0x6fe   :  { %v1996_v34 = vpop.permute.xlu2 %1995 }
 0x6ff   :  { %1998 = vst.msk [vmem:[#allocation4] sm:$0x2] %vm1098_vm9, %v1996_v34 }
 0x706   :  { %v1106_v0 = vpop.permute.xlu2 %1105 }
 0x707   :  { %1109 = vst.msk [vmem:[#allocation4 - $0x3] sm:$0x8] %vm1108_vm8, %v1106_v0 }
 0x716   :  { %v2000_v35 = vpop.permute.xlu1 %1999 }
 0x717   :  { %2002 = vst.msk [vmem:[#allocation4 - $0x1] sm:$0x4] %vm1103_vm3, %v2000_v35  ;;  %v2004_v8 = vpop.permute.xlu0 %2003 }
 0x718   :  { %2006 = vst.msk [vmem:[#allocation4 - $0x2] sm:$0x8] %vm1108_vm8, %v2004_v8 }
 0x71f   :  { %v2007_v14 = vld [vmem:[#allocation4] sm:$0x3] }
 0x720   :  { %2044 = vmatmul.f32.vlgmr.msra.gmra.mxu0 %v2007_v14 }
 0x79d   :  { %v2045_v18 = vpop.f32.mrf.mxu0 }
 0x79e   :  { %v2046_v36 = vadd.f32 %v2167_v61, %v2045_v18 }
 0x7a0   :  { %2049 = vst.msk [vmem:[#allocation5] sm:$0x3] %vm2048_vm12, %v2046_v36 }
 0x7a1   :  { %2060 = dma.vmem_to_hbm [thread:$0]  %s2056_s10, 32, %s2058_s19, [#allocation6]  }
 0x7a2   :  { %2260 = dma.done.wait [#allocation6], 32  }
 0x7a3   :  { %2261 = vsyncadd [#allocation6], 4294967264 }
 0x7a4   :  { %2065 = vsyncpa [#allocation6], 1 }

</bundles_post_ra>
